<compile_context>
chip_gen: v6e
topology: v6e:2x2x1
jax: 0.10.0
libtpu: 0.0.40
codegen_flags: <defaults>
</compile_context>

<pallas_src>
import functools

import jax
import jax.numpy as jnp
from jax.experimental import pallas as pl
from jax.experimental.pallas import tpu as pltpu

LATENT_DIM = 10
IMG_SHAPE = (1, 28, 28)
IMG_FLAT = 1 * 28 * 28          # 784
OUT_PAD = 896                   # 7 * 128: lane-dense padded output width
HIDDEN = [128, 256, 512, 1024]


def _round_up(x, m):
    return ((x + m - 1) // m) * m


def _cdiv(a, b):
    return -(-a // b)


def _leaky_relu(x, slope=0.2):
    # max(x, slope*x) == LeakyReLU(slope) for 0 < slope < 1.
    # 2 VALU ops (mul+max) instead of 3 (cmp+mul+select).
    return jnp.maximum(x, slope * x)


def generator_kernel(z_ref,
                     w1_ref, b1_ref,
                     w2_ref, b2_ref,
                     w3_ref, b3_ref,
                     w4_ref, b4_ref,
                     w5_ref, b5_ref,
                     out_ref):
    """Fused 5-layer MLP: all matmuls + activations in one kernel invocation.

    Weights may be f32 or bf16; matmul accumulation is always f32
    (preferred_element_type) and the bias/LeakyReLU/tanh epilogue runs in f32.
    Inter-layer activations are carried in the weight dtype (bf16 halves VPU
    and VMEM traffic between the big matmuls; no-op cast for f32 weights).
    """
    wdt = w1_ref.dtype

    def dense(h, w_ref, b_ref):
        acc = jnp.dot(h.astype(w_ref.dtype), w_ref[...],
                      preferred_element_type=jnp.float32)
        return acc + b_ref[...].astype(jnp.float32)

    h = z_ref[...]
    h = _leaky_relu(dense(h, w1_ref, b1_ref)).astype(wdt)
    h = _leaky_relu(dense(h, w2_ref, b2_ref)).astype(wdt)
    h = _leaky_relu(dense(h, w3_ref, b3_ref)).astype(wdt)
    h = _leaky_relu(dense(h, w4_ref, b4_ref)).astype(wdt)
    # Last layer is zero-padded 784 -> 896 columns; tanh(0) = 0 in the pad.
    h = jnp.tanh(dense(h, w5_ref, b5_ref))

    out_ref[...] = h.astype(out_ref.dtype)


def init_generator_params(key):
    """Deterministic init mimicking PyTorch nn.Linear defaults:
    U(-1/sqrt(fan_in), 1/sqrt(fan_in)) for both weight and bias."""
    dims = [LATENT_DIM] + HIDDEN + [IMG_FLAT]
    params = []
    for i in range(len(dims) - 1):
        fan_in, fan_out = dims[i], dims[i + 1]
        key, kw, kb = jax.random.split(key, 3)
        bound = 1.0 / jnp.sqrt(jnp.float32(fan_in))
        # weight stored as (in, out) so the kernel does x @ W
        w = jax.random.uniform(kw, (fan_in, fan_out), jnp.float32, -bound, bound)
        b = jax.random.uniform(kb, (1, fan_out), jnp.float32, -bound, bound)
        params.append((w, b))
    return params


def prepare_params(params, weight_dtype=jnp.bfloat16):
    """Flatten (w, b) pairs for the kernel.

    * Last layer zero-padded from 784 to OUT_PAD output columns (lane-dense
      stores; tanh(0)=0 keeps the pad benign).
    * Weights cast to `weight_dtype`.  bf16 is the default everywhere: the MXU
      is bf16-native on v5e/v6e/v7x and weight HBM/VMEM bytes halve (the
      dominant term at small batch).  Pass jnp.float32 for exact PyTorch
      numerics.  Biases stay f32.
    """
    flat = []
    n = len(params)
    for i, (w, b) in enumerate(params):
        if i == n - 1:
            w = jnp.pad(w, ((0, 0), (0, OUT_PAD - w.shape[1])))
            b = jnp.pad(b, ((0, 0), (0, OUT_PAD - b.shape[1])))
        flat.append(w.astype(weight_dtype))
        flat.append(b.astype(jnp.float32))
    return tuple(flat)


def _select_tiling(B, max_tile=256):
    """Balanced batch tiling.

    Pick the number of grid steps first (steps = cdiv(round_up(B,8), max_tile)),
    then the tile bt = round_up(cdiv(B8, steps), 8): padding is capped at a few
    rows instead of up to max_tile-1.  When the whole padded batch would be one
    >=256-row tile, split it in two so the ("parallel",) batch axis shards
    across both v7x TensorCores; small batches keep grid=1 so the VMEM-resident
    weights are only loaded into one core.
    """
    B8 = _round_up(max(B, 1), 8)
    steps = _cdiv(B8, max_tile)
    bt = _round_up(_cdiv(B8, steps), 8)
    if steps == 1 and bt >= 256:
        steps = 2
        bt = _round_up(_cdiv(B8, steps), 8)
    return bt, bt * steps, steps


@functools.partial(jax.jit, static_argnames=("max_batch_tile", "out_dtype"))
def generator_forward(z, params_flat, max_batch_tile=256, out_dtype=jnp.float32):
    """z: (B, LATENT_DIM) float32 -> image (B, 1, 28, 28) float32.

    out_dtype=jnp.bfloat16 halves output writeback (useful on v6e at large B);
    the wrapper upcasts back to f32.
    """
    B = z.shape[0]
    bt, Bp, steps = _select_tiling(B, max_batch_tile)
    if Bp != B:
        z = jnp.pad(z, ((0, Bp - B), (0, 0)))

    # Weights / biases: whole-array, single-buffered VMEM residents (no
    # pointless double-buffering of grid-constant blocks).
    weight_specs = [pl.BlockSpec(memory_space=pltpu.MemorySpace.VMEM)
                    for _ in params_flat]

    grid_spec = pltpu.PrefetchScalarGridSpec(
        num_scalar_prefetch=0,
        grid=(steps,),
        in_specs=[pl.BlockSpec((bt, LATENT_DIM), lambda i: (i, 0))]
                 + weight_specs,
        out_specs=pl.BlockSpec((bt, OUT_PAD), lambda i: (i, 0)),
    )

    # Advisory cost estimate so XLA schedules surrounding ops sensibly.
    dims = [LATENT_DIM] + HIDDEN + [OUT_PAD]
    matmul_flops = 2 * Bp * sum(a * b for a, b in zip(dims[:-1], dims[1:]))
    param_bytes = sum(int(p.size) * p.dtype.itemsize for p in params_flat)
    out_itemsize = jnp.dtype(out_dtype).itemsize
    bytes_accessed = (int(z.size) * z.dtype.itemsize + param_bytes
                      + Bp * OUT_PAD * out_itemsize)
    cost = pl.CostEstimate(flops=matmul_flops,
                           transcendentals=Bp * OUT_PAD,   # tanh
                           bytes_accessed=bytes_accessed)

    # Tight VMEM budget: resident weights + the two largest live f32 activation
    # slabs + double-buffered input/output tiles + margin.  ~8-17 MiB in
    # practice; cap at 32 MiB (leaves scoped-VMEM headroom even on v7x, 64 MiB).
    act_live = bt * (max(HIDDEN) + OUT_PAD) * 4
    io_tiles = 2 * bt * (LATENT_DIM * 4 + OUT_PAD * out_itemsize)
    vmem_limit = min(32 * 1024 * 1024,
                     param_bytes + 2 * act_live + io_tiles + 8 * 1024 * 1024)

    flat_img = pl.pallas_call(
        generator_kernel,
        out_shape=jax.ShapeDtypeStruct((Bp, OUT_PAD), out_dtype),
        grid_spec=grid_spec,
        cost_estimate=cost,
        compiler_params=pltpu.CompilerParams(
            dimension_semantics=("parallel",),   # batch tiles shard across TCs
            vmem_limit_bytes=int(vmem_limit),
        ),
    )(z, *params_flat)

    # Wrapper-side plumbing: drop batch / lane padding, upcast, reshape NCHW.
    img = flat_img[:B, :IMG_FLAT].astype(jnp.float32)
    return img.reshape(B, *IMG_SHAPE)


def generator_reference(z, params):
    """Pure-JAX f32 reference for correctness checking."""
    h = z
    for i, (w, b) in enumerate(params):
        h = h @ w + b
        h = jnp.where(h > 0, h, 0.2 * h) if i < len(params) - 1 else jnp.tanh(h)
    return h.reshape(z.shape[0], *IMG_SHAPE)


if __name__ == "__main__":
    key = jax.random.PRNGKey(0)
    key, kz = jax.random.split(key)

    B = 25  # matches opt.batch_size in the PyTorch spec
    z = jax.random.normal(kz, (B, LATENT_DIM), jnp.float32)

    params = init_generator_params(jax.random.PRNGKey(0))
    ref = generator_reference(z, params)

    # Default (production) path: bf16 weights + bf16 inter-layer activations,
    # f32 accumulation / epilogue.  Full-rate MXU on every generation.
    img_bf16 = generator_forward(z, prepare_params(params))   # bf16 default
    img_bf16 = jax.block_until_ready(img_bf16)
    assert img_bf16.shape == (B, 1, 28, 28), img_bf16.shape
    assert img_bf16.dtype == jnp.float32
    err_bf16 = float(jnp.max(jnp.abs(img_bf16 - ref)))
    assert err_bf16 < 1e-1, f"bf16 max abs error {err_bf16}"

    # f32-weight path: exact semantics of the PyTorch module.
    img_f32 = generator_forward(z, prepare_params(params, jnp.float32))
    img_f32 = jax.block_until_ready(img_f32)
    err_f32 = float(jnp.max(jnp.abs(img_f32 - ref)))
    assert err_f32 < 5e-4, f"f32 max abs error {err_f32}"

    # Exercise the balanced-tiling / dual-TC path (grid >= 2) once as well.
    B_big = 257
    z_big = jax.random.normal(key, (B_big, LATENT_DIM), jnp.float32)
    img_big = jax.block_until_ready(
        generator_forward(z_big, prepare_params(params)))
    ref_big = generator_reference(z_big, params)
    assert img_big.shape == (B_big, 1, 28, 28)
    err_big = float(jnp.max(jnp.abs(img_big - ref_big)))
    assert err_big < 1e-1, f"big-batch max abs error {err_big}"

    print("KERNEL_OK")
</pallas_src>

<mosaic_0001>
module attributes {stable_mosaic.version = 11 : i64} {
  func.func @generator_kernel(%arg0: i32, %arg1: memref<32x10xf32, #tpu.memory_space<vmem>>, %arg2: memref<10x128xbf16, #tpu.memory_space<vmem>>, %arg3: memref<1x128xf32, #tpu.memory_space<vmem>>, %arg4: memref<128x256xbf16, #tpu.memory_space<vmem>>, %arg5: memref<1x256xf32, #tpu.memory_space<vmem>>, %arg6: memref<256x512xbf16, #tpu.memory_space<vmem>>, %arg7: memref<1x512xf32, #tpu.memory_space<vmem>>, %arg8: memref<512x1024xbf16, #tpu.memory_space<vmem>>, %arg9: memref<1x1024xf32, #tpu.memory_space<vmem>>, %arg10: memref<1024x896xbf16, #tpu.memory_space<vmem>>, %arg11: memref<1x896xf32, #tpu.memory_space<vmem>>, %arg12: memref<32x896xf32, #tpu.memory_space<vmem>>) attributes {dimension_semantics = [#tpu.dimension_semantics<parallel>], iteration_bounds = array<i64: 1>, scalar_prefetch = 0 : i64, scratch_operands = 0 : i64, tpu.core_type = #tpu.core_type<tc>, window_params = [{transform_indices = @transform_0, window_bounds = array<i64: 32, 10>}, {pipeline_mode = #tpu.pipeline_mode<synchronous>, transform_indices = @transform_1, window_bounds = array<i64: 10, 128>}, {pipeline_mode = #tpu.pipeline_mode<synchronous>, transform_indices = @transform_2, window_bounds = array<i64: 1, 128>}, {pipeline_mode = #tpu.pipeline_mode<synchronous>, transform_indices = @transform_3, window_bounds = array<i64: 128, 256>}, {pipeline_mode = #tpu.pipeline_mode<synchronous>, transform_indices = @transform_4, window_bounds = array<i64: 1, 256>}, {pipeline_mode = #tpu.pipeline_mode<synchronous>, transform_indices = @transform_5, window_bounds = array<i64: 256, 512>}, {pipeline_mode = #tpu.pipeline_mode<synchronous>, transform_indices = @transform_6, window_bounds = array<i64: 1, 512>}, {pipeline_mode = #tpu.pipeline_mode<synchronous>, transform_indices = @transform_7, window_bounds = array<i64: 512, 1024>}, {pipeline_mode = #tpu.pipeline_mode<synchronous>, transform_indices = @transform_8, window_bounds = array<i64: 1, 1024>}, {pipeline_mode = #tpu.pipeline_mode<synchronous>, transform_indices = @transform_9, window_bounds = array<i64: 1024, 896>}, {pipeline_mode = #tpu.pipeline_mode<synchronous>, transform_indices = @transform_10, window_bounds = array<i64: 1, 896>}, {transform_indices = @transform_11, window_bounds = array<i64: 32, 896>}]} {
    %c0 = arith.constant 0 : index
    %c0_0 = arith.constant 0 : index
    %0 = vector.load %arg1[%c0, %c0_0] : memref<32x10xf32, #tpu.memory_space<vmem>>, vector<32x10xf32>
    %1 = arith.truncf %0 : vector<32x10xf32> to vector<32x10xbf16>
    %c0_1 = arith.constant 0 : index
    %c0_2 = arith.constant 0 : index
    %2 = vector.load %arg2[%c0_1, %c0_2] : memref<10x128xbf16, #tpu.memory_space<vmem>>, vector<10x128xbf16>
    %cst = arith.constant dense<0.000000e+00> : vector<32x128xf32>
    %3 = tpu.matmul %1, %2, %cst {dimension_numbers = #tpu.dot_dimension_numbers<[1], [0], [0], [1], [0, 0, 1, 1], [], []>} : vector<32x10xbf16>, vector<10x128xbf16>, vector<32x128xf32> -> vector<32x128xf32>
    %c0_3 = arith.constant 0 : index
    %c0_4 = arith.constant 0 : index
    %4 = vector.load %arg3[%c0_3, %c0_4] : memref<1x128xf32, #tpu.memory_space<vmem>>, vector<1x128xf32>
    %5 = vector.broadcast %4 : vector<1x128xf32> to vector<32x128xf32>
    %6 = arith.addf %3, %5 : vector<32x128xf32>
    %cst_5 = arith.constant 2.000000e-01 : f32
    %7 = vector.broadcast %cst_5 : f32 to vector<32x128xf32>
    %8 = arith.mulf %7, %6 : vector<32x128xf32>
    %9 = arith.maximumf %6, %8 : vector<32x128xf32>
    %10 = arith.truncf %9 : vector<32x128xf32> to vector<32x128xbf16>
    %c0_6 = arith.constant 0 : index
    %c0_7 = arith.constant 0 : index
    %11 = vector.load %arg4[%c0_6, %c0_7] : memref<128x256xbf16, #tpu.memory_space<vmem>>, vector<128x256xbf16>
    %cst_8 = arith.constant dense<0.000000e+00> : vector<32x256xf32>
    %12 = tpu.matmul %10, %11, %cst_8 {dimension_numbers = #tpu.dot_dimension_numbers<[1], [0], [0], [1], [0, 0, 1, 1], [], []>} : vector<32x128xbf16>, vector<128x256xbf16>, vector<32x256xf32> -> vector<32x256xf32>
    %c0_9 = arith.constant 0 : index
    %c0_10 = arith.constant 0 : index
    %13 = vector.load %arg5[%c0_9, %c0_10] : memref<1x256xf32, #tpu.memory_space<vmem>>, vector<1x256xf32>
    %14 = vector.broadcast %13 : vector<1x256xf32> to vector<32x256xf32>
    %15 = arith.addf %12, %14 : vector<32x256xf32>
    %cst_11 = arith.constant 2.000000e-01 : f32
    %16 = vector.broadcast %cst_11 : f32 to vector<32x256xf32>
    %17 = arith.mulf %16, %15 : vector<32x256xf32>
    %18 = arith.maximumf %15, %17 : vector<32x256xf32>
    %19 = arith.truncf %18 : vector<32x256xf32> to vector<32x256xbf16>
    %c0_12 = arith.constant 0 : index
    %c0_13 = arith.constant 0 : index
    %20 = vector.load %arg6[%c0_12, %c0_13] : memref<256x512xbf16, #tpu.memory_space<vmem>>, vector<256x512xbf16>
    %cst_14 = arith.constant dense<0.000000e+00> : vector<32x512xf32>
    %21 = tpu.matmul %19, %20, %cst_14 {dimension_numbers = #tpu.dot_dimension_numbers<[1], [0], [0], [1], [0, 0, 1, 1], [], []>} : vector<32x256xbf16>, vector<256x512xbf16>, vector<32x512xf32> -> vector<32x512xf32>
    %c0_15 = arith.constant 0 : index
    %c0_16 = arith.constant 0 : index
    %22 = vector.load %arg7[%c0_15, %c0_16] : memref<1x512xf32, #tpu.memory_space<vmem>>, vector<1x512xf32>
    %23 = vector.broadcast %22 : vector<1x512xf32> to vector<32x512xf32>
    %24 = arith.addf %21, %23 : vector<32x512xf32>
    %cst_17 = arith.constant 2.000000e-01 : f32
    %25 = vector.broadcast %cst_17 : f32 to vector<32x512xf32>
    %26 = arith.mulf %25, %24 : vector<32x512xf32>
    %27 = arith.maximumf %24, %26 : vector<32x512xf32>
    %28 = arith.truncf %27 : vector<32x512xf32> to vector<32x512xbf16>
    %c0_18 = arith.constant 0 : index
    %c0_19 = arith.constant 0 : index
    %29 = vector.load %arg8[%c0_18, %c0_19] : memref<512x1024xbf16, #tpu.memory_space<vmem>>, vector<512x1024xbf16>
    %cst_20 = arith.constant dense<0.000000e+00> : vector<32x1024xf32>
    %30 = tpu.matmul %28, %29, %cst_20 {dimension_numbers = #tpu.dot_dimension_numbers<[1], [0], [0], [1], [0, 0, 1, 1], [], []>} : vector<32x512xbf16>, vector<512x1024xbf16>, vector<32x1024xf32> -> vector<32x1024xf32>
    %c0_21 = arith.constant 0 : index
    %c0_22 = arith.constant 0 : index
    %31 = vector.load %arg9[%c0_21, %c0_22] : memref<1x1024xf32, #tpu.memory_space<vmem>>, vector<1x1024xf32>
    %32 = vector.broadcast %31 : vector<1x1024xf32> to vector<32x1024xf32>
    %33 = arith.addf %30, %32 : vector<32x1024xf32>
    %cst_23 = arith.constant 2.000000e-01 : f32
    %34 = vector.broadcast %cst_23 : f32 to vector<32x1024xf32>
    %35 = arith.mulf %34, %33 : vector<32x1024xf32>
    %36 = arith.maximumf %33, %35 : vector<32x1024xf32>
    %37 = arith.truncf %36 : vector<32x1024xf32> to vector<32x1024xbf16>
    %c0_24 = arith.constant 0 : index
    %c0_25 = arith.constant 0 : index
    %38 = vector.load %arg10[%c0_24, %c0_25] : memref<1024x896xbf16, #tpu.memory_space<vmem>>, vector<1024x896xbf16>
    %cst_26 = arith.constant dense<0.000000e+00> : vector<32x896xf32>
    %39 = tpu.matmul %37, %38, %cst_26 {dimension_numbers = #tpu.dot_dimension_numbers<[1], [0], [0], [1], [0, 0, 1, 1], [], []>} : vector<32x1024xbf16>, vector<1024x896xbf16>, vector<32x896xf32> -> vector<32x896xf32>
    %c0_27 = arith.constant 0 : index
    %c0_28 = arith.constant 0 : index
    %40 = vector.load %arg11[%c0_27, %c0_28] : memref<1x896xf32, #tpu.memory_space<vmem>>, vector<1x896xf32>
    %41 = vector.broadcast %40 : vector<1x896xf32> to vector<32x896xf32>
    %42 = arith.addf %39, %41 : vector<32x896xf32>
    %43 = math.tanh %42 : vector<32x896xf32>
    %c0_29 = arith.constant 0 : index
    %c0_30 = arith.constant 0 : index
    %44 = vector.load %arg12[%c0_29, %c0_30] : memref<32x896xf32, #tpu.memory_space<vmem>>, vector<32x896xf32>
    tpu.vector_store %arg12[%c0_29, %c0_30], %43 {strides = array<i32>} : memref<32x896xf32, #tpu.memory_space<vmem>>, vector<32x896xf32>,
    return
  }
  func.func @transform_0(%arg0: i32) -> (i32, i32) {
    %c0_i32 = arith.constant 0 : i32
    %c0_i32_0 = arith.constant 0 : i32
    return %arg0, %c0_i32 : i32, i32
  }
  func.func @transform_1(%arg0: i32) -> (i32, i32) {
    %c0_i32 = arith.constant 0 : i32
    %c0_i32_0 = arith.constant 0 : i32
    %c0_i32_1 = arith.constant 0 : i32
    return %c0_i32, %c0_i32_0 : i32, i32
  }
  func.func @transform_2(%arg0: i32) -> (i32, i32) {
    %c0_i32 = arith.constant 0 : i32
    %c0_i32_0 = arith.constant 0 : i32
    %c0_i32_1 = arith.constant 0 : i32
    return %c0_i32, %c0_i32_0 : i32, i32
  }
  func.func @transform_3(%arg0: i32) -> (i32, i32) {
    %c0_i32 = arith.constant 0 : i32
    %c0_i32_0 = arith.constant 0 : i32
    %c0_i32_1 = arith.constant 0 : i32
    return %c0_i32, %c0_i32_0 : i32, i32
  }
  func.func @transform_4(%arg0: i32) -> (i32, i32) {
    %c0_i32 = arith.constant 0 : i32
    %c0_i32_0 = arith.constant 0 : i32
    %c0_i32_1 = arith.constant 0 : i32
    return %c0_i32, %c0_i32_0 : i32, i32
  }
  func.func @transform_5(%arg0: i32) -> (i32, i32) {
    %c0_i32 = arith.constant 0 : i32
    %c0_i32_0 = arith.constant 0 : i32
    %c0_i32_1 = arith.constant 0 : i32
    return %c0_i32, %c0_i32_0 : i32, i32
  }
  func.func @transform_6(%arg0: i32) -> (i32, i32) {
    %c0_i32 = arith.constant 0 : i32
    %c0_i32_0 = arith.constant 0 : i32
    %c0_i32_1 = arith.constant 0 : i32
    return %c0_i32, %c0_i32_0 : i32, i32
  }
  func.func @transform_7(%arg0: i32) -> (i32, i32) {
    %c0_i32 = arith.constant 0 : i32
    %c0_i32_0 = arith.constant 0 : i32
    %c0_i32_1 = arith.constant 0 : i32
    return %c0_i32, %c0_i32_0 : i32, i32
  }
  func.func @transform_8(%arg0: i32) -> (i32, i32) {
    %c0_i32 = arith.constant 0 : i32
    %c0_i32_0 = arith.constant 0 : i32
    %c0_i32_1 = arith.constant 0 : i32
    return %c0_i32, %c0_i32_0 : i32, i32
  }
  func.func @transform_9(%arg0: i32) -> (i32, i32) {
    %c0_i32 = arith.constant 0 : i32
    %c0_i32_0 = arith.constant 0 : i32
    %c0_i32_1 = arith.constant 0 : i32
    return %c0_i32, %c0_i32_0 : i32, i32
  }
  func.func @transform_10(%arg0: i32) -> (i32, i32) {
    %c0_i32 = arith.constant 0 : i32
    %c0_i32_0 = arith.constant 0 : i32
    %c0_i32_1 = arith.constant 0 : i32
    return %c0_i32, %c0_i32_0 : i32, i32
  }
  func.func @transform_11(%arg0: i32) -> (i32, i32) {
    %c0_i32 = arith.constant 0 : i32
    %c0_i32_0 = arith.constant 0 : i32
    return %arg0, %c0_i32 : i32, i32
  }
}

</mosaic_0001>

<bundles_post_ra>
// kernel: generator_forward.1
= control target key start
LH: loop header
LB: loop body
LE: loop exit
PB: predicated region body
PF: predicated region fallthrough
CT: control target
= control target key end

     0   :  { %16 = vsyncpa [#allocation3], 0  ;;  %s9414_s0 = inlined_call_operand.vmem [shape: f32[32,10], index: 0, kind: input, shape index: {}]   ;;  %s9415_s1 = inlined_call_operand.hbm [shape: bf16[10,128], index: 1, kind: input, shape index: {}]   ;;  %s9416_s2 = inlined_call_operand.hbm [shape: f32[1,128], index: 2, kind: input, shape index: {}]   ;;  %s9417_s3 = inlined_call_operand.hbm [shape: bf16[128,256], index: 3, kind: input, shape index: {}]   ;;  %s9418_s4 = inlined_call_operand.hbm [shape: f32[1,256], index: 4, kind: input, shape index: {}]   ;;  %s9419_s5 = inlined_call_operand.hbm [shape: bf16[256,512], index: 5, kind: input, shape index: {}]   ;;  %s9420_s6 = inlined_call_operand.hbm [shape: f32[1,512], index: 6, kind: input, shape index: {}]   ;;  %s9421_s7 = inlined_call_operand.hbm [shape: bf16[512,1024], index: 7, kind: input, shape index: {}]   ;;  %s9422_s8 = inlined_call_operand.hbm [shape: f32[1,1024], index: 8, kind: input, shape index: {}]   ;;  %s9423_s9 = inlined_call_operand.hbm [shape: bf16[1024,896], index: 9, kind: input, shape index: {}]   ;;  %s9424_s10 = inlined_call_operand.hbm [shape: f32[1,896], index: 10, kind: input, shape index: {}]   ;;  %s9425_s11 = inlined_call_operand.vmem [shape: f32[32,896], index: 11, kind: output, shape index: {}]  }
   0x1   :  { %17 = vsyncpa [#allocation5], 0 }
   0x2   :  { %18 = vsyncpa [#allocation8], 0 }
   0x3   :  { %19 = vsyncpa [#allocation11], 0 }
   0x4   :  { %20 = vsyncpa [#allocation14], 0 }
   0x5   :  { %21 = vsyncpa [#allocation17], 0  ;;  %s8798_s17 = smov [#allocation4]   ;;  %s8799_s19 = smov [#allocation7]  }
   0x6   :  { %s42_s18 = sshll.u32 %s8798_s17, 4  ;;  %s64_s20 = sshll.u32 %s8799_s19, 4  ;;  %s43_s18 = int_to_ptr.vmem [resolvable:$true] %s42_s18  ;;  %s65_s20 = int_to_ptr.vmem [resolvable:$true] %s64_s20 }
   0x7   :  { %s8594_s21 = scalar_lea.vmem %s43_s18, 16  ;;  %s8598_s22 = scalar_lea.vmem %s43_s18, 32 }
   0x8   :  { %p8595_p0 = scmp.ne.s32.totalorder %s43_s18, %s8594_s21  ;;  %p8599_p1 = scmp.lt.s32.totalorder %s43_s18, %s43_s18 }
   0x9   :  { %p8600_p2 = scmp.lt.s32.totalorder %s8598_s22, %s8594_s21 }
   0xb   :  { %p8601_p3 = por %p8600_p2, %p8599_p1 }
   0xd   :  { %p8602_p4 = pnand %p8601_p3, %p8595_p0 }
   0xf   :  { %8605 = shalt.err (!%p8602_p4)
}
  0x10   :  { %45 = dma.hbm_to_vmem [thread:$0]  %s9416_s2, 16, %s43_s18, [#allocation5]  }
  0x11   :  { %s8614_s25 = scalar_lea.vmem %s65_s20, 32  ;;  %p8619_p6 = scmp.lt.s32.totalorder %s65_s20, %s65_s20 }
  0x12   :  { %p8615_p5 = scmp.ne.s32.totalorder %s65_s20, %s8614_s25  ;;  %p8620_p7 = scmp.lt.s32.totalorder %s8614_s25, %s8614_s25 }
  0x14   :  { %p8621_p8 = por %p8620_p7, %p8619_p6 }
  0x16   :  { %p8622_p9 = pnand %p8621_p8, %p8615_p5 }
  0x18   :  { %8625 = shalt.err (!%p8622_p9)
}
  0x19   :  { %67 = dma.hbm_to_vmem [thread:$0]  %s9418_s4, 32, %s65_s20, [#allocation8]  }
  0x1a   :  { %s8800_s28 = smov [#allocation10]   ;;  %s8801_s30 = smov [#allocation13]  }
  0x1b   :  { %s86_s29 = sshll.u32 %s8800_s28, 4  ;;  %s108_s12 = sshll.u32 %s8801_s30, 4  ;;  %s87_s29 = int_to_ptr.vmem [resolvable:$true] %s86_s29  ;;  %s109_s12 = int_to_ptr.vmem [resolvable:$true] %s108_s12 }
  0x1c   :  { %s8634_s13 = scalar_lea.vmem %s87_s29, 64  ;;  %p8639_p11 = scmp.lt.s32.totalorder %s87_s29, %s87_s29 }
  0x1d   :  { %p8635_p10 = scmp.ne.s32.totalorder %s87_s29, %s8634_s13  ;;  %p8640_p12 = scmp.lt.s32.totalorder %s8634_s13, %s8634_s13 }
  0x1f   :  { %p8641_p13 = por %p8640_p12, %p8639_p11 }
  0x21   :  { %p8642_p0 = pnand %p8641_p13, %p8635_p10 }
  0x23   :  { %8645 = shalt.err (!%p8642_p0)
}
  0x24   :  { %89 = dma.hbm_to_vmem [thread:$0]  %s9420_s6, 64, %s87_s29, [#allocation11]  }
  0x25   :  { %s8654_s15 = scalar_lea.vmem %s109_s12, 128  ;;  %p8659_p2 = scmp.lt.s32.totalorder %s109_s12, %s109_s12 }
  0x26   :  { %p8655_p1 = scmp.ne.s32.totalorder %s109_s12, %s8654_s15  ;;  %p8660_p3 = scmp.lt.s32.totalorder %s8654_s15, %s8654_s15 }
  0x28   :  { %p8661_p4 = por %p8660_p3, %p8659_p2 }
  0x2a   :  { %p8662_p5 = pnand %p8661_p4, %p8655_p1 }
  0x2c   :  { %8665 = shalt.err (!%p8662_p5)
}
  0x2d   :  { %111 = dma.hbm_to_vmem [thread:$0]  %s9422_s8, 128, %s109_s12, [#allocation14]  }
  0x2e   :  { %s8802_s17 = smov [#allocation2]  }
  0x2f   :  { %s29_s18 = sshll.u32 %s8802_s17, 4  ;;  %s30_s18 = int_to_ptr.vmem [resolvable:$true] %s29_s18 }
  0x30   :  { %s8674_s19 = scalar_lea.vmem %s30_s18, 128  ;;  %p8679_p7 = scmp.lt.s32.totalorder %s30_s18, %s30_s18 }
  0x31   :  { %p8675_p6 = scmp.ne.s32.totalorder %s30_s18, %s8674_s19  ;;  %p8680_p8 = scmp.lt.s32.totalorder %s8674_s19, %s8674_s19 }
  0x33   :  { %p8681_p9 = por %p8680_p8, %p8679_p7 }
  0x35   :  { %p8682_p10 = pnand %p8681_p9, %p8675_p6 }
  0x37   :  { %8685 = shalt.err (!%p8682_p10)
}
  0x38   :  { %s8803_s6 = smov 64   ;;  %s8804_s20 = smov 4  }
  0x39   :  { %35 = dma.hbm_to_vmem [thread:$0]  %s9415_s1, 128, %s30_s18, [#allocation3], %s8803_s6, %s8803_s6, %s8804_s20  }
  0x3a   :  { %s8805_s23 = smov [#allocation6]  }
  0x3b   :  { %s51_s24 = sshll.u32 %s8805_s23, 4  ;;  %s52_s24 = int_to_ptr.vmem [resolvable:$true] %s51_s24 }
  0x3c   :  { %s8694_s8 = scalar_lea.vmem %s52_s24, 2048  ;;  %p8699_p12 = scmp.lt.s32.totalorder %s52_s24, %s52_s24 }
  0x3d   :  { %p8695_p11 = scmp.ne.s32.totalorder %s52_s24, %s8694_s8  ;;  %p8700_p13 = scmp.lt.s32.totalorder %s8694_s8, %s8694_s8 }
  0x3f   :  { %p8701_p0 = por %p8700_p13, %p8699_p12 }
  0x41   :  { %p8702_p1 = pnand %p8701_p0, %p8695_p11 }
  0x43   :  { %8705 = shalt.err (!%p8702_p1)
}
  0x44   :  { %s8806_s25 = smov 128   ;;  %s8807_s26 = smov 8  }
  0x45   :  { %57 = dma.hbm_to_vmem [thread:$0]  %s9417_s3, 2048, %s52_s24, [#allocation5], %s8806_s25, %s8806_s25, %s8807_s26  }
  0x46   :  { %s8808_s29 = smov [#allocation9]  }
  0x47   :  { %s73_s30 = sshll.u32 %s8808_s29, 4  ;;  %s74_s30 = int_to_ptr.vmem [resolvable:$true] %s73_s30 }
  0x48   :  { %s8714_s1 = scalar_lea.vmem %s74_s30, 8192  ;;  %p8719_p3 = scmp.lt.s32.totalorder %s74_s30, %s74_s30 }
  0x49   :  { %p8715_p2 = scmp.ne.s32.totalorder %s74_s30, %s8714_s1  ;;  %p8720_p4 = scmp.lt.s32.totalorder %s8714_s1, %s8714_s1 }
  0x4b   :  { %p8721_p5 = por %p8720_p4, %p8719_p3 }
  0x4d   :  { %p8722_p6 = pnand %p8721_p5, %p8715_p2 }
  0x4f   :  { %8725 = shalt.err (!%p8722_p6)
}
  0x50   :  { %s8809_s12 = smov 256   ;;  %s8810_s13 = smov 16  }
  0x51   :  { %79 = dma.hbm_to_vmem [thread:$0]  %s9419_s5, 8192, %s74_s30, [#allocation8], %s8809_s12, %s8809_s12, %s8810_s13  }
  0x52   :  { %s8811_s15 = smov [#allocation12]  }
  0x53   :  { %s95_s4 = sshll.u32 %s8811_s15, 4  ;;  %s96_s4 = int_to_ptr.vmem [resolvable:$true] %s95_s4 }
  0x54   :  { %s8734_s3 = scalar_lea.vmem %s96_s4, 32768  ;;  %p8739_p8 = scmp.lt.s32.totalorder %s96_s4, %s96_s4 }
  0x55   :  { %p8735_p7 = scmp.ne.s32.totalorder %s96_s4, %s8734_s3  ;;  %p8740_p9 = scmp.lt.s32.totalorder %s8734_s3, %s8734_s3 }
  0x57   :  { %p8741_p10 = por %p8740_p9, %p8739_p8 }
  0x59   :  { %p8742_p11 = pnand %p8741_p10, %p8735_p7 }
  0x5b   :  { %8745 = shalt.err (!%p8742_p11)
}
  0x5c   :  { %s8812_s16 = smov 512   ;;  %s8813_s17 = smov 32  }
  0x5d   :  { %101 = dma.hbm_to_vmem [thread:$0]  %s9421_s7, 32768, %s96_s4, [#allocation11], %s8812_s16, %s8812_s16, %s8813_s17  }
  0x5e   :  { %s8814_s6 = smov [#allocation15]  }
  0x5f   :  { %s117_s20 = sshll.u32 %s8814_s6, 4  ;;  %s118_s20 = int_to_ptr.vmem [resolvable:$true] %s117_s20 }
  0x60   :  { %s8754_s5 = scalar_lea.vmem %s118_s20, 57344  ;;  %p8759_p13 = scmp.lt.s32.totalorder %s118_s20, %s118_s20 }
  0x61   :  { %p8755_p12 = scmp.ne.s32.totalorder %s118_s20, %s8754_s5  ;;  %p8760_p0 = scmp.lt.s32.totalorder %s8754_s5, %s8754_s5 }
  0x63   :  { %p8761_p1 = por %p8760_p0, %p8759_p13 }
  0x65   :  { %p8762_p2 = pnand %p8761_p1, %p8755_p12 }
  0x67   :  { %8765 = shalt.err (!%p8762_p2)
}
  0x68   :  { %s8815_s21 = smov 448   ;;  %s8816_s22 = smov 28  }
  0x69   :  { %123 = dma.hbm_to_vmem [thread:$0]  %s9423_s9, 57344, %s118_s20, [#allocation14], %s8815_s21, %s8815_s21, %s8816_s22  }
  0x6a   :  { %s8817_s8 = smov [#allocation16]  }
  0x6b   :  { %s130_s25 = sshll.u32 %s8817_s8, 4  ;;  %s131_s25 = int_to_ptr.vmem [resolvable:$true] %s130_s25 }
  0x6c   :  { %s8774_s7 = scalar_lea.vmem %s131_s25, 112  ;;  %s8778_s26 = scalar_lea.vmem %s131_s25, 128 }
  0x6d   :  { %p8775_p3 = scmp.ne.s32.totalorder %s131_s25, %s8774_s7  ;;  %p8779_p4 = scmp.lt.s32.totalorder %s131_s25, %s131_s25 }
  0x6e   :  { %p8780_p5 = scmp.lt.s32.totalorder %s8778_s26, %s8774_s7 }
  0x70   :  { %p8781_p6 = por %p8780_p5, %p8779_p4 }
  0x72   :  { %p8782_p7 = pnand %p8781_p6, %p8775_p3 }
  0x74   :  { %8785 = shalt.err (!%p8782_p7)
}
  0x75   :  { %133 = dma.hbm_to_vmem [thread:$0]  %s9424_s10, 112, %s131_s25, [#allocation17]  }
  0x76   :  { %8786 = dma.done.wait [#allocation3], 128  }
  0x77   :  { %8787 = vsyncadd [#allocation3], 4294967168 }
  0x78   :  { %8788 = dma.done.wait [#allocation5], 2064  }
  0x79   :  { %8789 = vsyncadd [#allocation5], 4294965232 }
  0x7a   :  { %8790 = dma.done.wait [#allocation8], 8224  }
  0x7b   :  { %8791 = vsyncadd [#allocation8], 4294959072 }
  0x7c   :  { %8792 = dma.done.wait [#allocation11], 32832  }
  0x7d   :  { %8793 = vsyncadd [#allocation11], 4294934464 }
  0x7e   :  { %8794 = dma.done.wait [#allocation14], 57472  }
  0x7f   :  { %8795 = vsyncadd [#allocation14], 4294909824 }
  0x80   :  { %8796 = dma.done.wait [#allocation17], 112  }
  0x81   :  { %8797 = vsyncadd [#allocation17], 4294967184  ;;  %vm192_vm0 = vcmask 1044480   ;;  %v7768_v0 = vld [vmem:[#allocation2] sm:$0x1f]   ;;  %v166_v2 = vld [vmem:[%s9414_s0 + $0x8] sm:$0xff] }
  0x82   :  { %v165_v1 = vld [vmem:[%s9414_s0] sm:$0xff]  ;;  %vm185_vm1 = vcmask 80896   ;;  %v167_v3 = vld [vmem:[%s9414_s0 + $0x10] sm:$0xff]  ;;  %7746 = vmatprep.subr.msk.bf16.mxu0 %vm192_vm0, %v7768_v0  ;;  %v194_v4 = vsel %vm192_vm0, %v7768_v0, 0  ;;  %v168_v6 = vld [vmem:[%s9414_s0 + $0x18] sm:$0xff]  ;;  %v8818_v24 = vmov 0  }
  0x83   :  { %v169_v5 = vpack.c.bf16 %v166_v2, %v165_v1  ;;  %7725 = vmatpush3.bf16.msra.mxu0 %v194_v4  ;;  %v170_v7 = vpack.c.bf16 %v168_v6, %v167_v3  ;;  %v7769_v8 = vld [vmem:[#allocation6 + $0x74] ss:$8 sps:$4 sm:$0xff]   ;;  %v7771_v9 = vld [vmem:[#allocation6 + $0x70] ss:$8 sps:$4 sm:$0xff]   ;;  %v7772_v10 = vld [vmem:[#allocation6 + $0x64] ss:$8 sps:$4 sm:$0xff]   ;;  %395 = vmatprep.mubr.bf16.mxu1 %v8818_v24 }
  0x84   :  { %363 = vmatprep.subr.bf16.mxu1 %v7769_v8  ;;  %v7774_v11 = vld [vmem:[#allocation6 + $0x60] ss:$8 sps:$4 sm:$0xff]   ;;  %v7775_v12 = vld [vmem:[#allocation6 + $0x54] ss:$8 sps:$4 sm:$0xff]   ;;  %v7777_v13 = vld [vmem:[#allocation6 + $0x50] ss:$8 sps:$4 sm:$0xff]  }
  0x85   :  { %7726 = vmatprep.mubr.msk.bf16.mxu0 %vm185_vm1, %v169_v5  ;;  %364 = vmatpush1.bf16.msra.mxu1 %v7771_v9  ;;  %v7778_v14 = vld [vmem:[#allocation6 + $0x44] ss:$8 sps:$4 sm:$0xff]   ;;  %v7780_v15 = vld [vmem:[#allocation6 + $0x40] ss:$8 sps:$4 sm:$0xff]   ;;  %v7781_v16 = vld [vmem:[#allocation6 + $0x34] ss:$8 sps:$4 sm:$0xff]  }
  0x86   :  { %7727 = vmatmul.mubr.msk.bf16.vlgmr.msra.gmra.mxu0 %vm185_vm1, %v170_v7  ;;  %365 = vmatprep.subr.bf16.mxu1 %v7772_v10  ;;  %v7783_v17 = vld [vmem:[#allocation6 + $0x30] ss:$8 sps:$4 sm:$0xff]   ;;  %v7784_v18 = vld [vmem:[#allocation6 + $0x24] ss:$8 sps:$4 sm:$0xff]   ;;  %v7786_v19 = vld [vmem:[#allocation6 + $0x20] ss:$8 sps:$4 sm:$0xff]  }
  0x87   :  { %v7787_v20 = vld [vmem:[#allocation6 + $0x14] ss:$8 sps:$4 sm:$0xff]   ;;  %v7789_v21 = vld [vmem:[#allocation6 + $0x10] ss:$8 sps:$4 sm:$0xff]   ;;  %v7790_v22 = vld [vmem:[#allocation6 + $0x4] ss:$8 sps:$4 sm:$0xff]  }
  0x88   :  { %v7792_v23 = vld [vmem:[#allocation6] ss:$8 sps:$4 sm:$0xff]   ;;  %v6821_v50 = vld [vmem:[#allocation4] ss:$0 sm:$0xff] }
  0x89   :  { %366 = vmatpush1.bf16.msra.mxu1 %v7774_v11  ;;  %v7793_v25 = vld [vmem:[#allocation9 + $0xe0] ss:$16 sps:$4 sm:$0xff]   ;;  %v7795_v26 = vld [vmem:[#allocation9 + $0xe4] ss:$16 sps:$4 sm:$0xff]   ;;  %v7798_v27 = vld [vmem:[#allocation9 + $0xec] ss:$16 sps:$4 sm:$0xff]  }
  0x8a   :  { %367 = vmatprep.subr.bf16.mxu1 %v7775_v12  ;;  %v7801_v28 = vld [vmem:[#allocation9 + $0xc4] ss:$16 sps:$4 sm:$0xff]   ;;  %842 = vmatprep.subr.bf16.mxu0 %v7795_v26  ;;  %v7799_v29 = vld [vmem:[#allocation9 + $0xc0] ss:$16 sps:$4 sm:$0xff]   ;;  %v7796_v63 = vld [vmem:[#allocation9 + $0xe8] ss:$16 sps:$4 sm:$0xff]  }
  0x8b   :  { %843 = vmatpush1.bf16.msra.mxu0 %v7793_v25  ;;  %v7807_v30 = vld [vmem:[#allocation9 + $0xa4] ss:$16 sps:$4 sm:$0xff]   ;;  %v7805_v31 = vld [vmem:[#allocation9 + $0xa0] ss:$16 sps:$4 sm:$0xff]   ;;  %v7804_v2 = vld [vmem:[#allocation9 + $0xcc] ss:$16 sps:$4 sm:$0xff]  }
  0x8c   :  { %844 = vmatprep.subr.bf16.mxu0 %v7801_v28  ;;  %v7813_v32 = vld [vmem:[#allocation9 + $0x84] ss:$16 sps:$4 sm:$0xff]   ;;  %v7811_v33 = vld [vmem:[#allocation9 + $0x80] ss:$16 sps:$4 sm:$0xff]   ;;  %v7802_v4 = vld [vmem:[#allocation9 + $0xc8] ss:$16 sps:$4 sm:$0xff]  }
  0x8d   :  { %368 = vmatpush1.bf16.msra.mxu1 %v7777_v13  ;;  %v7819_v34 = vld [vmem:[#allocation9 + $0x64] ss:$16 sps:$4 sm:$0xff]   ;;  %v7817_v35 = vld [vmem:[#allocation9 + $0x60] ss:$16 sps:$4 sm:$0xff]   ;;  %v7810_v5 = vld [vmem:[#allocation9 + $0xac] ss:$16 sps:$4 sm:$0xff]  }
  0x8e   :  { %369 = vmatprep.subr.bf16.mxu1 %v7778_v14  ;;  %v7825_v36 = vld [vmem:[#allocation9 + $0x44] ss:$16 sps:$4 sm:$0xff]   ;;  %v7823_v37 = vld [vmem:[#allocation9 + $0x40] ss:$16 sps:$4 sm:$0xff]   ;;  %v7808_v7 = vld [vmem:[#allocation9 + $0xa8] ss:$16 sps:$4 sm:$0xff]  }
  0x8f   :  { %845 = vmatpush1.bf16.msra.mxu0 %v7799_v29  ;;  %v7831_v38 = vld [vmem:[#allocation9 + $0x24] ss:$16 sps:$4 sm:$0xff]   ;;  %v7829_v39 = vld [vmem:[#allocation9 + $0x20] ss:$16 sps:$4 sm:$0xff]   ;;  %v7816_v9 = vld [vmem:[#allocation9 + $0x8c] ss:$16 sps:$4 sm:$0xff]  }
  0x90   :  { %846 = vmatprep.subr.bf16.mxu0 %v7807_v30  ;;  %v7837_v40 = vld [vmem:[#allocation9 + $0x4] ss:$16 sps:$4 sm:$0xff]   ;;  %v7835_v41 = vld [vmem:[#allocation9] ss:$16 sps:$4 sm:$0xff]   ;;  %v7814_v11 = vld [vmem:[#allocation9 + $0x88] ss:$16 sps:$4 sm:$0xff]  }
  0x91   :  { %370 = vmatpush1.bf16.msra.mxu1 %v7780_v15  ;;  %v7843_v42 = vld [vmem:[#allocation9 + $0x1e4] ss:$16 sps:$4 sm:$0xff]   ;;  %v7841_v43 = vld [vmem:[#allocation9 + $0x1e0] ss:$16 sps:$4 sm:$0xff]   ;;  %v7822_v12 = vld [vmem:[#allocation9 + $0x6c] ss:$16 sps:$4 sm:$0xff]  }
  0x92   :  { %371 = vmatprep.subr.bf16.mxu1 %v7781_v16  ;;  %v7849_v44 = vld [vmem:[#allocation9 + $0x1c4] ss:$16 sps:$4 sm:$0xff]   ;;  %v7847_v45 = vld [vmem:[#allocation9 + $0x1c0] ss:$16 sps:$4 sm:$0xff]   ;;  %v7820_v13 = vld [vmem:[#allocation9 + $0x68] ss:$16 sps:$4 sm:$0xff]  }
  0x93   :  { %847 = vmatpush1.bf16.msra.mxu0 %v7805_v31  ;;  %v7855_v46 = vld [vmem:[#allocation9 + $0x1a4] ss:$16 sps:$4 sm:$0xff]   ;;  %v7853_v47 = vld [vmem:[#allocation9 + $0x1a0] ss:$16 sps:$4 sm:$0xff]   ;;  %v7828_v14 = vld [vmem:[#allocation9 + $0x4c] ss:$16 sps:$4 sm:$0xff]  }
  0x94   :  { %848 = vmatprep.subr.bf16.mxu0 %v7813_v32  ;;  %v7861_v48 = vld [vmem:[#allocation9 + $0x184] ss:$16 sps:$4 sm:$0xff]   ;;  %v7859_v49 = vld [vmem:[#allocation9 + $0x180] ss:$16 sps:$4 sm:$0xff]   ;;  %v7826_v15 = vld [vmem:[#allocation9 + $0x48] ss:$16 sps:$4 sm:$0xff]  }
  0x95   :  { %372 = vmatpush1.bf16.msra.mxu1 %v7783_v17  ;;  %v7834_v16 = vld [vmem:[#allocation9 + $0x2c] ss:$16 sps:$4 sm:$0xff]   ;;  %v7832_v17 = vld [vmem:[#allocation9 + $0x28] ss:$16 sps:$4 sm:$0xff]   ;;  %v7867_v28 = vld [vmem:[#allocation9 + $0x164] ss:$16 sps:$4 sm:$0xff]  }
  0x96   :  { %373 = vmatprep.subr.bf16.mxu1 %v7784_v18  ;;  %v7840_v18 = vld [vmem:[#allocation9 + $0xc] ss:$16 sps:$4 sm:$0xff]   ;;  %v7856_v25 = vld [vmem:[#allocation9 + $0x1a8] ss:$16 sps:$4 sm:$0xff]   ;;  %v7865_v30 = vld [vmem:[#allocation9 + $0x160] ss:$16 sps:$4 sm:$0xff]  }
  0x97   :  { %849 = vmatpush1.bf16.msra.mxu0 %v7811_v33  ;;  %v7864_v26 = vld [vmem:[#allocation9 + $0x18c] ss:$16 sps:$4 sm:$0xff]   ;;  %v7868_v31 = vld [vmem:[#allocation9 + $0x168] ss:$16 sps:$4 sm:$0xff]   ;;  %v7873_v32 = vld [vmem:[#allocation9 + $0x144] ss:$16 sps:$4 sm:$0xff]  }
  0x98   :  { %850 = vmatprep.subr.bf16.mxu0 %v7819_v34  ;;  %v7870_v29 = vld [vmem:[#allocation9 + $0x16c] ss:$16 sps:$4 sm:$0xff]   ;;  %v7871_v34 = vld [vmem:[#allocation9 + $0x140] ss:$16 sps:$4 sm:$0xff]  }
  0x99   :  { %374 = vmatpush1.bf16.msra.mxu1 %v7786_v19  ;;  %v7838_v19 = vld [vmem:[#allocation9 + $0x8] ss:$16 sps:$4 sm:$0xff]   ;;  %v7876_v33 = vld [vmem:[#allocation9 + $0x14c] ss:$16 sps:$4 sm:$0xff]  }
  0x9a   :  { %375 = vmatprep.subr.bf16.mxu1 %v7787_v20  ;;  %v7846_v20 = vld [vmem:[#allocation9 + $0x1ec] ss:$16 sps:$4 sm:$0xff]  }
  0x9b   :  { %851 = vmatpush1.bf16.msra.mxu0 %v7817_v35  ;;  %v7874_v35 = vld [vmem:[#allocation9 + $0x148] ss:$16 sps:$4 sm:$0xff]  }
  0x9c   :  { %852 = vmatprep.subr.bf16.mxu0 %v7825_v36  ;;  %v7879_v36 = vld [vmem:[#allocation9 + $0x124] ss:$16 sps:$4 sm:$0xff]  }
  0x9d   :  { %376 = vmatpush1.bf16.msra.mxu1 %v7789_v21  ;;  %v7844_v21 = vld [vmem:[#allocation9 + $0x1e8] ss:$16 sps:$4 sm:$0xff]  }
  0x9e   :  { %377 = vmatprep.subr.bf16.mxu1 %v7790_v22  ;;  %v7852_v22 = vld [vmem:[#allocation9 + $0x1cc] ss:$16 sps:$4 sm:$0xff]  }
  0x9f   :  { %853 = vmatpush1.bf16.msra.mxu0 %v7823_v37  ;;  %v7882_v37 = vld [vmem:[#allocation9 + $0x12c] ss:$16 sps:$4 sm:$0xff]  }
  0xa0   :  { %854 = vmatprep.subr.bf16.mxu0 %v7831_v38  ;;  %v7877_v38 = vld [vmem:[#allocation9 + $0x120] ss:$16 sps:$4 sm:$0xff]  }
  0xa1   :  { %378 = vmatpush1.bf16.msra.mxu1 %v7792_v23  ;;  %v7850_v23 = vld [vmem:[#allocation9 + $0x1c8] ss:$16 sps:$4 sm:$0xff]  }
  0xa2   :  { %895 = vmatprep.subr.bf16.mxu1 %v7798_v27  ;;  %v7862_v27 = vld [vmem:[#allocation9 + $0x188] ss:$16 sps:$4 sm:$0xff]  }
  0xa3   :  { %855 = vmatpush1.bf16.msra.mxu0 %v7829_v39  ;;  %v7880_v39 = vld [vmem:[#allocation9 + $0x128] ss:$16 sps:$4 sm:$0xff]  }
  0xa4   :  { %856 = vmatprep.subr.bf16.mxu0 %v7837_v40  ;;  %v7885_v40 = vld [vmem:[#allocation9 + $0x104] ss:$16 sps:$4 sm:$0xff]  }
  0xa7   :  { %857 = vmatpush1.bf16.msra.mxu0 %v7835_v41  ;;  %v7888_v41 = vld [vmem:[#allocation9 + $0x10c] ss:$16 sps:$4 sm:$0xff]  }
  0xa8   :  { %858 = vmatprep.subr.bf16.mxu0 %v7843_v42  ;;  %v7883_v42 = vld [vmem:[#allocation9 + $0x100] ss:$16 sps:$4 sm:$0xff]  }
  0xab   :  { %859 = vmatpush2.bf16.msra.mxu0 %v7841_v43  ;;  %v7886_v43 = vld [vmem:[#allocation9 + $0x108] ss:$16 sps:$4 sm:$0xff]  }
  0xac   :  { %860 = vmatprep.subr.bf16.mxu0 %v7849_v44  ;;  %v1044_v44 = vld [vmem:[#allocation12 + $0x1c0] sm:$0xff] }
  0xaf   :  { %861 = vmatpush2.bf16.msra.mxu0 %v7847_v45  ;;  %v1048_v45 = vld [vmem:[#allocation12 + $0x1e0] sm:$0xff] }
  0xb0   :  { %862 = vmatprep.subr.bf16.mxu0 %v7855_v46  ;;  %v1172_v46 = vld [vmem:[#allocation12 + $0x5c0] sm:$0xff] }
  0xb3   :  { %863 = vmatpush2.bf16.msra.mxu0 %v7853_v47  ;;  %v6961_v47 = vcombine.low %v1044_v44, %v1048_v45 }
  0xb4   :  { %864 = vmatprep.subr.bf16.mxu0 %v7861_v48  ;;  %v6962_v48 = vcombine.high %v1044_v44, %v1048_v45  ;;  %v1148_v44 = vld [vmem:[#allocation12 + $0x500] sm:$0xff] }
  0xb5   :  { %v1152_v45 = vld [vmem:[#allocation12 + $0x520] sm:$0xff] }
  0xb7   :  { %865 = vmatpush2.bf16.msra.mxu0 %v7859_v49  ;;  %v1176_v49 = vld [vmem:[#allocation12 + $0x5e0] sm:$0xff] }
  0xb8   :  { %866 = vmatprep.subr.bf16.mxu0 %v7867_v28 }
  0xbb   :  { %867 = vmatpush2.bf16.msra.mxu0 %v7865_v30 }
  0xbc   :  { %868 = vmatprep.subr.bf16.mxu0 %v7873_v32  ;;  %v1160_v32 = vld [vmem:[#allocation12 + $0x560] sm:$0xff] }
  0xbf   :  { %869 = vmatpush2.bf16.msra.mxu0 %v7871_v34 }
  0xc0   :  { %870 = vmatprep.subr.bf16.mxu0 %v7879_v36 }
  0xc3   :  { %871 = vmatpush2.bf16.msra.mxu0 %v7877_v38 }
  0xc4   :  { %872 = vmatprep.subr.bf16.mxu0 %v7885_v40  ;;  %v1020_v40 = vld [vmem:[#allocation12 + $0x100] sm:$0xff] }
  0xc7   :  { %873 = vmatpush2.bf16.msra.mxu0 %v7883_v42 }
  0xc8   :  { %2566 = vmatprep.subr.bf16.mxu0 %v6962_v48 }
 0x146   :  { %v7728_v51 = vpop.f32.mrf.mxu0 }
 0x147   :  { %v239_v52 = vadd.f32 %v7728_v51, %v6821_v50  ;;  %v7090_v51 = vcombine.high %v1172_v46, %v1176_v49 }
 0x148   :  { %v230_v53 = vpop.f32.mrf.mxu0 }
 0x149   :  { %v247_v54 = vmul.f32 0.2, %v239_v52  ;;  %v231_v55 = vadd.f32 %v6821_v50, %v230_v53 }
 0x14a   :  { %v7729_v56 = vpop.f32.mrf.mxu0 }
 0x14b   :  { %v245_v57 = vmul.f32 0.2, %v231_v55  ;;  %v242_v58 = vadd.f32 %v7729_v56, %v6821_v50  ;;  %v251_v8 = vmax.f32 %v239_v52, %v247_v54  ;;  %v273_v52 = vlaneseq  ;;  %v271_v56 = vld [vmem:[#allocation7] sm:$0x3] }
 0x14c   :  { %v233_v59 = vpop.f32.mrf.mxu0 }
 0x14d   :  { %v248_v60 = vmul.f32 0.2, %v242_v58  ;;  %v234_v61 = vadd.f32 %v6821_v50, %v233_v59  ;;  %v249_v0 = vmax.f32 %v231_v55, %v245_v57  ;;  %v7089_v50 = vcombine.low %v1172_v46, %v1176_v49 }
 0x14e   :  { %v8923_v53 = vshrl.u32 %v273_v52, 7  ;;  %v7066_v52 = vcombine.high %v1148_v44, %v1152_v45 }
 0x14f   :  { %v246_v62 = vmul.f32 0.2, %v234_v61  ;;  %v252_v6 = vmax.f32 %v242_v58, %v248_v60 }
 0x150   :  { %v8926_v54 = vsub.s32 1, %v8923_v53  ;;  %v8929_v55 = vsub.s32 0, %v8923_v53 }
 0x151   :  { %v250_v1 = vmax.f32 %v234_v61, %v246_v62  ;;  %v254_v10 = vpack.c.bf16 %v252_v6, %v251_v8 }
 0x152   :  { %v280_v57 = vrot.slane %v271_v56, %v8926_v54  ;;  %v276_v58 = vrot.slane %v271_v56, %v8929_v55  ;;  %v1012_v56 = vld [vmem:[#allocation12 + $0xc0] sm:$0xff] }
 0x153   :  { %v253_v3 = vpack.c.bf16 %v250_v1, %v249_v0 }
 0x155   :  { %396 = vmatmul.mubr.bf16.vlgmr.msra.gmra.mxu1 %v253_v3 }
 0x156   :  { %405 = vmatprep.mubr.bf16.mxu1 %v8818_v24  ;;  %896 = vmatpush1.bf16.msra.mxu1 %v7796_v63  ;;  %v7858_v24 = vld [vmem:[#allocation9 + $0x1ac] ss:$16 sps:$4 sm:$0xff]  }
 0x157   :  { %897 = vmatprep.subr.bf16.mxu1 %v7804_v2 }
 0x15a   :  { %898 = vmatpush1.bf16.msra.mxu1 %v7802_v4 }
 0x15b   :  { %899 = vmatprep.subr.bf16.mxu1 %v7810_v5 }
 0x15d   :  { %406 = vmatmul.mubr.bf16.gmra.mxu1 %v254_v10  ;;  %v1036_v10 = vld [vmem:[#allocation12 + $0x180] sm:$0xff] }
 0x15e   :  { %900 = vmatpush1.bf16.msra.mxu1 %v7808_v7 }
 0x15f   :  { %901 = vmatprep.subr.bf16.mxu1 %v7816_v9 }
 0x162   :  { %902 = vmatpush1.bf16.msra.mxu1 %v7814_v11 }
 0x163   :  { %903 = vmatprep.subr.bf16.mxu1 %v7822_v12 }
 0x166   :  { %904 = vmatpush1.bf16.msra.mxu1 %v7820_v13 }
 0x167   :  { %905 = vmatprep.subr.bf16.mxu1 %v7828_v14  ;;  %v1040_v14 = vld [vmem:[#allocation12 + $0x1a0] sm:$0xff] }
 0x16a   :  { %906 = vmatpush1.bf16.msra.mxu1 %v7826_v15  ;;  %v1164_v15 = vld [vmem:[#allocation12 + $0x580] sm:$0xff] }
 0x16b   :  { %907 = vmatprep.subr.bf16.mxu1 %v7834_v16  ;;  %v1168_v16 = vld [vmem:[#allocation12 + $0x5a0] sm:$0xff] }
 0x16c   :  { %v7081_v36 = vcombine.low %v1164_v15, %v1168_v16 }
 0x16e   :  { %908 = vmatpush1.bf16.msra.mxu1 %v7832_v17 }
 0x16f   :  { %909 = vmatprep.subr.bf16.mxu1 %v7840_v18 }
 0x172   :  { %910 = vmatpush1.bf16.msra.mxu1 %v7838_v19 }
 0x173   :  { %911 = vmatprep.subr.bf16.mxu1 %v7846_v20 }
 0x176   :  { %912 = vmatpush2.bf16.msra.mxu1 %v7844_v21 }
 0x177   :  { %913 = vmatprep.subr.bf16.mxu1 %v7852_v22 }
 0x17a   :  { %914 = vmatpush2.bf16.msra.mxu1 %v7850_v23 }
 0x17b   :  { %915 = vmatprep.subr.bf16.mxu1 %v7858_v24  ;;  %v6954_v24 = vcombine.high %v1036_v10, %v1040_v14 }
 0x17e   :  { %916 = vmatpush2.bf16.msra.mxu1 %v7856_v25  ;;  %v7082_v25 = vcombine.high %v1164_v15, %v1168_v16  ;;  %v988_v16 = vld [vmem:[#allocation12] sm:$0xff] }
 0x17f   :  { %917 = vmatprep.subr.bf16.mxu1 %v7864_v26  ;;  %v1028_v26 = vld [vmem:[#allocation12 + $0x140] sm:$0xff] }
 0x182   :  { %918 = vmatpush2.bf16.msra.mxu1 %v7862_v27  ;;  %v1032_v27 = vld [vmem:[#allocation12 + $0x160] sm:$0xff] }
 0x183   :  { %919 = vmatprep.subr.bf16.mxu1 %v7870_v29  ;;  %v6946_v38 = vcombine.high %v1028_v26, %v1032_v27  ;;  %v6945_v49 = vcombine.low %v1028_v26, %v1032_v27  ;;  %v1236_v26 = vld [vmem:[#allocation12 + $0x7c0] sm:$0xff] }
 0x184   :  { %v1240_v27 = vld [vmem:[#allocation12 + $0x7e0] sm:$0xff] }
 0x186   :  { %920 = vmatpush2.bf16.msra.mxu1 %v7868_v31  ;;  %v1156_v31 = vld [vmem:[#allocation12 + $0x540] sm:$0xff] }
 0x187   :  { %921 = vmatprep.subr.bf16.mxu1 %v7876_v33 }
 0x18a   :  { %922 = vmatpush2.bf16.msra.mxu1 %v7874_v35  ;;  %v6953_v35 = vcombine.low %v1036_v10, %v1040_v14  ;;  %v1124_v10 = vld [vmem:[#allocation12 + $0x440] sm:$0xff] }
 0x18b   :  { %923 = vmatprep.subr.bf16.mxu1 %v7882_v37 }
 0x18e   :  { %924 = vmatpush2.bf16.msra.mxu1 %v7880_v39  ;;  %v7074_v39 = vcombine.high %v1156_v31, %v1160_v32 }
 0x18f   :  { %925 = vmatprep.subr.bf16.mxu1 %v7888_v41 }
 0x192   :  { %926 = vmatpush2.bf16.msra.mxu1 %v7886_v43  ;;  %v1024_v43 = vld [vmem:[#allocation12 + $0x120] sm:$0xff] }
 0x193   :  { %2619 = vmatprep.subr.bf16.mxu1 %v7090_v51  ;;  %v6938_v51 = vcombine.high %v1020_v40, %v1024_v43 }
 0x215   :  { %v397_v59 = vpop.f32.mrf.mxu1 }
 0x216   :  { %v398_v62 = vadd.f32 %v397_v59, %v276_v58  ;;  %v1144_v59 = vld [vmem:[#allocation12 + $0x4e0] sm:$0xff] }
 0x217   :  { %v399_v60 = vpop.f32.mrf.mxu1 }
 0x218   :  { %v400_v61 = vadd.f32 %v399_v60, %v280_v57  ;;  %v416_v5 = vmul.f32 0.2, %v398_v62  ;;  %v6937_v60 = vcombine.low %v1020_v40, %v1024_v43  ;;  %v1092_v40 = vld [vmem:[#allocation12 + $0x340] sm:$0xff] }
 0x219   :  { %v401_v63 = vpop.f32.mrf.mxu1  ;;  %v1224_v43 = vld [vmem:[#allocation12 + $0x760] sm:$0xff] }
 0x21a   :  { %v402_v0 = vadd.f32 %v401_v63, %v276_v58  ;;  %v417_v2 = vmul.f32 0.2, %v400_v61  ;;  %v424_v17 = vmax.f32 %v398_v62, %v416_v5 }
 0x21b   :  { %v403_v1 = vpop.f32.mrf.mxu1 }
 0x21c   :  { %v418_v3 = vmul.f32 0.2, %v402_v0  ;;  %v404_v4 = vadd.f32 %v403_v1, %v280_v57  ;;  %v425_v11 = vmax.f32 %v400_v61, %v417_v2  ;;  %v7065_v61 = vcombine.low %v1148_v44, %v1152_v45  ;;  %v1008_v1 = vld [vmem:[#allocation12 + $0xa0] sm:$0xff] }
 0x21d   :  { %v407_v6 = vpop.f32.mrf.mxu1  ;;  %v1132_v2 = vld [vmem:[#allocation12 + $0x480] sm:$0xff] }
 0x21e   :  { %v419_v7 = vmul.f32 0.2, %v404_v4  ;;  %v426_v8 = vmax.f32 %v402_v0, %v418_v3  ;;  %v408_v18 = vadd.f32 %v407_v6, %v276_v58  ;;  %v1004_v0 = vld [vmem:[#allocation12 + $0x80] sm:$0xff] }
 0x21f   :  { %v409_v9 = vpop.f32.mrf.mxu1  ;;  %v1136_v3 = vld [vmem:[#allocation12 + $0x4a0] sm:$0xff]  ;;  %v6922_v6 = vcombine.high %v1004_v0, %v1008_v1 }
 0x220   :  { %v427_v12 = vmax.f32 %v404_v4, %v419_v7  ;;  %v410_v13 = vadd.f32 %v409_v9, %v280_v57  ;;  %v432_v22 = vpack.c.bf16 %v426_v8, %v424_v17  ;;  %v420_v33 = vmul.f32 0.2, %v408_v18  ;;  %v996_v8 = vld [vmem:[#allocation12 + $0x40] sm:$0xff] }
 0x221   :  { %v411_v19 = vpop.f32.mrf.mxu1  ;;  %v7050_v7 = vcombine.high %v1132_v2, %v1136_v3  ;;  %v1000_v9 = vld [vmem:[#allocation12 + $0x60] sm:$0xff] }
 0x222   :  { %v412_v20 = vadd.f32 %v411_v19, %v276_v58  ;;  %v433_v21 = vpack.c.bf16 %v427_v12, %v425_v11  ;;  %v421_v28 = vmul.f32 0.2, %v410_v13  ;;  %v428_v46 = vmax.f32 %v408_v18, %v420_v33  ;;  %v1140_v58 = vld [vmem:[#allocation12 + $0x4c0] sm:$0xff] }
 0x223   :  { %v413_v23 = vpop.f32.mrf.mxu1  ;;  %v7058_v63 = vcombine.high %v1140_v58, %v1144_v59  ;;  %v7057_v5 = vcombine.low %v1140_v58, %v1144_v59  ;;  %v1128_v11 = vld [vmem:[#allocation12 + $0x460] sm:$0xff]  ;;  %v6921_v12 = vcombine.low %v1004_v0, %v1008_v1  ;;  %v6914_v14 = vcombine.high %v996_v8, %v1000_v9 }
 0x224   :  { %v422_v29 = vmul.f32 0.2, %v412_v20  ;;  %v414_v30 = vadd.f32 %v413_v23, %v280_v57  ;;  %874 = vmatprep.mubr.bf16.mxu0 %v433_v21  ;;  %927 = vmatprep.mubr.bf16.mxu1 %v433_v21  ;;  %v429_v41 = vmax.f32 %v410_v13, %v421_v28  ;;  %v1016_v57 = vld [vmem:[#allocation12 + $0xe0] sm:$0xff]  ;;  %v7049_v13 = vcombine.low %v1132_v2, %v1136_v3 }
 0x225   :  { %875 = vmatmul.mubr.bf16.vlgmr.msra.gmra.mxu0 %v432_v22  ;;  %928 = vmatmul.mubr.bf16.vlgmr.msra.gmra.mxu1 %v432_v22  ;;  %v6930_v62 = vcombine.high %v1012_v56, %v1016_v57  ;;  %v6929_v4 = vcombine.low %v1012_v56, %v1016_v57  ;;  %v7042_v15 = vcombine.high %v1124_v10, %v1128_v11  ;;  %v992_v17 = vld [vmem:[#allocation12 + $0x20] sm:$0xff] }
 0x226   :  { %v423_v34 = vmul.f32 0.2, %v414_v30  ;;  %2567 = vmatpush1.bf16.msra.mxu0 %v6961_v47  ;;  %2620 = vmatpush1.bf16.msra.mxu1 %v7089_v50  ;;  %v430_v37 = vmax.f32 %v412_v20, %v422_v29  ;;  %v7073_v47 = vcombine.low %v1156_v31, %v1160_v32  ;;  %v1116_v18 = vld [vmem:[#allocation12 + $0x400] sm:$0xff]  ;;  %v6913_v20 = vcombine.low %v996_v8, %v1000_v9 }
 0x227   :  { %2568 = vmatprep.subr.bf16.mxu0 %v6954_v24  ;;  %2621 = vmatprep.subr.bf16.mxu1 %v7082_v25  ;;  %v1120_v19 = vld [vmem:[#allocation12 + $0x420] sm:$0xff]  ;;  %v7041_v21 = vcombine.low %v1124_v10, %v1128_v11  ;;  %v6906_v22 = vcombine.high %v988_v16, %v992_v17  ;;  %v6905_v28 = vcombine.low %v988_v16, %v992_v17 }
 0x228   :  { %v431_v42 = vmax.f32 %v414_v30, %v423_v34  ;;  %v434_v50 = vpack.c.bf16 %v430_v37, %v428_v46  ;;  %v7034_v23 = vcombine.high %v1116_v18, %v1120_v19  ;;  %v1108_v24 = vld [vmem:[#allocation12 + $0x3c0] sm:$0xff]  ;;  %v7033_v29 = vcombine.low %v1116_v18, %v1120_v19 }
 0x229   :  { %v1112_v25 = vld [vmem:[#allocation12 + $0x3e0] sm:$0xff]  ;;  %v7154_v31 = vcombine.high %v1236_v26, %v1240_v27  ;;  %v7153_v37 = vcombine.low %v1236_v26, %v1240_v27 }
 0x22a   :  { %v435_v48 = vpack.c.bf16 %v431_v42, %v429_v41  ;;  %2569 = vmatpush1.bf16.msra.mxu0 %v6953_v35  ;;  %2622 = vmatpush1.bf16.msra.mxu1 %v7081_v36  ;;  %v7026_v30 = vcombine.high %v1108_v24, %v1112_v25  ;;  %v1100_v32 = vld [vmem:[#allocation12 + $0x380] sm:$0xff]  ;;  %v7025_v36 = vcombine.low %v1108_v24, %v1112_v25 }
 0x22b   :  { %2570 = vmatprep.subr.bf16.mxu0 %v6946_v38  ;;  %2623 = vmatprep.subr.bf16.mxu1 %v7074_v39  ;;  %v1104_v33 = vld [vmem:[#allocation12 + $0x3a0] sm:$0xff] }
 0x22c   :  { %884 = vmatprep.mubr.bf16.mxu0 %v435_v48  ;;  %937 = vmatprep.mubr.bf16.mxu1 %v435_v48  ;;  %v1228_v34 = vld [vmem:[#allocation12 + $0x780] sm:$0xff]  ;;  %v7018_v38 = vcombine.high %v1100_v32, %v1104_v33  ;;  %v7017_v44 = vcombine.low %v1100_v32, %v1104_v33  ;;  %v8941_v33 = vld [vmem:[#allocation12 + $0x5e8] sm:$0xff] }
 0x22d   :  { %885 = vmatmul.mubr.bf16.gmra.mxu0 %v434_v50  ;;  %938 = vmatmul.mubr.bf16.gmra.mxu1 %v434_v50  ;;  %v1232_v35 = vld [vmem:[#allocation12 + $0x7a0] sm:$0xff] }
 0x22e   :  { %2571 = vmatpush1.bf16.msra.mxu0 %v6945_v49  ;;  %2624 = vmatpush1.bf16.msra.mxu1 %v7073_v47  ;;  %v7146_v39 = vcombine.high %v1228_v34, %v1232_v35  ;;  %v1096_v41 = vld [vmem:[#allocation12 + $0x360] sm:$0xff]  ;;  %v7145_v45 = vcombine.low %v1228_v34, %v1232_v35 }
 0x22f   :  { %2572 = vmatprep.subr.bf16.mxu0 %v6938_v51  ;;  %2625 = vmatprep.subr.bf16.mxu1 %v7066_v52  ;;  %v1220_v42 = vld [vmem:[#allocation12 + $0x740] sm:$0xff]  ;;  %v7010_v46 = vcombine.high %v1092_v40, %v1096_v41  ;;  %v7009_v52 = vcombine.low %v1092_v40, %v1096_v41 }
 0x230   :  { %v7138_v48 = vcombine.high %v1220_v42, %v1224_v43  ;;  %v1084_v49 = vld [vmem:[#allocation12 + $0x300] sm:$0xff]  ;;  %v7137_v56 = vcombine.low %v1220_v42, %v1224_v43 }
 0x231   :  { %v1088_v47 = vld [vmem:[#allocation12 + $0x320] sm:$0xff] }
 0x232   :  { %2573 = vmatpush1.bf16.msra.mxu0 %v6937_v60  ;;  %2626 = vmatpush1.bf16.msra.mxu1 %v7065_v61  ;;  %v1212_v50 = vld [vmem:[#allocation12 + $0x700] sm:$0xff]  ;;  %v7002_v57 = vcombine.high %v1084_v49, %v1088_v47 }
 0x233   :  { %2574 = vmatprep.subr.bf16.mxu0 %v6930_v62  ;;  %2627 = vmatprep.subr.bf16.mxu1 %v7058_v63  ;;  %v1216_v51 = vld [vmem:[#allocation12 + $0x720] sm:$0xff]  ;;  %v7001_v63 = vcombine.low %v1084_v49, %v1088_v47 }
 0x234   :  { %v7130_v58 = vcombine.high %v1212_v50, %v1216_v51  ;;  %v1076_v59 = vld [vmem:[#allocation12 + $0x2c0] sm:$0xff]  ;;  %v7129_v0 = vcombine.low %v1212_v50, %v1216_v51 }
 0x235   :  { %v1080_v60 = vld [vmem:[#allocation12 + $0x2e0] sm:$0xff] }
 0x236   :  { %2575 = vmatpush1.bf16.msra.mxu0 %v6929_v4  ;;  %2628 = vmatpush1.bf16.msra.mxu1 %v7057_v5  ;;  %v1204_v61 = vld [vmem:[#allocation12 + $0x6c0] sm:$0xff]  ;;  %v6994_v1 = vcombine.high %v1076_v59, %v1080_v60  ;;  %v6993_v3 = vcombine.low %v1076_v59, %v1080_v60 }
 0x237   :  { %2576 = vmatprep.subr.bf16.mxu0 %v6922_v6  ;;  %2629 = vmatprep.subr.bf16.mxu1 %v7050_v7  ;;  %v1208_v62 = vld [vmem:[#allocation12 + $0x6e0] sm:$0xff] }
 0x238   :  { %v7122_v2 = vcombine.high %v1204_v61, %v1208_v62  ;;  %v7121_v4 = vcombine.low %v1204_v61, %v1208_v62  ;;  %v1068_v5 = vld [vmem:[#allocation12 + $0x280] sm:$0xff] }
 0x239   :  { %v1072_v6 = vld [vmem:[#allocation12 + $0x2a0] sm:$0xff] }
 0x23a   :  { %2577 = vmatpush1.bf16.msra.mxu0 %v6921_v12  ;;  %2630 = vmatpush1.bf16.msra.mxu1 %v7049_v13  ;;  %v1196_v7 = vld [vmem:[#allocation12 + $0x680] sm:$0xff]  ;;  %v6986_v8 = vcombine.high %v1068_v5, %v1072_v6  ;;  %v6985_v10 = vcombine.low %v1068_v5, %v1072_v6 }
 0x23b   :  { %2578 = vmatprep.subr.bf16.mxu0 %v6914_v14  ;;  %2631 = vmatprep.subr.bf16.mxu1 %v7042_v15  ;;  %v1200_v9 = vld [vmem:[#allocation12 + $0x6a0] sm:$0xff] }
 0x23c   :  { %v7113_v11 = vcombine.low %v1196_v7, %v1200_v9  ;;  %v7114_v12 = vcombine.high %v1196_v7, %v1200_v9  ;;  %v1060_v13 = vld [vmem:[#allocation12 + $0x240] sm:$0xff] }
 0x23d   :  { %v1064_v14 = vld [vmem:[#allocation12 + $0x260] sm:$0xff] }
 0x23e   :  { %2579 = vmatpush1.bf16.msra.mxu0 %v6913_v20  ;;  %2632 = vmatpush1.bf16.msra.mxu1 %v7041_v21  ;;  %v1188_v15 = vld [vmem:[#allocation12 + $0x640] sm:$0xff]  ;;  %v6978_v16 = vcombine.high %v1060_v13, %v1064_v14  ;;  %v6977_v18 = vcombine.low %v1060_v13, %v1064_v14 }
 0x23f   :  { %2580 = vmatprep.subr.bf16.mxu0 %v6906_v22  ;;  %2633 = vmatprep.subr.bf16.mxu1 %v7034_v23  ;;  %v1192_v17 = vld [vmem:[#allocation12 + $0x660] sm:$0xff] }
 0x240   :  { %v7105_v19 = vcombine.low %v1188_v15, %v1192_v17  ;;  %v7106_v20 = vcombine.high %v1188_v15, %v1192_v17  ;;  %v1052_v21 = vld [vmem:[#allocation12 + $0x200] sm:$0xff] }
 0x241   :  { %v1056_v22 = vld [vmem:[#allocation12 + $0x220] sm:$0xff] }
 0x242   :  { %2581 = vmatpush1.bf16.msra.mxu0 %v6905_v28  ;;  %2634 = vmatpush1.bf16.msra.mxu1 %v7033_v29  ;;  %v1180_v23 = vld [vmem:[#allocation12 + $0x600] sm:$0xff]  ;;  %v6970_v24 = vcombine.high %v1052_v21, %v1056_v22  ;;  %v6969_v26 = vcombine.low %v1052_v21, %v1056_v22  ;;  %v8933_v29 = vld [vmem:[#allocation12 + $0x1c8] sm:$0xff] }
 0x243   :  { %2582 = vmatprep.subr.bf16.mxu0 %v7026_v30  ;;  %2635 = vmatprep.subr.bf16.mxu1 %v7154_v31  ;;  %v1184_v25 = vld [vmem:[#allocation12 + $0x620] sm:$0xff]  ;;  %v8935_v30 = vld [vmem:[#allocation12 + $0x1e8] sm:$0xff] }
 0x244   :  { %v7097_v27 = vcombine.low %v1180_v23, %v1184_v25  ;;  %v7098_v28 = vcombine.high %v1180_v23, %v1184_v25  ;;  %v8937_v31 = vld [vmem:[#allocation12 + $0x5c8] sm:$0xff]  ;;  %v6964_v32 = vcombine.high %v8933_v29, %v8935_v30  ;;  %v6963_v34 = vcombine.low %v8933_v29, %v8935_v30 }
 0x245   :  { %v7091_v35 = vcombine.low %v8937_v31, %v8941_v33 }
 0x246   :  { %2583 = vmatpush2.bf16.msra.mxu0 %v7025_v36  ;;  %2636 = vmatpush2.bf16.msra.mxu1 %v7153_v37  ;;  %v7092_v36 = vcombine.high %v8937_v31, %v8941_v33  ;;  %v500_v37 = vld [vmem:[#allocation10] sm:$0xf]  ;;  %v1149_v31 = vld [vmem:[#allocation12 + $0x508] sm:$0xff] }
 0x247   :  { %2584 = vmatprep.subr.bf16.mxu0 %v7018_v38  ;;  %2637 = vmatprep.subr.bf16.mxu1 %v7146_v39  ;;  %v8950_v38 = vsub.s32 3, %v8923_v53  ;;  %v8953_v39 = vsub.s32 2, %v8923_v53  ;;  %v505_v40 = vrot.slane %v500_v37, %v8929_v55  ;;  %v8957_v41 = vrot.slane %v500_v37, %v8926_v54  ;;  %v1153_v33 = vld [vmem:[#allocation12 + $0x528] sm:$0xff] }
 0x249   :  { %v8960_v42 = vrot.slane %v500_v37, %v8950_v38 }
 0x24a   :  { %2585 = vmatpush2.bf16.msra.mxu0 %v7017_v44  ;;  %2638 = vmatpush2.bf16.msra.mxu1 %v7145_v45  ;;  %v513_v44 = vrot.slane %v500_v37, %v8953_v39 }
 0x24b   :  { %2586 = vmatprep.subr.bf16.mxu0 %v7010_v46  ;;  %2639 = vmatprep.subr.bf16.mxu1 %v7138_v48 }
 0x24e   :  { %2587 = vmatpush2.bf16.msra.mxu0 %v7009_v52  ;;  %2640 = vmatpush2.bf16.msra.mxu1 %v7137_v56 }
 0x24f   :  { %2588 = vmatprep.subr.bf16.mxu0 %v7002_v57  ;;  %2641 = vmatprep.subr.bf16.mxu1 %v7130_v58 }
 0x252   :  { %2589 = vmatpush2.bf16.msra.mxu0 %v7001_v63  ;;  %2642 = vmatpush2.bf16.msra.mxu1 %v7129_v0 }
 0x253   :  { %2590 = vmatprep.subr.bf16.mxu0 %v6994_v1  ;;  %2643 = vmatprep.subr.bf16.mxu1 %v7122_v2  ;;  %v8967_v2 = vld [vmem:[#allocation12 + $0x188] sm:$0xff] }
 0x256   :  { %2591 = vmatpush2.bf16.msra.mxu0 %v6993_v3  ;;  %2644 = vmatpush2.bf16.msra.mxu1 %v7121_v4  ;;  %v8969_v3 = vld [vmem:[#allocation12 + $0x1a8] sm:$0xff] }
 0x257   :  { %2592 = vmatprep.subr.bf16.mxu0 %v6986_v8  ;;  %2645 = vmatprep.subr.bf16.mxu1 %v7114_v12  ;;  %v6956_v17 = vcombine.high %v8967_v2, %v8969_v3 }
 0x25a   :  { %2593 = vmatpush2.bf16.msra.mxu0 %v6985_v10  ;;  %2646 = vmatpush2.bf16.msra.mxu1 %v7113_v11 }
 0x25b   :  { %2594 = vmatprep.subr.bf16.mxu0 %v6978_v16  ;;  %2647 = vmatprep.subr.bf16.mxu1 %v7106_v20 }
 0x25e   :  { %2595 = vmatpush2.bf16.msra.mxu0 %v6977_v18  ;;  %2648 = vmatpush2.bf16.msra.mxu1 %v7105_v19  ;;  %v8975_v18 = vld [vmem:[#allocation12 + $0x588] sm:$0xff] }
 0x25f   :  { %2596 = vmatprep.subr.bf16.mxu0 %v6970_v24  ;;  %2649 = vmatprep.subr.bf16.mxu1 %v7098_v28  ;;  %v1169_v19 = vld [vmem:[#allocation12 + $0x5a8] sm:$0xff] }
 0x262   :  { %2597 = vmatpush2.bf16.msra.mxu0 %v6969_v26  ;;  %2650 = vmatpush2.bf16.msra.mxu1 %v7097_v27 }
 0x263   :  { %2672 = vmatprep.subr.bf16.mxu0 %v6964_v32  ;;  %2725 = vmatprep.subr.bf16.mxu1 %v7092_v36 }
 0x2e5   :  { %v876_v43 = vpop.f32.mrf.mxu0  ;;  %v929_v45 = vpop.f32.mrf.mxu1 }
 0x2e6   :  { %v877_v46 = vadd.f32 %v876_v43, %v505_v40  ;;  %v930_v51 = vadd.f32 %v929_v45, %v513_v44  ;;  %v7084_v45 = vcombine.high %v8975_v18, %v1169_v19 }
 0x2e7   :  { %v878_v48 = vpop.f32.mrf.mxu0  ;;  %v931_v49 = vpop.f32.mrf.mxu1 }
 0x2e8   :  { %v879_v47 = vadd.f32 %v878_v48, %v8957_v41  ;;  %v932_v50 = vadd.f32 %v931_v49, %v8960_v42  ;;  %v948_v57 = vmul.f32 0.2, %v877_v46  ;;  %v950_v4 = vmul.f32 0.2, %v930_v51 }
 0x2e9   :  { %v880_v52 = vpop.f32.mrf.mxu0  ;;  %v933_v56 = vpop.f32.mrf.mxu1 }
 0x2ea   :  { %v881_v58 = vadd.f32 %v880_v52, %v505_v40  ;;  %v934_v59 = vadd.f32 %v933_v56, %v513_v44  ;;  %v949_v62 = vmul.f32 0.2, %v879_v47  ;;  %v951_v63 = vmul.f32 0.2, %v932_v50  ;;  %v1029_v52 = vld [vmem:[#allocation12 + $0x148] sm:$0xff] }
 0x2eb   :  { %v882_v60 = vpop.f32.mrf.mxu0  ;;  %v935_v61 = vpop.f32.mrf.mxu1  ;;  %v964_v12 = vmax.f32 %v877_v46, %v948_v57  ;;  %v966_v24 = vmax.f32 %v930_v51, %v950_v4  ;;  %v1033_v56 = vld [vmem:[#allocation12 + $0x168] sm:$0xff] }
 0x2ec   :  { %v883_v0 = vadd.f32 %v882_v60, %v8957_v41  ;;  %v936_v1 = vadd.f32 %v935_v61, %v8960_v42  ;;  %v952_v5 = vmul.f32 0.2, %v881_v58  ;;  %v954_v6 = vmul.f32 0.2, %v934_v59  ;;  %v1157_v61 = vld [vmem:[#allocation12 + $0x548] sm:$0xff] }
 0x2ed   :  { %v886_v7 = vpop.f32.mrf.mxu0  ;;  %v939_v8 = vpop.f32.mrf.mxu1  ;;  %v965_v20 = vmax.f32 %v879_v47, %v949_v62  ;;  %v967_v21 = vmax.f32 %v932_v50, %v951_v63  ;;  %v1161_v62 = vld [vmem:[#allocation12 + $0x568] sm:$0xff]  ;;  %v6948_v4 = vcombine.high %v1029_v52, %v1033_v56 }
 0x2ee   :  { %v953_v9 = vmul.f32 0.2, %v883_v0  ;;  %v955_v10 = vmul.f32 0.2, %v936_v1  ;;  %v8971_v11 = vadd.f32 %v886_v7, %v505_v40  ;;  %v968_v13 = vmax.f32 %v881_v58, %v952_v5 }
 0x2ef   :  { %v970_v14 = vmax.f32 %v934_v59, %v954_v6  ;;  %v888_v15 = vpop.f32.mrf.mxu0  ;;  %v941_v16 = vpop.f32.mrf.mxu1  ;;  %v940_v25 = vadd.f32 %v939_v8, %v513_v44  ;;  %v7076_v7 = vcombine.high %v1157_v61, %v1161_v62 }
 0x2f0   :  { %v969_v22 = vmax.f32 %v883_v0, %v953_v9  ;;  %v971_v23 = vmax.f32 %v936_v1, %v955_v10  ;;  %v889_v26 = vadd.f32 %v888_v15, %v8957_v41  ;;  %v942_v27 = vadd.f32 %v941_v16, %v8960_v42  ;;  %v1021_v10 = vld [vmem:[#allocation12 + $0x108] sm:$0xff] }
 0x2f1   :  { %v890_v28 = vpop.f32.mrf.mxu0  ;;  %v943_v32 = vpop.f32.mrf.mxu1  ;;  %v956_v43 = vmul.f32 0.2, %v8971_v11  ;;  %v8985_v46 = vpack.c.bf16 %v968_v13, %v964_v12  ;;  %v8987_v48 = vpack.c.bf16 %v970_v14, %v966_v24  ;;  %v958_v63 = vmul.f32 0.2, %v940_v25  ;;  %v1025_v12 = vld [vmem:[#allocation12 + $0x128] sm:$0xff] }
 0x2f2   :  { %v8979_v36 = vpack.c.bf16 %v969_v22, %v965_v20  ;;  %v8981_v37 = vpack.c.bf16 %v971_v23, %v967_v21  ;;  %v891_v49 = vadd.f32 %v890_v28, %v505_v40  ;;  %v944_v47 = vadd.f32 %v943_v32, %v513_v44  ;;  %v1141_v20 = vld [vmem:[#allocation12 + $0x4c8] sm:$0xff] }
 0x2f3   :  { %v892_v50 = vpop.f32.mrf.mxu0  ;;  %v945_v51 = vpop.f32.mrf.mxu1  ;;  %v957_v57 = vmul.f32 0.2, %v889_v26  ;;  %v959_v58 = vmul.f32 0.2, %v942_v27  ;;  %v6955_v44 = vcombine.low %v8967_v2, %v8969_v3  ;;  %v972_v29 = vmax.f32 %v8971_v11, %v956_v43  ;;  %v1145_v21 = vld [vmem:[#allocation12 + $0x4e8] sm:$0xff] }
 0x2f4   :  { %v893_v59 = vadd.f32 %v892_v50, %v8957_v41  ;;  %v946_v60 = vadd.f32 %v945_v51, %v8960_v42  ;;  %2598 = vmatprep.mubr.bf16.mxu0 %v8979_v36  ;;  %2651 = vmatprep.mubr.bf16.mxu1 %v8981_v37  ;;  %v960_v0 = vmul.f32 0.2, %v891_v49  ;;  %v962_v40 = vmul.f32 0.2, %v944_v47  ;;  %v1133_v28 = vld [vmem:[#allocation12 + $0x488] sm:$0xff] }
 0x2f5   :  { %2599 = vmatmul.mubr.bf16.vlgmr.msra.gmra.mxu0 %v8985_v46  ;;  %2652 = vmatmul.mubr.bf16.vlgmr.msra.gmra.mxu1 %v8987_v48  ;;  %v7083_v42 = vcombine.low %v8975_v18, %v1169_v19  ;;  %v973_v8 = vmax.f32 %v889_v26, %v957_v57  ;;  %v975_v2 = vmax.f32 %v942_v27, %v959_v58  ;;  %v1017_v19 = vld [vmem:[#allocation12 + $0xe8] sm:$0xff] }
 0x2f6   :  { %v961_v1 = vmul.f32 0.2, %v893_v59  ;;  %v963_v41 = vmul.f32 0.2, %v946_v60  ;;  %2673 = vmatpush1.bf16.msra.mxu0 %v6963_v34  ;;  %2726 = vmatpush1.bf16.msra.mxu1 %v7091_v35  ;;  %v976_v5 = vmax.f32 %v891_v49, %v960_v0  ;;  %v978_v6 = vmax.f32 %v944_v47, %v962_v40  ;;  %v1005_v26 = vld [vmem:[#allocation12 + $0x88] sm:$0xff] }
 0x2f7   :  { %2674 = vmatprep.subr.bf16.mxu0 %v6956_v17  ;;  %2727 = vmatprep.subr.bf16.mxu1 %v7084_v45  ;;  %v974_v30 = vmax.f32 %v940_v25, %v958_v63  ;;  %v6947_v34 = vcombine.low %v1029_v52, %v1033_v56  ;;  %v7075_v14 = vcombine.low %v1157_v61, %v1161_v62  ;;  %v1013_v17 = vld [vmem:[#allocation12 + $0xc8] sm:$0xff] }
 0x2f8   :  { %v977_v3 = vmax.f32 %v893_v59, %v961_v1  ;;  %v979_v9 = vmax.f32 %v946_v60, %v963_v41  ;;  %v9009_v15 = vpack.c.bf16 %v976_v5, %v972_v29  ;;  %v6940_v11 = vcombine.high %v1021_v10, %v1025_v12  ;;  %v1009_v27 = vld [vmem:[#allocation12 + $0xa8] sm:$0xff] }
 0x2f9   :  { %v9011_v16 = vpack.c.bf16 %v978_v6, %v974_v30  ;;  %v7068_v18 = vcombine.high %v1149_v31, %v1153_v33  ;;  %v6939_v22 = vcombine.low %v1021_v10, %v1025_v12  ;;  %v7067_v23 = vcombine.low %v1149_v31, %v1153_v33  ;;  %v1137_v32 = vld [vmem:[#allocation12 + $0x4a8] sm:$0xff] }
 0x2fa   :  { %v9005_v35 = vpack.c.bf16 %v977_v3, %v973_v8  ;;  %v9007_v13 = vpack.c.bf16 %v979_v9, %v975_v2  ;;  %2675 = vmatpush1.bf16.msra.mxu0 %v6955_v44  ;;  %2728 = vmatpush1.bf16.msra.mxu1 %v7083_v42  ;;  %v6932_v24 = vcombine.high %v1013_v17, %v1017_v19  ;;  %v997_v50 = vld [vmem:[#allocation12 + $0x48] sm:$0xff] }
 0x2fb   :  { %2676 = vmatprep.subr.bf16.mxu0 %v6948_v4  ;;  %2729 = vmatprep.subr.bf16.mxu1 %v7076_v7  ;;  %v7060_v25 = vcombine.high %v1141_v20, %v1145_v21  ;;  %v6931_v43 = vcombine.low %v1013_v17, %v1017_v19  ;;  %v7059_v45 = vcombine.low %v1141_v20, %v1145_v21  ;;  %v1001_v51 = vld [vmem:[#allocation12 + $0x68] sm:$0xff] }
 0x2fc   :  { %2608 = vmatprep.mubr.bf16.mxu0 %v9005_v35  ;;  %2661 = vmatprep.mubr.bf16.mxu1 %v9007_v13  ;;  %v6924_v49 = vcombine.high %v1005_v26, %v1009_v27  ;;  %v7052_v47 = vcombine.high %v1133_v28, %v1137_v32  ;;  %v1125_v52 = vld [vmem:[#allocation12 + $0x448] sm:$0xff]  ;;  %v6923_v57 = vcombine.low %v1005_v26, %v1009_v27 }
 0x2fd   :  { %2609 = vmatmul.mubr.bf16.gmra.mxu0 %v9009_v15  ;;  %2662 = vmatmul.mubr.bf16.gmra.mxu1 %v9011_v16  ;;  %v1129_v56 = vld [vmem:[#allocation12 + $0x468] sm:$0xff]  ;;  %v7051_v58 = vcombine.low %v1133_v28, %v1137_v32  ;;  %v6916_v59 = vcombine.high %v997_v50, %v1001_v51  ;;  %v6915_v40 = vcombine.low %v997_v50, %v1001_v51 }
 0x2fe   :  { %2677 = vmatpush1.bf16.msra.mxu0 %v6947_v34  ;;  %2730 = vmatpush1.bf16.msra.mxu1 %v7075_v14  ;;  %v7044_v60 = vcombine.high %v1125_v52, %v1129_v56  ;;  %v989_v61 = vld [vmem:[#allocation12 + $0x8] sm:$0xff]  ;;  %v7043_v44 = vcombine.low %v1125_v52, %v1129_v56 }
 0x2ff   :  { %2704 = vmatprep.mubr.bf16.mxu0 %v8979_v36  ;;  %2757 = vmatprep.mubr.bf16.mxu1 %v8981_v37  ;;  %v993_v62 = vld [vmem:[#allocation12 + $0x28] sm:$0xff] }
 0x300   :  { %2678 = vmatprep.subr.bf16.mxu0 %v6940_v11  ;;  %2731 = vmatprep.subr.bf16.mxu1 %v7068_v18  ;;  %v1117_v63 = vld [vmem:[#allocation12 + $0x408] sm:$0xff]  ;;  %v6908_v1 = vcombine.high %v989_v61, %v993_v62  ;;  %v6907_v7 = vcombine.low %v989_v61, %v993_v62 }
 0x301   :  { %v1121_v0 = vld [vmem:[#allocation12 + $0x428] sm:$0xff] }
 0x302   :  { %2679 = vmatpush1.bf16.msra.mxu0 %v6939_v22  ;;  %2732 = vmatpush1.bf16.msra.mxu1 %v7067_v23  ;;  %v7036_v41 = vcombine.high %v1117_v63, %v1121_v0  ;;  %v1109_v42 = vld [vmem:[#allocation12 + $0x3c8] sm:$0xff]  ;;  %v7035_v8 = vcombine.low %v1117_v63, %v1121_v0 }
 0x303   :  { %2680 = vmatprep.subr.bf16.mxu0 %v6932_v24  ;;  %2733 = vmatprep.subr.bf16.mxu1 %v7060_v25  ;;  %v1113_v4 = vld [vmem:[#allocation12 + $0x3e8] sm:$0xff] }
 0x304   :  { %v1237_v5 = vld [vmem:[#allocation12 + $0x7c8] sm:$0xff]  ;;  %v7028_v2 = vcombine.high %v1109_v42, %v1113_v4  ;;  %v7027_v34 = vcombine.low %v1109_v42, %v1113_v4 }
 0x305   :  { %v1241_v6 = vld [vmem:[#allocation12 + $0x7e8] sm:$0xff] }
 0x306   :  { %2681 = vmatpush1.bf16.msra.mxu0 %v6931_v43  ;;  %2734 = vmatpush1.bf16.msra.mxu1 %v7059_v45  ;;  %v7156_v3 = vcombine.high %v1237_v5, %v1241_v6  ;;  %v1101_v9 = vld [vmem:[#allocation12 + $0x388] sm:$0xff]  ;;  %v7155_v12 = vcombine.low %v1237_v5, %v1241_v6 }
 0x307   :  { %2682 = vmatprep.subr.bf16.mxu0 %v6924_v49  ;;  %2735 = vmatprep.subr.bf16.mxu1 %v7052_v47  ;;  %v1105_v10 = vld [vmem:[#allocation12 + $0x3a8] sm:$0xff] }
 0x308   :  { %v1229_v29 = vld [vmem:[#allocation12 + $0x788] sm:$0xff]  ;;  %v7020_v31 = vcombine.high %v1101_v9, %v1105_v10  ;;  %v7019_v19 = vcombine.low %v1101_v9, %v1105_v10 }
 0x309   :  { %v1233_v30 = vld [vmem:[#allocation12 + $0x7a8] sm:$0xff] }
 0x30a   :  { %2683 = vmatpush1.bf16.msra.mxu0 %v6923_v57  ;;  %2736 = vmatpush1.bf16.msra.mxu1 %v7051_v58  ;;  %v7148_v33 = vcombine.high %v1229_v29, %v1233_v30  ;;  %v1093_v14 = vld [vmem:[#allocation12 + $0x348] sm:$0xff]  ;;  %v7147_v20 = vcombine.low %v1229_v29, %v1233_v30 }
 0x30b   :  { %2684 = vmatprep.subr.bf16.mxu0 %v6916_v59  ;;  %2737 = vmatprep.subr.bf16.mxu1 %v7044_v60  ;;  %v1097_v17 = vld [vmem:[#allocation12 + $0x368] sm:$0xff] }
 0x30c   :  { %v1221_v11 = vld [vmem:[#allocation12 + $0x748] sm:$0xff]  ;;  %v7012_v21 = vcombine.high %v1093_v14, %v1097_v17  ;;  %v7011_v27 = vcombine.low %v1093_v14, %v1097_v17  ;;  %v1178_v14 = vld [vmem:[#allocation12 + $0x5f0] sm:$0xff] }
 0x30d   :  { %v1225_v18 = vld [vmem:[#allocation12 + $0x768] sm:$0xff] }
 0x30e   :  { %2685 = vmatpush1.bf16.msra.mxu0 %v6915_v40  ;;  %2738 = vmatpush1.bf16.msra.mxu1 %v7043_v44  ;;  %v7140_v22 = vcombine.high %v1221_v11, %v1225_v18  ;;  %v1085_v23 = vld [vmem:[#allocation12 + $0x308] sm:$0xff]  ;;  %v7139_v28 = vcombine.low %v1221_v11, %v1225_v18 }
 0x30f   :  { %2686 = vmatprep.subr.bf16.mxu0 %v6908_v1  ;;  %2739 = vmatprep.subr.bf16.mxu1 %v7036_v41  ;;  %v1089_v24 = vld [vmem:[#allocation12 + $0x328] sm:$0xff] }
 0x310   :  { %v1213_v25 = vld [vmem:[#allocation12 + $0x708] sm:$0xff]  ;;  %v7004_v32 = vcombine.high %v1085_v23, %v1089_v24  ;;  %v7003_v51 = vcombine.low %v1085_v23, %v1089_v24  ;;  %v1170_v23 = vld [vmem:[#allocation12 + $0x5b0] sm:$0xff] }
 0x311   :  { %v1217_v26 = vld [vmem:[#allocation12 + $0x728] sm:$0xff] }
 0x312   :  { %2687 = vmatpush1.bf16.msra.mxu0 %v6907_v7  ;;  %2740 = vmatpush1.bf16.msra.mxu1 %v7035_v8  ;;  %v7132_v43 = vcombine.high %v1213_v25, %v1217_v26  ;;  %v1077_v45 = vld [vmem:[#allocation12 + $0x2c8] sm:$0xff]  ;;  %v7131_v52 = vcombine.low %v1213_v25, %v1217_v26 }
 0x313   :  { %2688 = vmatprep.subr.bf16.mxu0 %v7028_v2  ;;  %2741 = vmatprep.subr.bf16.mxu1 %v7156_v3  ;;  %v1081_v49 = vld [vmem:[#allocation12 + $0x2e8] sm:$0xff] }
 0x314   :  { %v1205_v47 = vld [vmem:[#allocation12 + $0x6c8] sm:$0xff]  ;;  %v6996_v56 = vcombine.high %v1077_v45, %v1081_v49  ;;  %v6995_v62 = vcombine.low %v1077_v45, %v1081_v49  ;;  %v1162_v45 = vld [vmem:[#allocation12 + $0x570] sm:$0xff] }
 0x315   :  { %v1209_v50 = vld [vmem:[#allocation12 + $0x6e8] sm:$0xff] }
 0x316   :  { %2689 = vmatpush2.bf16.msra.mxu0 %v7027_v34  ;;  %2742 = vmatpush2.bf16.msra.mxu1 %v7155_v12  ;;  %v7124_v57 = vcombine.high %v1205_v47, %v1209_v50  ;;  %v1069_v58 = vld [vmem:[#allocation12 + $0x288] sm:$0xff]  ;;  %v7123_v63 = vcombine.low %v1205_v47, %v1209_v50  ;;  %v1046_v12 = vld [vmem:[#allocation12 + $0x1d0] sm:$0xff] }
 0x317   :  { %2690 = vmatprep.subr.bf16.mxu0 %v7020_v31  ;;  %2743 = vmatprep.subr.bf16.mxu1 %v7148_v33  ;;  %v1073_v59 = vld [vmem:[#allocation12 + $0x2a8] sm:$0xff]  ;;  %v1050_v31 = vld [vmem:[#allocation12 + $0x1f0] sm:$0xff] }
 0x318   :  { %v1197_v60 = vld [vmem:[#allocation12 + $0x688] sm:$0xff]  ;;  %v6988_v0 = vcombine.high %v1069_v58, %v1073_v59  ;;  %v6987_v4 = vcombine.low %v1069_v58, %v1073_v59  ;;  %v1174_v33 = vld [vmem:[#allocation12 + $0x5d0] sm:$0xff]  ;;  %v6966_v18 = vcombine.high %v1046_v12, %v1050_v31  ;;  %v6965_v24 = vcombine.low %v1046_v12, %v1050_v31 }
 0x319   :  { %v1201_v61 = vld [vmem:[#allocation12 + $0x6a8] sm:$0xff]  ;;  %v7093_v25 = vcombine.low %v1174_v33, %v1178_v14  ;;  %v1154_v58 = vld [vmem:[#allocation12 + $0x530] sm:$0xff] }
 0x31a   :  { %2691 = vmatpush2.bf16.msra.mxu0 %v7019_v19  ;;  %2744 = vmatpush2.bf16.msra.mxu1 %v7147_v20  ;;  %v7116_v40 = vcombine.high %v1197_v60, %v1201_v61  ;;  %v1061_v44 = vld [vmem:[#allocation12 + $0x248] sm:$0xff]  ;;  %v7115_v5 = vcombine.low %v1197_v60, %v1201_v61  ;;  %v7094_v19 = vcombine.high %v1174_v33, %v1178_v14  ;;  %v1038_v20 = vld [vmem:[#allocation12 + $0x190] sm:$0xff] }
 0x31b   :  { %2692 = vmatprep.subr.bf16.mxu0 %v7012_v21  ;;  %2745 = vmatprep.subr.bf16.mxu1 %v7140_v22  ;;  %v1065_v1 = vld [vmem:[#allocation12 + $0x268] sm:$0xff]  ;;  %v1042_v21 = vld [vmem:[#allocation12 + $0x1b0] sm:$0xff] }
 0x31c   :  { %v1189_v41 = vld [vmem:[#allocation12 + $0x648] sm:$0xff]  ;;  %v6980_v6 = vcombine.high %v1061_v44, %v1065_v1  ;;  %v6979_v10 = vcombine.low %v1061_v44, %v1065_v1  ;;  %v1166_v22 = vld [vmem:[#allocation12 + $0x590] sm:$0xff]  ;;  %v6958_v26 = vcombine.high %v1038_v20, %v1042_v21  ;;  %v6957_v49 = vcombine.low %v1038_v20, %v1042_v21 }
 0x31d   :  { %v1193_v42 = vld [vmem:[#allocation12 + $0x668] sm:$0xff]  ;;  %v7085_v47 = vcombine.low %v1166_v22, %v1170_v23  ;;  %v1146_v44 = vld [vmem:[#allocation12 + $0x4f0] sm:$0xff] }
 0x31e   :  { %2693 = vmatpush2.bf16.msra.mxu0 %v7011_v27  ;;  %2746 = vmatpush2.bf16.msra.mxu1 %v7139_v28  ;;  %v7108_v7 = vcombine.high %v1189_v41, %v1193_v42  ;;  %v1053_v8 = vld [vmem:[#allocation12 + $0x208] sm:$0xff]  ;;  %v7107_v29 = vcombine.low %v1189_v41, %v1193_v42  ;;  %v7086_v27 = vcombine.high %v1166_v22, %v1170_v23  ;;  %v1030_v28 = vld [vmem:[#allocation12 + $0x150] sm:$0xff] }
 0x31f   :  { %2694 = vmatprep.subr.bf16.mxu0 %v7004_v32  ;;  %2747 = vmatprep.subr.bf16.mxu1 %v7132_v43  ;;  %v1057_v2 = vld [vmem:[#allocation12 + $0x228] sm:$0xff]  ;;  %v1034_v32 = vld [vmem:[#allocation12 + $0x170] sm:$0xff] }
 0x320   :  { %v1181_v3 = vld [vmem:[#allocation12 + $0x608] sm:$0xff]  ;;  %v6972_v30 = vcombine.high %v1053_v8, %v1057_v2  ;;  %v6971_v17 = vcombine.low %v1053_v8, %v1057_v2  ;;  %v1158_v43 = vld [vmem:[#allocation12 + $0x550] sm:$0xff]  ;;  %v6950_v50 = vcombine.high %v1030_v28, %v1034_v32  ;;  %v6949_v59 = vcombine.low %v1030_v28, %v1034_v32 }
 0x321   :  { %v1185_v9 = vld [vmem:[#allocation12 + $0x628] sm:$0xff]  ;;  %v7077_v60 = vcombine.low %v1158_v43, %v1162_v45  ;;  %v1138_v8 = vld [vmem:[#allocation12 + $0x4b0] sm:$0xff] }
 0x322   :  { %2695 = vmatpush2.bf16.msra.mxu0 %v7003_v51  ;;  %2748 = vmatpush2.bf16.msra.mxu1 %v7131_v52  ;;  %v7100_v34 = vcombine.high %v1181_v3, %v1185_v9  ;;  %v7099_v11 = vcombine.low %v1181_v3, %v1185_v9  ;;  %v7078_v51 = vcombine.high %v1158_v43, %v1162_v45  ;;  %v1022_v52 = vld [vmem:[#allocation12 + $0x110] sm:$0xff] }
 0x323   :  { %2696 = vmatprep.subr.bf16.mxu0 %v6996_v56  ;;  %2749 = vmatprep.subr.bf16.mxu1 %v7124_v57  ;;  %v1026_v56 = vld [vmem:[#allocation12 + $0x130] sm:$0xff] }
 0x324   :  { %v1150_v57 = vld [vmem:[#allocation12 + $0x510] sm:$0xff]  ;;  %v6942_v61 = vcombine.high %v1022_v52, %v1026_v56  ;;  %v6941_v1 = vcombine.low %v1022_v52, %v1026_v56 }
 0x325   :  { %v7069_v41 = vcombine.low %v1150_v57, %v1154_v58  ;;  %v1130_v12 = vld [vmem:[#allocation12 + $0x470] sm:$0xff] }
 0x326   :  { %2697 = vmatpush2.bf16.msra.mxu0 %v6995_v62  ;;  %2750 = vmatpush2.bf16.msra.mxu1 %v7123_v63  ;;  %v7070_v62 = vcombine.high %v1150_v57, %v1154_v58  ;;  %v1014_v63 = vld [vmem:[#allocation12 + $0xd0] sm:$0xff] }
 0x327   :  { %2698 = vmatprep.subr.bf16.mxu0 %v6988_v0  ;;  %2751 = vmatprep.subr.bf16.mxu1 %v7116_v40  ;;  %v1018_v0 = vld [vmem:[#allocation12 + $0xf0] sm:$0xff] }
 0x328   :  { %v1142_v40 = vld [vmem:[#allocation12 + $0x4d0] sm:$0xff]  ;;  %v6934_v42 = vcombine.high %v1014_v63, %v1018_v0  ;;  %v6933_v2 = vcombine.low %v1014_v63, %v1018_v0 }
 0x329   :  { %v7061_v3 = vcombine.low %v1142_v40, %v1146_v44  ;;  %v1122_v20 = vld [vmem:[#allocation12 + $0x430] sm:$0xff] }
 0x32a   :  { %2699 = vmatpush2.bf16.msra.mxu0 %v6987_v4  ;;  %2752 = vmatpush2.bf16.msra.mxu1 %v7115_v5  ;;  %v7062_v4 = vcombine.high %v1142_v40, %v1146_v44  ;;  %v1006_v5 = vld [vmem:[#allocation12 + $0x90] sm:$0xff] }
 0x32b   :  { %2700 = vmatprep.subr.bf16.mxu0 %v6980_v6  ;;  %2753 = vmatprep.subr.bf16.mxu1 %v7108_v7  ;;  %v1010_v6 = vld [vmem:[#allocation12 + $0xb0] sm:$0xff] }
 0x32c   :  { %v1134_v7 = vld [vmem:[#allocation12 + $0x490] sm:$0xff]  ;;  %v6926_v9 = vcombine.high %v1006_v5, %v1010_v6  ;;  %v6925_v31 = vcombine.low %v1006_v5, %v1010_v6 }
 0x32d   :  { %v7053_v33 = vcombine.low %v1134_v7, %v1138_v8  ;;  %v1242_v28 = vld [vmem:[#allocation12 + $0x7f0] sm:$0xff] }
 0x32e   :  { %2701 = vmatpush2.bf16.msra.mxu0 %v6979_v10  ;;  %2754 = vmatpush2.bf16.msra.mxu1 %v7107_v29  ;;  %v7054_v10 = vcombine.high %v1134_v7, %v1138_v8  ;;  %v998_v29 = vld [vmem:[#allocation12 + $0x50] sm:$0xff] }
 0x32f   :  { %2702 = vmatprep.subr.bf16.mxu0 %v6972_v30  ;;  %2755 = vmatprep.subr.bf16.mxu1 %v7100_v34  ;;  %v1002_v30 = vld [vmem:[#allocation12 + $0x70] sm:$0xff] }
 0x330   :  { %v1126_v34 = vld [vmem:[#allocation12 + $0x450] sm:$0xff]  ;;  %v6918_v14 = vcombine.high %v998_v29, %v1002_v30  ;;  %v6917_v21 = vcombine.low %v998_v29, %v1002_v30 }
 0x331   :  { %v7045_v22 = vcombine.low %v1126_v34, %v1130_v12  ;;  %v1234_v52 = vld [vmem:[#allocation12 + $0x7b0] sm:$0xff] }
 0x332   :  { %2703 = vmatpush2.bf16.msra.mxu0 %v6971_v17  ;;  %2756 = vmatpush2.bf16.msra.mxu1 %v7099_v11  ;;  %v7046_v17 = vcombine.high %v1126_v34, %v1130_v12  ;;  %v990_v11 = vld [vmem:[#allocation12 + $0x10] sm:$0xff] }
 0x333   :  { %2778 = vmatprep.subr.bf16.mxu0 %v6966_v18  ;;  %2831 = vmatprep.subr.bf16.mxu1 %v7094_v19  ;;  %v994_v18 = vld [vmem:[#allocation12 + $0x30] sm:$0xff] }
 0x334   :  { %v1118_v19 = vld [vmem:[#allocation12 + $0x410] sm:$0xff]  ;;  %v6910_v23 = vcombine.high %v990_v11, %v994_v18  ;;  %v6909_v32 = vcombine.low %v990_v11, %v994_v18 }
 0x335   :  { %2705 = vmatmul.mubr.bf16.vlgmr.msra.gmra.mxu0 %v8985_v46  ;;  %2758 = vmatmul.mubr.bf16.vlgmr.msra.gmra.mxu1 %v8987_v48  ;;  %v7037_v43 = vcombine.low %v1118_v19, %v1122_v20  ;;  %v1226_v63 = vld [vmem:[#allocation12 + $0x770] sm:$0xff] }
 0x336   :  { %2714 = vmatprep.mubr.bf16.mxu0 %v9005_v35  ;;  %2767 = vmatprep.mubr.bf16.mxu1 %v9007_v13  ;;  %v1218_v5 = vld [vmem:[#allocation12 + $0x730] sm:$0xff] }
 0x337   :  { %2779 = vmatpush1.bf16.msra.mxu0 %v6965_v24  ;;  %2832 = vmatpush1.bf16.msra.mxu1 %v7093_v25  ;;  %v7038_v24 = vcombine.high %v1118_v19, %v1122_v20  ;;  %v1110_v25 = vld [vmem:[#allocation12 + $0x3d0] sm:$0xff] }
 0x338   :  { %2780 = vmatprep.subr.bf16.mxu0 %v6958_v26  ;;  %2833 = vmatprep.subr.bf16.mxu1 %v7086_v27  ;;  %v1114_v26 = vld [vmem:[#allocation12 + $0x3f0] sm:$0xff] }
 0x339   :  { %v1238_v27 = vld [vmem:[#allocation12 + $0x7d0] sm:$0xff]  ;;  %v7030_v45 = vcombine.high %v1110_v25, %v1114_v26  ;;  %v7029_v56 = vcombine.low %v1110_v25, %v1114_v26 }
 0x33a   :  { %v7157_v57 = vcombine.low %v1238_v27, %v1242_v28  ;;  %v1210_v29 = vld [vmem:[#allocation12 + $0x6f0] sm:$0xff] }
 0x33b   :  { %2781 = vmatpush1.bf16.msra.mxu0 %v6957_v49  ;;  %2834 = vmatpush1.bf16.msra.mxu1 %v7085_v47  ;;  %v7158_v49 = vcombine.high %v1238_v27, %v1242_v28  ;;  %v1102_v47 = vld [vmem:[#allocation12 + $0x390] sm:$0xff] }
 0x33c   :  { %2782 = vmatprep.subr.bf16.mxu0 %v6950_v50  ;;  %2835 = vmatprep.subr.bf16.mxu1 %v7078_v51  ;;  %v1106_v50 = vld [vmem:[#allocation12 + $0x3b0] sm:$0xff] }
 0x33d   :  { %2715 = vmatmul.mubr.bf16.gmra.mxu0 %v9009_v15  ;;  %2768 = vmatmul.mubr.bf16.gmra.mxu1 %v9011_v16  ;;  %v1230_v51 = vld [vmem:[#allocation12 + $0x790] sm:$0xff]  ;;  %v7022_v58 = vcombine.high %v1102_v47, %v1106_v50  ;;  %v7021_v0 = vcombine.low %v1102_v47, %v1106_v50 }
 0x33e   :  { %2810 = vmatprep.mubr.bf16.mxu0 %v8979_v36  ;;  %2863 = vmatprep.mubr.bf16.mxu1 %v8981_v37  ;;  %v7149_v40 = vcombine.low %v1230_v51, %v1234_v52  ;;  %v1202_v11 = vld [vmem:[#allocation12 + $0x6b0] sm:$0xff] }
 0x33f   :  { %2783 = vmatpush1.bf16.msra.mxu0 %v6949_v59  ;;  %2836 = vmatpush1.bf16.msra.mxu1 %v7077_v60  ;;  %v7150_v59 = vcombine.high %v1230_v51, %v1234_v52  ;;  %v1094_v60 = vld [vmem:[#allocation12 + $0x350] sm:$0xff] }
 0x340   :  { %2784 = vmatprep.subr.bf16.mxu0 %v6942_v61  ;;  %2837 = vmatprep.subr.bf16.mxu1 %v7070_v62  ;;  %v1098_v61 = vld [vmem:[#allocation12 + $0x370] sm:$0xff] }
 0x341   :  { %v1222_v62 = vld [vmem:[#allocation12 + $0x750] sm:$0xff]  ;;  %v7014_v44 = vcombine.high %v1094_v60, %v1098_v61  ;;  %v7013_v6 = vcombine.low %v1094_v60, %v1098_v61  ;;  %v1179_v60 = vld [vmem:[#allocation12 + $0x5f8] sm:$0xff] }
 0x342   :  { %v7141_v7 = vcombine.low %v1222_v62, %v1226_v63  ;;  %v1194_v25 = vld [vmem:[#allocation12 + $0x670] sm:$0xff] }
 0x343   :  { %2785 = vmatpush1.bf16.msra.mxu0 %v6941_v1  ;;  %2838 = vmatpush1.bf16.msra.mxu1 %v7069_v41  ;;  %v7142_v1 = vcombine.high %v1222_v62, %v1226_v63  ;;  %v1086_v41 = vld [vmem:[#allocation12 + $0x310] sm:$0xff] }
 0x344   :  { %2786 = vmatprep.subr.bf16.mxu0 %v6934_v42  ;;  %2839 = vmatprep.subr.bf16.mxu1 %v7062_v4  ;;  %v1090_v42 = vld [vmem:[#allocation12 + $0x330] sm:$0xff] }
 0x345   :  { %v1214_v4 = vld [vmem:[#allocation12 + $0x710] sm:$0xff]  ;;  %v7006_v8 = vcombine.high %v1086_v41, %v1090_v42  ;;  %v7005_v30 = vcombine.low %v1086_v41, %v1090_v42  ;;  %v1171_v41 = vld [vmem:[#allocation12 + $0x5b8] sm:$0xff] }
 0x346   :  { %v7133_v34 = vcombine.low %v1214_v4, %v1218_v5  ;;  %v1186_v47 = vld [vmem:[#allocation12 + $0x630] sm:$0xff] }
 0x347   :  { %2787 = vmatpush1.bf16.msra.mxu0 %v6933_v2  ;;  %2840 = vmatpush1.bf16.msra.mxu1 %v7061_v3  ;;  %v7134_v2 = vcombine.high %v1214_v4, %v1218_v5  ;;  %v1078_v3 = vld [vmem:[#allocation12 + $0x2d0] sm:$0xff] }
 0x348   :  { %2788 = vmatprep.subr.bf16.mxu0 %v6926_v9  ;;  %2841 = vmatprep.subr.bf16.mxu1 %v7054_v10  ;;  %v1082_v9 = vld [vmem:[#allocation12 + $0x2f0] sm:$0xff] }
 0x349   :  { %v1206_v10 = vld [vmem:[#allocation12 + $0x6d0] sm:$0xff]  ;;  %v6998_v12 = vcombine.high %v1078_v3, %v1082_v9  ;;  %v6997_v18 = vcombine.low %v1078_v3, %v1082_v9  ;;  %v1163_v3 = vld [vmem:[#allocation12 + $0x578] sm:$0xff] }
 0x34a   :  { %v7125_v19 = vcombine.low %v1206_v10, %v1210_v29 }
 0x34b   :  { %2789 = vmatpush1.bf16.msra.mxu0 %v6925_v31  ;;  %2842 = vmatpush1.bf16.msra.mxu1 %v7053_v33  ;;  %v7126_v31 = vcombine.high %v1206_v10, %v1210_v29  ;;  %v1070_v33 = vld [vmem:[#allocation12 + $0x290] sm:$0xff] }
 0x34c   :  { %2790 = vmatprep.subr.bf16.mxu0 %v6918_v14  ;;  %2843 = vmatprep.subr.bf16.mxu1 %v7046_v17  ;;  %v1074_v14 = vld [vmem:[#allocation12 + $0x2b0] sm:$0xff] }
 0x34d   :  { %v1198_v17 = vld [vmem:[#allocation12 + $0x690] sm:$0xff]  ;;  %v6990_v20 = vcombine.high %v1070_v33, %v1074_v14  ;;  %v6989_v26 = vcombine.low %v1070_v33, %v1074_v14  ;;  %v1155_v33 = vld [vmem:[#allocation12 + $0x538] sm:$0xff] }
 0x34e   :  { %v7117_v27 = vcombine.low %v1198_v17, %v1202_v11 }
 0x34f   :  { %2791 = vmatpush1.bf16.msra.mxu0 %v6917_v21  ;;  %2844 = vmatpush1.bf16.msra.mxu1 %v7045_v22  ;;  %v7118_v21 = vcombine.high %v1198_v17, %v1202_v11  ;;  %v1062_v22 = vld [vmem:[#allocation12 + $0x250] sm:$0xff] }
 0x350   :  { %2792 = vmatprep.subr.bf16.mxu0 %v6910_v23  ;;  %2845 = vmatprep.subr.bf16.mxu1 %v7038_v24  ;;  %v1066_v23 = vld [vmem:[#allocation12 + $0x270] sm:$0xff] }
 0x351   :  { %v1190_v24 = vld [vmem:[#allocation12 + $0x650] sm:$0xff]  ;;  %v6982_v28 = vcombine.high %v1062_v22, %v1066_v23  ;;  %v6981_v50 = vcombine.low %v1062_v22, %v1066_v23  ;;  %v1147_v22 = vld [vmem:[#allocation12 + $0x4f8] sm:$0xff] }
 0x352   :  { %v7109_v51 = vcombine.low %v1190_v24, %v1194_v25 }
 0x353   :  { %2793 = vmatpush1.bf16.msra.mxu0 %v6909_v32  ;;  %2846 = vmatpush1.bf16.msra.mxu1 %v7037_v43  ;;  %v7110_v32 = vcombine.high %v1190_v24, %v1194_v25  ;;  %v1054_v43 = vld [vmem:[#allocation12 + $0x210] sm:$0xff] }
 0x354   :  { %2794 = vmatprep.subr.bf16.mxu0 %v7030_v45  ;;  %2847 = vmatprep.subr.bf16.mxu1 %v7158_v49  ;;  %v1058_v45 = vld [vmem:[#allocation12 + $0x230] sm:$0xff] }
 0x355   :  { %v1182_v49 = vld [vmem:[#allocation12 + $0x610] sm:$0xff]  ;;  %v6974_v52 = vcombine.high %v1054_v43, %v1058_v45  ;;  %v6973_v61 = vcombine.low %v1054_v43, %v1058_v45  ;;  %v1139_v43 = vld [vmem:[#allocation12 + $0x4b8] sm:$0xff] }
 0x356   :  { %v7101_v62 = vcombine.low %v1182_v49, %v1186_v47 }
 0x357   :  { %2795 = vmatpush2.bf16.msra.mxu0 %v7029_v56  ;;  %2848 = vmatpush2.bf16.msra.mxu1 %v7157_v57  ;;  %v7102_v56 = vcombine.high %v1182_v49, %v1186_v47  ;;  %v1047_v57 = vld [vmem:[#allocation12 + $0x1d8] sm:$0xff] }
 0x358   :  { %2796 = vmatprep.subr.bf16.mxu0 %v7022_v58  ;;  %2849 = vmatprep.subr.bf16.mxu1 %v7150_v59  ;;  %v1051_v58 = vld [vmem:[#allocation12 + $0x1f8] sm:$0xff] }
 0x359   :  { %v1175_v59 = vld [vmem:[#allocation12 + $0x5d8] sm:$0xff]  ;;  %v6968_v63 = vcombine.high %v1047_v57, %v1051_v58  ;;  %v6967_v42 = vcombine.low %v1047_v57, %v1051_v58 }
 0x35a   :  { %v7095_v4 = vcombine.low %v1175_v59, %v1179_v60  ;;  %v999_v47 = vld [vmem:[#allocation12 + $0x58] sm:$0xff] }
 0x35b   :  { %2797 = vmatpush2.bf16.msra.mxu0 %v7021_v0  ;;  %2850 = vmatpush2.bf16.msra.mxu1 %v7149_v40  ;;  %v7096_v0 = vcombine.high %v1175_v59, %v1179_v60  ;;  %v1039_v40 = vld [vmem:[#allocation12 + $0x198] sm:$0xff] }
 0x35c   :  { %2798 = vmatprep.subr.bf16.mxu0 %v7014_v44  ;;  %2851 = vmatprep.subr.bf16.mxu1 %v7142_v1  ;;  %v1043_v44 = vld [vmem:[#allocation12 + $0x1b8] sm:$0xff] }
 0x35d   :  { %v1167_v1 = vld [vmem:[#allocation12 + $0x598] sm:$0xff]  ;;  %v6960_v5 = vcombine.high %v1039_v40, %v1043_v44  ;;  %v6959_v9 = vcombine.low %v1039_v40, %v1043_v44 }
 0x35e   :  { %v7087_v10 = vcombine.low %v1167_v1, %v1171_v41  ;;  %v991_v60 = vld [vmem:[#allocation12 + $0x18] sm:$0xff] }
 0x35f   :  { %2799 = vmatpush2.bf16.msra.mxu0 %v7013_v6  ;;  %2852 = vmatpush2.bf16.msra.mxu1 %v7141_v7  ;;  %v7088_v6 = vcombine.high %v1167_v1, %v1171_v41  ;;  %v1031_v7 = vld [vmem:[#allocation12 + $0x158] sm:$0xff] }
 0x360   :  { %2800 = vmatprep.subr.bf16.mxu0 %v7006_v8  ;;  %2853 = vmatprep.subr.bf16.mxu1 %v7134_v2  ;;  %v1035_v8 = vld [vmem:[#allocation12 + $0x178] sm:$0xff] }
 0x361   :  { %v1159_v2 = vld [vmem:[#allocation12 + $0x558] sm:$0xff]  ;;  %v6952_v29 = vcombine.high %v1031_v7, %v1035_v8  ;;  %v6951_v14 = vcombine.low %v1031_v7, %v1035_v8 }
 0x362   :  { %v7079_v17 = vcombine.low %v1159_v2, %v1163_v3  ;;  %v1111_v41 = vld [vmem:[#allocation12 + $0x3d8] sm:$0xff] }
 0x363   :  { %2801 = vmatpush2.bf16.msra.mxu0 %v7005_v30  ;;  %2854 = vmatpush2.bf16.msra.mxu1 %v7133_v34  ;;  %v7080_v30 = vcombine.high %v1159_v2, %v1163_v3  ;;  %v1023_v34 = vld [vmem:[#allocation12 + $0x118] sm:$0xff] }
 0x364   :  { %2802 = vmatprep.subr.bf16.mxu0 %v6998_v12  ;;  %2855 = vmatprep.subr.bf16.mxu1 %v7126_v31  ;;  %v1027_v12 = vld [vmem:[#allocation12 + $0x138] sm:$0xff] }
 0x365   :  { %v1151_v31 = vld [vmem:[#allocation12 + $0x518] sm:$0xff]  ;;  %v6944_v11 = vcombine.high %v1023_v34, %v1027_v12  ;;  %v6943_v23 = vcombine.low %v1023_v34, %v1027_v12 }
 0x366   :  { %v7071_v24 = vcombine.low %v1151_v31, %v1155_v33  ;;  %v1103_v3 = vld [vmem:[#allocation12 + $0x398] sm:$0xff] }
 0x367   :  { %2803 = vmatpush2.bf16.msra.mxu0 %v6997_v18  ;;  %2856 = vmatpush2.bf16.msra.mxu1 %v7125_v19  ;;  %v7072_v18 = vcombine.high %v1151_v31, %v1155_v33  ;;  %v1015_v19 = vld [vmem:[#allocation12 + $0xd8] sm:$0xff] }
 0x368   :  { %2804 = vmatprep.subr.bf16.mxu0 %v6990_v20  ;;  %2857 = vmatprep.subr.bf16.mxu1 %v7118_v21  ;;  %v1019_v20 = vld [vmem:[#allocation12 + $0xf8] sm:$0xff] }
 0x369   :  { %v1143_v21 = vld [vmem:[#allocation12 + $0x4d8] sm:$0xff]  ;;  %v6936_v25 = vcombine.high %v1015_v19, %v1019_v20  ;;  %v6935_v45 = vcombine.low %v1015_v19, %v1019_v20 }
 0x36a   :  { %v7063_v49 = vcombine.low %v1143_v21, %v1147_v22  ;;  %v1095_v33 = vld [vmem:[#allocation12 + $0x358] sm:$0xff] }
 0x36b   :  { %2805 = vmatpush2.bf16.msra.mxu0 %v6989_v26  ;;  %2858 = vmatpush2.bf16.msra.mxu1 %v7117_v27  ;;  %v7064_v26 = vcombine.high %v1143_v21, %v1147_v22  ;;  %v1007_v27 = vld [vmem:[#allocation12 + $0x98] sm:$0xff] }
 0x36c   :  { %2806 = vmatprep.subr.bf16.mxu0 %v6982_v28  ;;  %2859 = vmatprep.subr.bf16.mxu1 %v7110_v32  ;;  %v1011_v28 = vld [vmem:[#allocation12 + $0xb8] sm:$0xff] }
 0x36d   :  { %v1135_v32 = vld [vmem:[#allocation12 + $0x498] sm:$0xff] }
 0x36e   :  { %v7055_v57 = vcombine.low %v1135_v32, %v1139_v43  ;;  %v1087_v22 = vld [vmem:[#allocation12 + $0x318] sm:$0xff] }
 0x36f   :  { %2807 = vmatpush2.bf16.msra.mxu0 %v6981_v50  ;;  %2860 = vmatpush2.bf16.msra.mxu1 %v7109_v51  ;;  %v1003_v50 = vld [vmem:[#allocation12 + $0x78] sm:$0xff] }
 0x370   :  { %2808 = vmatprep.subr.bf16.mxu0 %v6974_v52  ;;  %2861 = vmatprep.subr.bf16.mxu1 %v7102_v56  ;;  %v1127_v51 = vld [vmem:[#allocation12 + $0x458] sm:$0xff]  ;;  %v6927_v56 = vcombine.low %v1007_v27, %v1011_v28  ;;  %v6920_v58 = vcombine.high %v999_v47, %v1003_v50 }
 0x371   :  { %v1131_v52 = vld [vmem:[#allocation12 + $0x478] sm:$0xff] }
 0x372   :  { %v7048_v59 = vcombine.high %v1127_v51, %v1131_v52  ;;  %v7047_v40 = vcombine.low %v1127_v51, %v1131_v52  ;;  %v1071_v52 = vld [vmem:[#allocation12 + $0x298] sm:$0xff] }
 0x373   :  { %2809 = vmatpush2.bf16.msra.mxu0 %v6973_v61  ;;  %2862 = vmatpush2.bf16.msra.mxu1 %v7101_v62  ;;  %v995_v61 = vld [vmem:[#allocation12 + $0x38] sm:$0xff] }
 0x374   :  { %2884 = vmatprep.subr.bf16.mxu0 %v6968_v63  ;;  %2937 = vmatprep.subr.bf16.mxu1 %v7096_v0  ;;  %v1119_v62 = vld [vmem:[#allocation12 + $0x418] sm:$0xff]  ;;  %v6919_v0 = vcombine.low %v999_v47, %v1003_v50  ;;  %v6912_v44 = vcombine.high %v991_v60, %v995_v61 }
 0x375   :  { %v1123_v63 = vld [vmem:[#allocation12 + $0x438] sm:$0xff] }
 0x376   :  { %2811 = vmatmul.mubr.bf16.vlgmr.msra.gmra.mxu0 %v8985_v46  ;;  %2864 = vmatmul.mubr.bf16.vlgmr.msra.gmra.mxu1 %v8987_v48  ;;  %v7040_v1 = vcombine.high %v1119_v62, %v1123_v63  ;;  %v7039_v7 = vcombine.low %v1119_v62, %v1123_v63  ;;  %v1063_v63 = vld [vmem:[#allocation12 + $0x258] sm:$0xff] }
 0x377   :  { %2820 = vmatprep.mubr.bf16.mxu0 %v9005_v35  ;;  %2873 = vmatprep.mubr.bf16.mxu1 %v9007_v13 }
 0x378   :  { %2885 = vmatpush1.bf16.msra.mxu0 %v6967_v42  ;;  %2938 = vmatpush1.bf16.msra.mxu1 %v7095_v4  ;;  %v1115_v42 = vld [vmem:[#allocation12 + $0x3f8] sm:$0xff] }
 0x379   :  { %2886 = vmatprep.subr.bf16.mxu0 %v6960_v5  ;;  %2939 = vmatprep.subr.bf16.mxu1 %v7088_v6  ;;  %v1239_v4 = vld [vmem:[#allocation12 + $0x7d8] sm:$0xff]  ;;  %v6911_v6 = vcombine.low %v991_v60, %v995_v61  ;;  %v7032_v8 = vcombine.high %v1111_v41, %v1115_v42 }
 0x37a   :  { %v1243_v5 = vld [vmem:[#allocation12 + $0x7f8] sm:$0xff] }
 0x37b   :  { %v7160_v2 = vcombine.high %v1239_v4, %v1243_v5  ;;  %v7159_v34 = vcombine.low %v1239_v4, %v1243_v5  ;;  %v1055_v5 = vld [vmem:[#allocation12 + $0x218] sm:$0xff] }
 0x37c   :  { %2887 = vmatpush1.bf16.msra.mxu0 %v6959_v9  ;;  %2940 = vmatpush1.bf16.msra.mxu1 %v7087_v10  ;;  %v1107_v9 = vld [vmem:[#allocation12 + $0x3b8] sm:$0xff] }
 0x37d   :  { %2888 = vmatprep.subr.bf16.mxu0 %v6952_v29  ;;  %2941 = vmatprep.subr.bf16.mxu1 %v7080_v30  ;;  %v1231_v10 = vld [vmem:[#allocation12 + $0x798] sm:$0xff]  ;;  %v7031_v30 = vcombine.low %v1111_v41, %v1115_v42  ;;  %v7024_v12 = vcombine.high %v1103_v3, %v1107_v9 }
 0x37e   :  { %2821 = vmatmul.mubr.bf16.gmra.mxu0 %v9009_v15  ;;  %2874 = vmatmul.mubr.bf16.gmra.mxu1 %v9011_v16  ;;  %v1235_v29 = vld [vmem:[#allocation12 + $0x7b8] sm:$0xff] }
 0x37f   :  { %2916 = vmatprep.mubr.bf16.mxu0 %v8979_v36  ;;  %2969 = vmatprep.mubr.bf16.mxu1 %v8981_v37  ;;  %v6928_v36 = vcombine.high %v1007_v27, %v1011_v28  ;;  %v7056_v37 = vcombine.high %v1135_v32, %v1139_v43  ;;  %v7152_v31 = vcombine.high %v1231_v10, %v1235_v29  ;;  %v1079_v43 = vld [vmem:[#allocation12 + $0x2d8] sm:$0xff] }
 0x380   :  { %2889 = vmatpush1.bf16.msra.mxu0 %v6951_v14  ;;  %2942 = vmatpush1.bf16.msra.mxu1 %v7079_v17  ;;  %v1099_v14 = vld [vmem:[#allocation12 + $0x378] sm:$0xff]  ;;  %v7151_v19 = vcombine.low %v1231_v10, %v1235_v29 }
 0x381   :  { %2890 = vmatprep.subr.bf16.mxu0 %v6944_v11  ;;  %2943 = vmatprep.subr.bf16.mxu1 %v7072_v18  ;;  %v1223_v17 = vld [vmem:[#allocation12 + $0x758] sm:$0xff]  ;;  %v7023_v18 = vcombine.low %v1103_v3, %v1107_v9  ;;  %v7016_v20 = vcombine.high %v1095_v33, %v1099_v14 }
 0x382   :  { %v1227_v11 = vld [vmem:[#allocation12 + $0x778] sm:$0xff] }
 0x383   :  { %v7144_v21 = vcombine.high %v1223_v17, %v1227_v11  ;;  %v7143_v27 = vcombine.low %v1223_v17, %v1227_v11 }
 0x384   :  { %2891 = vmatpush1.bf16.msra.mxu0 %v6943_v23  ;;  %2944 = vmatpush1.bf16.msra.mxu1 %v7071_v24  ;;  %v1091_v23 = vld [vmem:[#allocation12 + $0x338] sm:$0xff] }
 0x385   :  { %2892 = vmatprep.subr.bf16.mxu0 %v6936_v25  ;;  %2945 = vmatprep.subr.bf16.mxu1 %v7064_v26  ;;  %v1215_v24 = vld [vmem:[#allocation12 + $0x718] sm:$0xff]  ;;  %v7015_v26 = vcombine.low %v1095_v33, %v1099_v14  ;;  %v7008_v28 = vcombine.high %v1087_v22, %v1091_v23  ;;  %v7889_v14 = vld [vmem:[#allocation15 + $0x188] ss:$28 sps:$4 sm:$0xff]  }
 0x386   :  { %v1219_v25 = vld [vmem:[#allocation12 + $0x738] sm:$0xff] }
 0x387   :  { %v7136_v32 = vcombine.high %v1215_v24, %v1219_v25  ;;  %v7135_v47 = vcombine.low %v1215_v24, %v1219_v25  ;;  %v7892_v24 = vld [vmem:[#allocation15 + $0x150] ss:$28 sps:$4 sm:$0xff]  }
 0x388   :  { %2893 = vmatpush1.bf16.msra.mxu0 %v6935_v45  ;;  %2946 = vmatpush1.bf16.msra.mxu1 %v7063_v49  ;;  %v1083_v45 = vld [vmem:[#allocation12 + $0x2f8] sm:$0xff] }
 0x389   :  { %2894 = vmatprep.subr.bf16.mxu0 %v6928_v36  ;;  %2947 = vmatprep.subr.bf16.mxu1 %v7056_v37  ;;  %v1207_v49 = vld [vmem:[#allocation12 + $0x6d8] sm:$0xff]  ;;  %v7007_v37 = vcombine.low %v1087_v22, %v1091_v23  ;;  %v7000_v50 = vcombine.high %v1079_v43, %v1083_v45 }
 0x38a   :  { %v1211_v36 = vld [vmem:[#allocation12 + $0x6f8] sm:$0xff] }
 0x38b   :  { %v7128_v51 = vcombine.high %v1207_v49, %v1211_v36  ;;  %v7127_v60 = vcombine.low %v1207_v49, %v1211_v36 }
 0x38c   :  { %2895 = vmatpush1.bf16.msra.mxu0 %v6927_v56  ;;  %2948 = vmatpush1.bf16.msra.mxu1 %v7055_v57  ;;  %v1075_v56 = vld [vmem:[#allocation12 + $0x2b8] sm:$0xff] }
 0x38d   :  { %2896 = vmatprep.subr.bf16.mxu0 %v6920_v58  ;;  %2949 = vmatprep.subr.bf16.mxu1 %v7048_v59  ;;  %v1199_v57 = vld [vmem:[#allocation12 + $0x698] sm:$0xff]  ;;  %v6999_v59 = vcombine.low %v1079_v43, %v1083_v45  ;;  %v6992_v61 = vcombine.high %v1071_v52, %v1075_v56 }
 0x38e   :  { %v1203_v58 = vld [vmem:[#allocation12 + $0x6b8] sm:$0xff] }
 0x38f   :  { %v7120_v62 = vcombine.high %v1199_v57, %v1203_v58  ;;  %v7119_v41 = vcombine.low %v1199_v57, %v1203_v58  ;;  %v7895_v43 = vld [vmem:[#allocation15 + $0x118] ss:$28 sps:$4 sm:$0xff]   ;;  %v7903_v58 = vld [vmem:[#allocation15 + $0xac] ss:$28 sps:$4 sm:$0xff]  }
 0x390   :  { %2897 = vmatpush1.bf16.msra.mxu0 %v6919_v0  ;;  %2950 = vmatpush1.bf16.msra.mxu1 %v7047_v40  ;;  %v1067_v0 = vld [vmem:[#allocation12 + $0x278] sm:$0xff] }
 0x391   :  { %2898 = vmatprep.subr.bf16.mxu0 %v6912_v44  ;;  %2951 = vmatprep.subr.bf16.mxu1 %v7040_v1  ;;  %v1191_v40 = vld [vmem:[#allocation12 + $0x658] sm:$0xff]  ;;  %v6991_v1 = vcombine.low %v1071_v52, %v1075_v56  ;;  %v6984_v42 = vcombine.high %v1063_v63, %v1067_v0  ;;  %v7922_v52 = vld [vmem:[#allocation15 + $0x460] ss:$28 sps:$4 sm:$0xff]  }
 0x392   :  { %v1195_v44 = vld [vmem:[#allocation12 + $0x678] sm:$0xff] }
 0x393   :  { %v7112_v4 = vcombine.high %v1191_v40, %v1195_v44  ;;  %v7111_v3 = vcombine.low %v1191_v40, %v1195_v44  ;;  %v7916_v45 = vld [vmem:[#allocation15 + $0x498] ss:$28 sps:$4 sm:$0xff]  }
 0x394   :  { %2899 = vmatpush1.bf16.msra.mxu0 %v6911_v6  ;;  %2952 = vmatpush1.bf16.msra.mxu1 %v7039_v7  ;;  %v1059_v6 = vld [vmem:[#allocation12 + $0x238] sm:$0xff]  ;;  %v7915_v40 = vld [vmem:[#allocation15 + $0x3c] ss:$28 sps:$4 sm:$0xff]  }
 0x395   :  { %2900 = vmatprep.subr.bf16.mxu0 %v7032_v8  ;;  %2953 = vmatprep.subr.bf16.mxu1 %v7160_v2  ;;  %v1183_v7 = vld [vmem:[#allocation12 + $0x618] sm:$0xff]  ;;  %v6983_v2 = vcombine.low %v1063_v63, %v1067_v0  ;;  %v6976_v9 = vcombine.high %v1055_v5, %v1059_v6  ;;  %v6975_v29 = vcombine.low %v1055_v5, %v1059_v6  ;;  %v7942_v44 = vld [vmem:[#allocation15 + $0x3bc] ss:$28 sps:$4 sm:$0xff]  }
 0x396   :  { %v1187_v8 = vld [vmem:[#allocation12 + $0x638] sm:$0xff]  ;;  %v7919_v5 = vld [vmem:[#allocation15] ss:$28 sps:$4 sm:$0xff]  }
 0x397   :  { %v7104_v10 = vcombine.high %v1183_v7, %v1187_v8  ;;  %v7907_v63 = vld [vmem:[#allocation15 + $0x70] ss:$28 sps:$4 sm:$0xff]   ;;  %v7946_v6 = vld [vmem:[#allocation15 + $0x380] ss:$28 sps:$4 sm:$0xff]  }
 0x398   :  { %2901 = vmatpush2.bf16.msra.mxu0 %v7031_v30  ;;  %2954 = vmatpush2.bf16.msra.mxu1 %v7159_v34  ;;  %v7103_v30 = vcombine.low %v1183_v7, %v1187_v8  ;;  %v7891_v34 = vld [vmem:[#allocation15 + $0x18c] ss:$28 sps:$4 sm:$0xff]  }
 0x399   :  { %2902 = vmatprep.subr.bf16.mxu0 %v7024_v12  ;;  %2955 = vmatprep.subr.bf16.mxu1 %v7152_v31  ;;  %v7906_v12 = vld [vmem:[#allocation15 + $0x50c] ss:$28 sps:$4 sm:$0xff]   ;;  %v9035_v31 = vld [vmem:[#allocation13] sm:$0xff] }
 0x39a   :  { %v9039_v33 = vrot.slane %v9035_v31, %v8926_v54  ;;  %v7934_v0 = vld [vmem:[#allocation15 + $0x3f0] ss:$28 sps:$4 sm:$0xff]  }
 0x39b   :  { %v7927_v7 = vld [vmem:[#allocation15 + $0x34c] ss:$28 sps:$4 sm:$0xff]  }
 0x39c   :  { %2903 = vmatpush2.bf16.msra.mxu0 %v7023_v18  ;;  %2956 = vmatpush2.bf16.msra.mxu1 %v7151_v19  ;;  %v7904_v18 = vld [vmem:[#allocation15 + $0x508] ss:$28 sps:$4 sm:$0xff]   ;;  %v7894_v19 = vld [vmem:[#allocation15 + $0x154] ss:$28 sps:$4 sm:$0xff]  }
 0x39d   :  { %2904 = vmatprep.subr.bf16.mxu0 %v7016_v20  ;;  %2957 = vmatprep.subr.bf16.mxu1 %v7144_v21  ;;  %v7912_v20 = vld [vmem:[#allocation15 + $0x4d4] ss:$28 sps:$4 sm:$0xff]   ;;  %v7954_v8 = vld [vmem:[#allocation15 + $0x6cc] ss:$28 sps:$4 sm:$0xff]  }
 0x3a0   :  { %2905 = vmatpush2.bf16.msra.mxu0 %v7015_v26  ;;  %2958 = vmatpush2.bf16.msra.mxu1 %v7143_v27  ;;  %v7910_v27 = vld [vmem:[#allocation15 + $0x4d0] ss:$28 sps:$4 sm:$0xff]  }
 0x3a1   :  { %2906 = vmatprep.subr.bf16.mxu0 %v7008_v28  ;;  %2959 = vmatprep.subr.bf16.mxu1 %v7136_v32 }
 0x3a4   :  { %2907 = vmatpush2.bf16.msra.mxu0 %v7007_v37  ;;  %2960 = vmatpush2.bf16.msra.mxu1 %v7135_v47  ;;  %v7900_v37 = vld [vmem:[#allocation15 + $0xe4] ss:$28 sps:$4 sm:$0xff]  }
 0x3a5   :  { %2908 = vmatprep.subr.bf16.mxu0 %v7000_v50  ;;  %2961 = vmatprep.subr.bf16.mxu1 %v7128_v51  ;;  %v7924_v47 = vld [vmem:[#allocation15 + $0x464] ss:$28 sps:$4 sm:$0xff]  }
 0x3a6   :  { %v7898_v51 = vld [vmem:[#allocation15 + $0xe0] ss:$28 sps:$4 sm:$0xff]  }
 0x3a8   :  { %2909 = vmatpush2.bf16.msra.mxu0 %v6999_v59  ;;  %2962 = vmatpush2.bf16.msra.mxu1 %v7127_v60  ;;  %v7930_v59 = vld [vmem:[#allocation15 + $0x42c] ss:$28 sps:$4 sm:$0xff]  }
 0x3a9   :  { %2910 = vmatprep.subr.bf16.mxu0 %v6992_v61  ;;  %2963 = vmatprep.subr.bf16.mxu1 %v7120_v62  ;;  %v7901_v61 = vld [vmem:[#allocation15 + $0xa8] ss:$28 sps:$4 sm:$0xff]  }
 0x3aa   :  { %v7928_v62 = vld [vmem:[#allocation15 + $0x428] ss:$28 sps:$4 sm:$0xff]  }
 0x3ac   :  { %2911 = vmatpush2.bf16.msra.mxu0 %v6991_v1  ;;  %2964 = vmatpush2.bf16.msra.mxu1 %v7119_v41  ;;  %v7913_v1 = vld [vmem:[#allocation15 + $0x38] ss:$28 sps:$4 sm:$0xff]  }
 0x3ad   :  { %2912 = vmatprep.subr.bf16.mxu0 %v6984_v42  ;;  %2965 = vmatprep.subr.bf16.mxu1 %v7112_v4  ;;  %v7940_v41 = vld [vmem:[#allocation15 + $0x3b8] ss:$28 sps:$4 sm:$0xff]   ;;  %v7921_v42 = vld [vmem:[#allocation15 + $0x4] ss:$28 sps:$4 sm:$0xff]  }
 0x3ae   :  { %v7948_v4 = vld [vmem:[#allocation15 + $0x384] ss:$28 sps:$4 sm:$0xff]  }
 0x3b0   :  { %2913 = vmatpush2.bf16.msra.mxu0 %v6983_v2  ;;  %2966 = vmatpush2.bf16.msra.mxu1 %v7111_v3  ;;  %v7925_v2 = vld [vmem:[#allocation15 + $0x348] ss:$28 sps:$4 sm:$0xff]  }
 0x3b1   :  { %2914 = vmatprep.subr.bf16.mxu0 %v6976_v9  ;;  %2967 = vmatprep.subr.bf16.mxu1 %v7104_v10  ;;  %v7952_v3 = vld [vmem:[#allocation15 + $0x6c8] ss:$28 sps:$4 sm:$0xff]   ;;  %v7933_v9 = vld [vmem:[#allocation15 + $0x314] ss:$28 sps:$4 sm:$0xff]  }
 0x3b2   :  { %v7960_v10 = vld [vmem:[#allocation15 + $0x694] ss:$28 sps:$4 sm:$0xff]  }
 0x3b4   :  { %2915 = vmatpush2.bf16.msra.mxu0 %v6975_v29  ;;  %2968 = vmatpush2.bf16.msra.mxu1 %v7103_v30  ;;  %v7931_v30 = vld [vmem:[#allocation15 + $0x310] ss:$28 sps:$4 sm:$0xff]  }
 0x3b5   :  { %5923 = vmatprep.subr.bf16.mxu0 %v7891_v34  ;;  %v9041_v17 = vpop.f32.mrf.mxu0  ;;  %v9043_v11 = vpop.f32.mrf.mxu1  ;;  %5976 = vmatprep.subr.bf16.mxu1 %v7906_v12  ;;  %v7958_v34 = vld [vmem:[#allocation15 + $0x690] ss:$28 sps:$4 sm:$0xff]   ;;  %v7939_v12 = vld [vmem:[#allocation15 + $0x2dc] ss:$28 sps:$4 sm:$0xff]  }
 0x3b7   :  { %2917 = vmatmul.mubr.bf16.vlgmr.msra.gmra.mxu0 %v8985_v46  ;;  %2970 = vmatmul.mubr.bf16.vlgmr.msra.gmra.mxu1 %v8987_v48  ;;  %v2602_v21 = vpop.f32.mrf.mxu0  ;;  %v2655_v22 = vpop.f32.mrf.mxu1  ;;  %v7897_v46 = vld [vmem:[#allocation15 + $0x11c] ss:$28 sps:$4 sm:$0xff]  }
 0x3b8   :  { %2926 = vmatprep.mubr.bf16.mxu0 %v9005_v35  ;;  %2979 = vmatprep.mubr.bf16.mxu1 %v9007_v13  ;;  %v2603_v23 = vadd.f32 %v2602_v21, %v9039_v33  ;;  %v7918_v48 = vld [vmem:[#allocation15 + $0x49c] ss:$28 sps:$4 sm:$0xff]  }
 0x3b9   :  { %5924 = vmatpush1.bf16.msra.mxu0 %v7889_v14  ;;  %v9050_v25 = vpop.f32.mrf.mxu0  ;;  %v9052_v26 = vpop.f32.mrf.mxu1  ;;  %5977 = vmatpush1.bf16.msra.mxu1 %v7904_v18  ;;  %v7966_v14 = vld [vmem:[#allocation15 + $0x65c] ss:$28 sps:$4 sm:$0xff]  }
 0x3ba   :  { %v2656_v28 = vadd.f32 %v2655_v22, %v2603_v23  ;;  %5925 = vmatprep.subr.bf16.mxu0 %v7894_v19  ;;  %5978 = vmatprep.subr.bf16.mxu1 %v7912_v20  ;;  %v7937_v19 = vld [vmem:[#allocation15 + $0x2d8] ss:$28 sps:$4 sm:$0xff]   ;;  %v7945_v22 = vld [vmem:[#allocation15 + $0x2a4] ss:$28 sps:$4 sm:$0xff]  }
 0x3bb   :  { %v2606_v32 = vpop.f32.mrf.mxu0  ;;  %v2659_v13 = vpop.f32.mrf.mxu1  ;;  %v7964_v20 = vld [vmem:[#allocation15 + $0x658] ss:$28 sps:$4 sm:$0xff]   ;;  %v7972_v23 = vld [vmem:[#allocation15 + $0x624] ss:$28 sps:$4 sm:$0xff]  }
 0x3bc   :  { %v2607_v35 = vadd.f32 %v2606_v32, %v9039_v33  ;;  %v2991_v49 = vmul.f32 0.2, %v2656_v28  ;;  %v7975_v32 = vld [vmem:[#allocation15 + $0x5ec] ss:$28 sps:$4 sm:$0xff]  }
 0x3bd   :  { %5926 = vmatpush1.bf16.msra.mxu0 %v7892_v24  ;;  %5979 = vmatpush1.bf16.msra.mxu1 %v7910_v27  ;;  %v9060_v29 = vpop.f32.mrf.mxu0  ;;  %v9062_v21 = vpop.f32.mrf.mxu1  ;;  %v7943_v27 = vld [vmem:[#allocation15 + $0x2a0] ss:$28 sps:$4 sm:$0xff]  }
 0x3be   :  { %v2660_v36 = vadd.f32 %v2659_v13, %v2607_v35  ;;  %5927 = vmatprep.subr.bf16.mxu0 %v7897_v46  ;;  %5980 = vmatprep.subr.bf16.mxu1 %v7918_v48  ;;  %v3023_v56 = vmax.f32 %v2656_v28, %v2991_v49  ;;  %v7970_v28 = vld [vmem:[#allocation15 + $0x620] ss:$28 sps:$4 sm:$0xff]   ;;  %v7951_v48 = vld [vmem:[#allocation15 + $0x26c] ss:$28 sps:$4 sm:$0xff]   ;;  %v1249_v35 = vrot.slane %v9035_v31, %v8929_v55 }
 0x3bf   :  { %2927 = vmatmul.mubr.bf16.gmra.mxu0 %v9009_v15  ;;  %2980 = vmatmul.mubr.bf16.gmra.mxu1 %v9011_v16  ;;  %v7909_v15 = vld [vmem:[#allocation15 + $0x74] ss:$28 sps:$4 sm:$0xff]   ;;  %v2612_v18 = vpop.f32.mrf.mxu0  ;;  %v2665_v46 = vpop.f32.mrf.mxu1 }
 0x3c0   :  { %v2999_v50 = vmul.f32 0.2, %v2660_v36  ;;  %v7936_v16 = vld [vmem:[#allocation15 + $0x3f4] ss:$28 sps:$4 sm:$0xff]   ;;  %v2605_v49 = vadd.f32 %v9050_v25, %v1249_v35  ;;  %v7963_v25 = vld [vmem:[#allocation15 + $0x1fc] ss:$28 sps:$4 sm:$0xff]  }
 0x3c1   :  { %5928 = vmatpush1.bf16.msra.mxu0 %v7895_v43  ;;  %5981 = vmatpush1.bf16.msra.mxu1 %v7916_v45  ;;  %v2614_v24 = vpop.f32.mrf.mxu0  ;;  %v7949_v43 = vld [vmem:[#allocation15 + $0x268] ss:$28 sps:$4 sm:$0xff]  }
 0x3c2   :  { %v3031_v57 = vmax.f32 %v2660_v36, %v2999_v50  ;;  %5929 = vmatprep.subr.bf16.mxu0 %v7900_v37  ;;  %5982 = vmatprep.subr.bf16.mxu1 %v7924_v47  ;;  %v7973_v45 = vld [vmem:[#allocation15 + $0x5e8] ss:$28 sps:$4 sm:$0xff]   ;;  %v2667_v36 = vpop.f32.mrf.mxu1  ;;  %v7957_v37 = vld [vmem:[#allocation15 + $0x234] ss:$28 sps:$4 sm:$0xff]  }
 0x3c3   :  { %v2616_v13 = vpop.f32.mrf.mxu0  ;;  %v7978_v47 = vld [vmem:[#allocation15 + $0x5b4] ss:$28 sps:$4 sm:$0xff]  }
 0x3c4   :  { %v9057_v60 = vpack.c.bf16 %v3031_v57, %v3023_v56  ;;  %v2617_v50 = vadd.f32 %v2616_v13, %v9039_v33  ;;  %v7955_v56 = vld [vmem:[#allocation15 + $0x230] ss:$28 sps:$4 sm:$0xff]  }
 0x3c5   :  { %5930 = vmatpush1.bf16.msra.mxu0 %v7898_v51  ;;  %5983 = vmatpush1.bf16.msra.mxu1 %v7922_v52  ;;  %v2601_v51 = vadd.f32 %v9041_v17, %v1249_v35  ;;  %v2613_v52 = vadd.f32 %v2612_v18, %v9039_v33  ;;  %v7976_v57 = vld [vmem:[#allocation15 + $0x5b0] ss:$28 sps:$4 sm:$0xff]   ;;  %v7979_v17 = vld [vmem:[#allocation15 + $0x578] ss:$28 sps:$4 sm:$0xff]  }
 0x3c6   :  { %5931 = vmatprep.subr.bf16.mxu0 %v7903_v58  ;;  %5955 = vmatprep.mubr.bf16.mxu0 %v9057_v60  ;;  %v2658_v58 = vadd.f32 %v9052_v26, %v2605_v49 }
 0x3c7   :  { %5984 = vmatprep.subr.bf16.mxu1 %v7930_v59  ;;  %v2669_v59 = vpop.f32.mrf.mxu1 }
 0x3c8   :  { %v2998_v33 = vmul.f32 0.2, %v2658_v58 }
 0x3c9   :  { %5932 = vmatpush1.bf16.msra.mxu0 %v7901_v61  ;;  %5985 = vmatpush1.bf16.msra.mxu1 %v7928_v62  ;;  %v7981_v61 = vld [vmem:[#allocation15 + $0x57c] ss:$28 sps:$4 sm:$0xff]   ;;  %v2670_v62 = vadd.f32 %v2669_v59, %v2617_v50 }
 0x3ca   :  { %5933 = vmatprep.subr.bf16.mxu0 %v7909_v15  ;;  %5986 = vmatprep.subr.bf16.mxu1 %v7936_v16  ;;  %v2654_v15 = vadd.f32 %v9043_v11, %v2601_v51  ;;  %v2666_v16 = vadd.f32 %v2665_v46, %v2613_v52  ;;  %v7982_v11 = vld [vmem:[#allocation15 + $0x540] ss:$28 sps:$4 sm:$0xff]  }
 0x3cb   :  { %v3015_v26 = vmul.f32 0.2, %v2670_v62 }
 0x3cd   :  { %5934 = vmatpush1.bf16.msra.mxu0 %v7907_v63  ;;  %5987 = vmatpush1.bf16.msra.mxu1 %v7934_v0  ;;  %v7961_v63 = vld [vmem:[#allocation15 + $0x1f8] ss:$28 sps:$4 sm:$0xff]   ;;  %v2615_v0 = vadd.f32 %v2614_v24, %v1249_v35 }
 0x3ce   :  { %5935 = vmatprep.subr.bf16.mxu0 %v7915_v40  ;;  %5988 = vmatprep.subr.bf16.mxu1 %v7942_v44  ;;  %v7969_v40 = vld [vmem:[#allocation15 + $0x1c4] ss:$28 sps:$4 sm:$0xff]  }
 0x3cf   :  { %v7984_v44 = vld [vmem:[#allocation15 + $0x544] ss:$28 sps:$4 sm:$0xff]  }
 0x3d1   :  { %5936 = vmatpush1.bf16.msra.mxu0 %v7913_v1  ;;  %5989 = vmatpush1.bf16.msra.mxu1 %v7940_v41  ;;  %v2990_v1 = vmul.f32 0.2, %v2654_v15  ;;  %v2611_v41 = vadd.f32 %v9060_v29, %v1249_v35  ;;  %v9080_v29 = vrot.slane %v9035_v31, %v8950_v38 }
 0x3d2   :  { %5937 = vmatprep.subr.bf16.mxu0 %v7921_v42  ;;  %5990 = vmatprep.subr.bf16.mxu1 %v7948_v4  ;;  %v3007_v42 = vmul.f32 0.2, %v2666_v16  ;;  %v7967_v4 = vld [vmem:[#allocation15 + $0x1c0] ss:$28 sps:$4 sm:$0xff]  }
 0x3d5   :  { %5938 = vmatpush1.bf16.msra.mxu0 %v7919_v5  ;;  %5991 = vmatpush1.bf16.msra.mxu1 %v7946_v6  ;;  %v3030_v5 = vmax.f32 %v2658_v58, %v2998_v33  ;;  %v2668_v6 = vadd.f32 %v2667_v36, %v2615_v0 }
 0x3d6   :  { %5939 = vmatprep.subr.bf16.mxu0 %v7927_v7  ;;  %5992 = vmatprep.subr.bf16.mxu1 %v7954_v8  ;;  %v7987_v7 = vld [vmem:[#allocation15 + $0x88c] ss:$28 sps:$4 sm:$0xff]  }
 0x3d7   :  { %v8035_v8 = vld [vmem:[#allocation15 + $0xc0c] ss:$28 sps:$4 sm:$0xff]  }
 0x3d9   :  { %5940 = vmatpush2.bf16.msra.mxu0 %v7925_v2  ;;  %5993 = vmatpush2.bf16.msra.mxu1 %v7952_v3  ;;  %v3047_v2 = vmax.f32 %v2670_v62, %v3015_v26  ;;  %v9075_v3 = vrot.slane %v9035_v31, %v8953_v39  ;;  %v7996_v62 = vld [vmem:[#allocation15 + $0x7e4] ss:$28 sps:$4 sm:$0xff]  }
 0x3da   :  { %5941 = vmatprep.subr.bf16.mxu0 %v7933_v9  ;;  %5994 = vmatprep.subr.bf16.mxu1 %v7960_v10  ;;  %v3022_v9 = vmax.f32 %v2654_v15, %v2990_v1  ;;  %v2664_v10 = vadd.f32 %v9062_v21, %v2611_v41  ;;  %v7994_v1 = vld [vmem:[#allocation15 + $0x7e0] ss:$28 sps:$4 sm:$0xff]  }
 0x3dc   :  { %v9082_v18 = vpack.c.bf16 %v3030_v5, %v3022_v9 }
 0x3dd   :  { %5942 = vmatpush2.bf16.msra.mxu0 %v7931_v30  ;;  %5995 = vmatpush2.bf16.msra.mxu1 %v7958_v34  ;;  %v3039_v30 = vmax.f32 %v2666_v16, %v3007_v42 }
 0x3de   :  { %5943 = vmatprep.subr.bf16.mxu0 %v7939_v12  ;;  %5996 = vmatprep.subr.bf16.mxu1 %v7966_v14  ;;  %v7985_v14 = vld [vmem:[#allocation15 + $0x888] ss:$28 sps:$4 sm:$0xff]  }
 0x3e1   :  { %5944 = vmatpush2.bf16.msra.mxu0 %v7937_v19  ;;  %5997 = vmatpush2.bf16.msra.mxu1 %v7964_v20  ;;  %v3014_v19 = vmul.f32 0.2, %v2668_v6  ;;  %v7990_v20 = vld [vmem:[#allocation15 + $0x854] ss:$28 sps:$4 sm:$0xff]  }
 0x3e2   :  { %5945 = vmatprep.subr.bf16.mxu0 %v7945_v22  ;;  %5998 = vmatprep.subr.bf16.mxu1 %v7972_v23  ;;  %v9084_v22 = vpack.c.bf16 %v3047_v2, %v3039_v30 }
 0x3e3   :  { %v3046_v35 = vmax.f32 %v2668_v6, %v3014_v19  ;;  %v8041_v19 = vld [vmem:[#allocation15 + $0xbd4] ss:$28 sps:$4 sm:$0xff]  }
 0x3e5   :  { %5946 = vmatpush2.bf16.msra.mxu0 %v7943_v27  ;;  %5999 = vmatpush2.bf16.msra.mxu1 %v7970_v28  ;;  %v3006_v27 = vmul.f32 0.2, %v2664_v10 }
 0x3e6   :  { %5947 = vmatprep.subr.bf16.mxu0 %v7951_v48  ;;  %6000 = vmatprep.subr.bf16.mxu1 %v7975_v32  ;;  %v7988_v32 = vld [vmem:[#allocation15 + $0x850] ss:$28 sps:$4 sm:$0xff]  }
 0x3e9   :  { %5948 = vmatpush2.bf16.msra.mxu0 %v7949_v43  ;;  %6001 = vmatpush2.bf16.msra.mxu1 %v7973_v45  ;;  %v7993_v45 = vld [vmem:[#allocation15 + $0x81c] ss:$28 sps:$4 sm:$0xff]  }
 0x3ea   :  { %5949 = vmatprep.subr.bf16.mxu0 %v7957_v37  ;;  %6002 = vmatprep.subr.bf16.mxu1 %v7978_v47  ;;  %v3038_v47 = vmax.f32 %v2664_v10, %v3006_v27  ;;  %v8033_v10 = vld [vmem:[#allocation15 + $0xc08] ss:$28 sps:$4 sm:$0xff]  }
 0x3ec   :  { %v9092_v58 = vpack.c.bf16 %v3046_v35, %v3038_v47  ;;  %v8053_v47 = vld [vmem:[#allocation15 + $0xb64] ss:$28 sps:$4 sm:$0xff]  }
 0x3ed   :  { %5950 = vmatpush2.bf16.msra.mxu0 %v7955_v56  ;;  %6003 = vmatpush2.bf16.msra.mxu1 %v7976_v57  ;;  %v7991_v57 = vld [vmem:[#allocation15 + $0x818] ss:$28 sps:$4 sm:$0xff]  }
 0x3ee   :  { %5951 = vmatprep.subr.bf16.mxu0 %v7963_v25  ;;  %6004 = vmatprep.subr.bf16.mxu1 %v7981_v61 }
 0x3f1   :  { %5952 = vmatpush2.bf16.msra.mxu0 %v7961_v63  ;;  %6005 = vmatpush2.bf16.msra.mxu1 %v7979_v17 }
 0x3f2   :  { %5953 = vmatprep.subr.bf16.mxu0 %v7969_v40  ;;  %6006 = vmatprep.subr.bf16.mxu1 %v7984_v44 }
 0x3f5   :  { %5954 = vmatpush2.bf16.msra.mxu0 %v7967_v4  ;;  %v2706_v34 = vpop.f32.mrf.mxu0  ;;  %v2759_v12 = vpop.f32.mrf.mxu1  ;;  %6007 = vmatpush2.bf16.msra.mxu1 %v7982_v11  ;;  %v7999_v11 = vld [vmem:[#allocation15 + $0x7ac] ss:$28 sps:$4 sm:$0xff]  }
 0x3f6   :  { %6029 = vmatprep.subr.bf16.mxu0 %v7987_v7  ;;  %6082 = vmatprep.subr.bf16.mxu1 %v8035_v8  ;;  %v2707_v21 = vadd.f32 %v2706_v34, %v9075_v3 }
 0x3f7   :  { %v2708_v23 = vpop.f32.mrf.mxu0  ;;  %v2761_v24 = vpop.f32.mrf.mxu1 }
 0x3f8   :  { %5956 = vmatmul.mubr.bf16.vlgmr.msra.gmra.mxu0 %v9082_v18  ;;  %v2709_v28 = vadd.f32 %v2708_v23, %v9080_v29  ;;  %v2760_v49 = vadd.f32 %v2759_v12, %v2707_v21  ;;  %v8002_v23 = vld [vmem:[#allocation15 + $0x774] ss:$28 sps:$4 sm:$0xff]  }
 0x3f9   :  { %5965 = vmatprep.mubr.bf16.mxu0 %v9084_v22  ;;  %v2710_v46 = vpop.f32.mrf.mxu0  ;;  %v2763_v48 = vpop.f32.mrf.mxu1  ;;  %6030 = vmatpush1.bf16.msra.mxu0 %v7985_v14  ;;  %v7997_v14 = vld [vmem:[#allocation15 + $0x7a8] ss:$28 sps:$4 sm:$0xff]  }
 0x3fa   :  { %v2762_v13 = vadd.f32 %v2761_v24, %v2709_v28  ;;  %v2711_v43 = vadd.f32 %v2710_v46, %v9075_v3  ;;  %6031 = vmatprep.subr.bf16.mxu0 %v7990_v20  ;;  %v2992_v15 = vmul.f32 0.2, %v2760_v49  ;;  %v8000_v46 = vld [vmem:[#allocation15 + $0x770] ss:$28 sps:$4 sm:$0xff]  }
 0x3fb   :  { %v2712_v36 = vpop.f32.mrf.mxu0  ;;  %v2765_v37 = vpop.f32.mrf.mxu1 }
 0x3fc   :  { %v2764_v50 = vadd.f32 %v2763_v48, %v2711_v43  ;;  %v2713_v51 = vadd.f32 %v2712_v36, %v9080_v29  ;;  %v2993_v59 = vmul.f32 0.2, %v2762_v13  ;;  %v3024_v5 = vmax.f32 %v2760_v49, %v2992_v15  ;;  %v8047_v48 = vld [vmem:[#allocation15 + $0xb9c] ss:$28 sps:$4 sm:$0xff]   ;;  %v8063_v15 = vld [vmem:[#allocation15 + $0xaf0] ss:$28 sps:$4 sm:$0xff]  }
 0x3fd   :  { %v2716_v52 = vpop.f32.mrf.mxu0  ;;  %v2769_v56 = vpop.f32.mrf.mxu1  ;;  %6032 = vmatpush1.bf16.msra.mxu0 %v7988_v32  ;;  %v8045_v49 = vld [vmem:[#allocation15 + $0xb98] ss:$28 sps:$4 sm:$0xff]  }
 0x3fe   :  { %v3000_v25 = vmul.f32 0.2, %v2764_v50  ;;  %v2766_v61 = vadd.f32 %v2765_v37, %v2713_v51  ;;  %6033 = vmatprep.subr.bf16.mxu0 %v7993_v45  ;;  %v2717_v16 = vadd.f32 %v2716_v52, %v9075_v3  ;;  %v3025_v41 = vmax.f32 %v2762_v13, %v2993_v59  ;;  %v8005_v13 = vld [vmem:[#allocation15 + $0x73c] ss:$28 sps:$4 sm:$0xff]   ;;  %v8057_v59 = vld [vmem:[#allocation15 + $0xb28] ss:$28 sps:$4 sm:$0xff]  }
 0x3ff   :  { %v2718_v63 = vpop.f32.mrf.mxu0  ;;  %v2771_v17 = vpop.f32.mrf.mxu1  ;;  %v8003_v37 = vld [vmem:[#allocation15 + $0x738] ss:$28 sps:$4 sm:$0xff]   ;;  %v8051_v51 = vld [vmem:[#allocation15 + $0xb60] ss:$28 sps:$4 sm:$0xff]  }
 0x400   :  { %v3001_v33 = vmul.f32 0.2, %v2766_v61  ;;  %5966 = vmatmul.mubr.bf16.gmra.mxu0 %v9092_v58  ;;  %v2719_v0 = vadd.f32 %v2718_v63, %v9080_v29  ;;  %v3032_v40 = vmax.f32 %v2764_v50, %v3000_v25  ;;  %v2770_v6 = vadd.f32 %v2769_v56, %v2717_v16  ;;  %v8008_v50 = vld [vmem:[#allocation15 + $0x704] ss:$28 sps:$4 sm:$0xff]   ;;  %v8059_v56 = vld [vmem:[#allocation15 + $0xb2c] ss:$28 sps:$4 sm:$0xff]  }
 0x401   :  { %v2720_v44 = vpop.f32.mrf.mxu0  ;;  %v2773_v26 = vpop.f32.mrf.mxu1  ;;  %6034 = vmatpush1.bf16.msra.mxu0 %v7991_v57  ;;  %v8006_v52 = vld [vmem:[#allocation15 + $0x700] ss:$28 sps:$4 sm:$0xff]   ;;  %v8011_v57 = vld [vmem:[#allocation15 + $0xa4c] ss:$28 sps:$4 sm:$0xff]  }
 0x402   :  { %v3033_v42 = vmax.f32 %v2766_v61, %v3001_v33  ;;  %v2772_v4 = vadd.f32 %v2771_v17, %v2719_v0  ;;  %6035 = vmatprep.subr.bf16.mxu0 %v7996_v62  ;;  %v2721_v7 = vadd.f32 %v2720_v44, %v9075_v3  ;;  %v9101_v30 = vpack.c.bf16 %v3032_v40, %v3024_v5  ;;  %v8009_v25 = vld [vmem:[#allocation15 + $0xa48] ss:$28 sps:$4 sm:$0xff]   ;;  %v8065_v61 = vld [vmem:[#allocation15 + $0xaf4] ss:$28 sps:$4 sm:$0xff]   ;;  %v8071_v63 = vld [vmem:[#allocation15 + $0xabc] ss:$28 sps:$4 sm:$0xff]  }
 0x403   :  { %v2722_v8 = vpop.f32.mrf.mxu0  ;;  %v2775_v12 = vpop.f32.mrf.mxu1  ;;  %v3008_v3 = vmul.f32 0.2, %v2770_v6  ;;  %v8014_v62 = vld [vmem:[#allocation15 + $0xa14] ss:$28 sps:$4 sm:$0xff]   ;;  %v8017_v17 = vld [vmem:[#allocation15 + $0x9dc] ss:$28 sps:$4 sm:$0xff]  }
 0x404   :  { %v9098_v2 = vpack.c.bf16 %v3033_v42, %v3025_v41  ;;  %v2723_v9 = vadd.f32 %v2722_v8, %v9080_v29  ;;  %v2774_v34 = vadd.f32 %v2773_v26, %v2721_v7  ;;  %v3009_v20 = vmul.f32 0.2, %v2772_v4  ;;  %v8039_v29 = vld [vmem:[#allocation15 + $0xbd0] ss:$28 sps:$4 sm:$0xff]   ;;  %v8069_v33 = vld [vmem:[#allocation15 + $0xab8] ss:$28 sps:$4 sm:$0xff]  }
 0x405   :  { %6036 = vmatpush1.bf16.msra.mxu0 %v7994_v1  ;;  %v3040_v43 = vmax.f32 %v2770_v6, %v3008_v3  ;;  %v8012_v16 = vld [vmem:[#allocation15 + $0xa10] ss:$28 sps:$4 sm:$0xff]   ;;  %v8015_v0 = vld [vmem:[#allocation15 + $0x9d8] ss:$28 sps:$4 sm:$0xff]   ;;  %v8077_v40 = vld [vmem:[#allocation15 + $0xa84] ss:$28 sps:$4 sm:$0xff]  }
 0x406   :  { %v2776_v21 = vadd.f32 %v2775_v12, %v2723_v9  ;;  %6008 = vmatprep.mubr.bf16.mxu1 %v9098_v2  ;;  %6037 = vmatprep.subr.bf16.mxu0 %v7999_v11  ;;  %v3016_v24 = vmul.f32 0.2, %v2774_v34  ;;  %v3041_v32 = vmax.f32 %v2772_v4, %v3009_v20  ;;  %v8020_v44 = vld [vmem:[#allocation15 + $0x9a4] ss:$28 sps:$4 sm:$0xff]   ;;  %v8083_v41 = vld [vmem:[#allocation15 + $0xdcc] ss:$28 sps:$4 sm:$0xff]  }
 0x407   :  { %6009 = vmatmul.mubr.bf16.vlgmr.msra.gmra.mxu1 %v9101_v30  ;;  %v8075_v26 = vld [vmem:[#allocation15 + $0xa80] ss:$28 sps:$4 sm:$0xff]   ;;  %v8023_v42 = vld [vmem:[#allocation15 + $0x96c] ss:$28 sps:$4 sm:$0xff]   ;;  %v8089_v5 = vld [vmem:[#allocation15 + $0xd94] ss:$28 sps:$4 sm:$0xff]  }
 0x408   :  { %v3017_v27 = vmul.f32 0.2, %v2776_v21  ;;  %6083 = vmatpush1.bf16.msra.mxu1 %v8033_v10  ;;  %v3048_v28 = vmax.f32 %v2774_v34, %v3016_v24  ;;  %v8018_v1 = vld [vmem:[#allocation15 + $0x9a0] ss:$28 sps:$4 sm:$0xff]   ;;  %v8081_v4 = vld [vmem:[#allocation15 + $0xdc8] ss:$28 sps:$4 sm:$0xff]  }
 0x409   :  { %6038 = vmatpush1.bf16.msra.mxu0 %v7997_v14  ;;  %6084 = vmatprep.subr.bf16.mxu1 %v8041_v19  ;;  %v8021_v11 = vld [vmem:[#allocation15 + $0x968] ss:$28 sps:$4 sm:$0xff]   ;;  %v8026_v6 = vld [vmem:[#allocation15 + $0x934] ss:$28 sps:$4 sm:$0xff]   ;;  %v8095_v9 = vld [vmem:[#allocation15 + $0xd5c] ss:$28 sps:$4 sm:$0xff]  }
 0x40a   :  { %v3049_v35 = vmax.f32 %v2776_v21, %v3017_v27  ;;  %6039 = vmatprep.subr.bf16.mxu0 %v8002_v23  ;;  %v9107_v36 = vpack.c.bf16 %v3048_v28, %v3040_v43  ;;  %v8087_v7 = vld [vmem:[#allocation15 + $0xd90] ss:$28 sps:$4 sm:$0xff]   ;;  %v8029_v10 = vld [vmem:[#allocation15 + $0x8fc] ss:$28 sps:$4 sm:$0xff]   ;;  %v8101_v14 = vld [vmem:[#allocation15 + $0xd24] ss:$28 sps:$4 sm:$0xff]  }
 0x40b   :  { %v8024_v8 = vld [vmem:[#allocation15 + $0x930] ss:$28 sps:$4 sm:$0xff]   ;;  %v8093_v34 = vld [vmem:[#allocation15 + $0xd58] ss:$28 sps:$4 sm:$0xff]   ;;  %v8032_v19 = vld [vmem:[#allocation15 + $0x8c4] ss:$28 sps:$4 sm:$0xff]  }
 0x40c   :  { %v9105_v45 = vpack.c.bf16 %v3049_v35, %v3041_v32  ;;  %6085 = vmatpush1.bf16.msra.mxu1 %v8039_v29  ;;  %v8027_v12 = vld [vmem:[#allocation15 + $0x8f8] ss:$28 sps:$4 sm:$0xff]   ;;  %v1264_v20 = vsub.s32 4, %v8923_v53  ;;  %v8099_v21 = vld [vmem:[#allocation15 + $0xd20] ss:$28 sps:$4 sm:$0xff]   ;;  %v1268_v23 = vsub.s32 5, %v8923_v53 }
 0x40d   :  { %6040 = vmatpush1.bf16.msra.mxu0 %v8000_v46  ;;  %6086 = vmatprep.subr.bf16.mxu1 %v8047_v48  ;;  %v8030_v3 = vld [vmem:[#allocation15 + $0x8c0] ss:$28 sps:$4 sm:$0xff]   ;;  %v8107_v24 = vld [vmem:[#allocation15 + $0xcec] ss:$28 sps:$4 sm:$0xff]   ;;  %v8038_v27 = vld [vmem:[#allocation15 + $0x194] ss:$28 sps:$4 sm:$0xff]  }
 0x40e   :  { %6018 = vmatprep.mubr.bf16.mxu1 %v9105_v45  ;;  %6041 = vmatprep.subr.bf16.mxu0 %v8005_v13  ;;  %v1265_v29 = vrot.slane %v9035_v31, %v1264_v20  ;;  %v8105_v28 = vld [vmem:[#allocation15 + $0xce8] ss:$28 sps:$4 sm:$0xff]   ;;  %v1269_v46 = vrot.slane %v9035_v31, %v1268_v23  ;;  %v8113_v48 = vld [vmem:[#allocation15 + $0xcb4] ss:$28 sps:$4 sm:$0xff]  }
 0x40f   :  { %6019 = vmatmul.mubr.bf16.gmra.mxu1 %v9107_v36 }
 0x410   :  { %6087 = vmatpush1.bf16.msra.mxu1 %v8045_v49 }
 0x411   :  { %6042 = vmatpush1.bf16.msra.mxu0 %v8003_v37  ;;  %6088 = vmatprep.subr.bf16.mxu1 %v8053_v47  ;;  %v8111_v37 = vld [vmem:[#allocation15 + $0xcb0] ss:$28 sps:$4 sm:$0xff]  }
 0x412   :  { %6043 = vmatprep.subr.bf16.mxu0 %v8008_v50  ;;  %v8119_v50 = vld [vmem:[#allocation15 + $0xc7c] ss:$28 sps:$4 sm:$0xff]  }
 0x414   :  { %6089 = vmatpush1.bf16.msra.mxu1 %v8051_v51 }
 0x415   :  { %6044 = vmatpush1.bf16.msra.mxu0 %v8006_v52  ;;  %6090 = vmatprep.subr.bf16.mxu1 %v8059_v56 }
 0x416   :  { %6045 = vmatprep.subr.bf16.mxu0 %v8011_v57 }
 0x418   :  { %6091 = vmatpush1.bf16.msra.mxu1 %v8057_v59 }
 0x419   :  { %6046 = vmatpush2.bf16.msra.mxu0 %v8009_v25  ;;  %6092 = vmatprep.subr.bf16.mxu1 %v8065_v61 }
 0x41a   :  { %6047 = vmatprep.subr.bf16.mxu0 %v8014_v62  ;;  %v8117_v62 = vld [vmem:[#allocation15 + $0xc78] ss:$28 sps:$4 sm:$0xff]  }
 0x41c   :  { %6093 = vmatpush1.bf16.msra.mxu1 %v8063_v15 }
 0x41d   :  { %6048 = vmatpush2.bf16.msra.mxu0 %v8012_v16  ;;  %6094 = vmatprep.subr.bf16.mxu1 %v8071_v63  ;;  %v8125_v63 = vld [vmem:[#allocation15 + $0xc44] ss:$28 sps:$4 sm:$0xff]  }
 0x41e   :  { %6049 = vmatprep.subr.bf16.mxu0 %v8017_v17 }
 0x420   :  { %6095 = vmatpush1.bf16.msra.mxu1 %v8069_v33 }
 0x421   :  { %6050 = vmatpush2.bf16.msra.mxu0 %v8015_v0  ;;  %6096 = vmatprep.subr.bf16.mxu1 %v8077_v40 }
 0x422   :  { %6051 = vmatprep.subr.bf16.mxu0 %v8020_v44 }
 0x424   :  { %6097 = vmatpush1.bf16.msra.mxu1 %v8075_v26 }
 0x425   :  { %6052 = vmatpush2.bf16.msra.mxu0 %v8018_v1  ;;  %6098 = vmatprep.subr.bf16.mxu1 %v8083_v41 }
 0x426   :  { %6053 = vmatprep.subr.bf16.mxu0 %v8023_v42 }
 0x428   :  { %6099 = vmatpush2.bf16.msra.mxu1 %v8081_v4  ;;  %v8123_v4 = vld [vmem:[#allocation15 + $0xc40] ss:$28 sps:$4 sm:$0xff]  }
 0x429   :  { %6054 = vmatpush2.bf16.msra.mxu0 %v8021_v11  ;;  %6100 = vmatprep.subr.bf16.mxu1 %v8089_v5 }
 0x42a   :  { %6055 = vmatprep.subr.bf16.mxu0 %v8026_v6  ;;  %v8131_v6 = vld [vmem:[#allocation15 + $0x514] ss:$28 sps:$4 sm:$0xff]  }
 0x42c   :  { %6101 = vmatpush2.bf16.msra.mxu1 %v8087_v7 }
 0x42d   :  { %6056 = vmatpush2.bf16.msra.mxu0 %v8024_v8  ;;  %6102 = vmatprep.subr.bf16.mxu1 %v8095_v9 }
 0x42e   :  { %6057 = vmatprep.subr.bf16.mxu0 %v8029_v10 }
 0x430   :  { %6103 = vmatpush2.bf16.msra.mxu1 %v8093_v34 }
 0x431   :  { %6058 = vmatpush2.bf16.msra.mxu0 %v8027_v12  ;;  %6104 = vmatprep.subr.bf16.mxu1 %v8101_v14 }
 0x432   :  { %6059 = vmatprep.subr.bf16.mxu0 %v8032_v19 }
 0x434   :  { %6105 = vmatpush2.bf16.msra.mxu1 %v8099_v21 }
 0x435   :  { %6060 = vmatpush2.bf16.msra.mxu0 %v8030_v3  ;;  %6106 = vmatprep.subr.bf16.mxu1 %v8107_v24 }
 0x436   :  { %v2812_v32 = vpop.f32.mrf.mxu0  ;;  %v2865_v35 = vpop.f32.mrf.mxu1  ;;  %6135 = vmatprep.subr.bf16.mxu0 %v8038_v27 }
 0x437   :  { %v2813_v13 = vadd.f32 %v2812_v32, %v1265_v29 }
 0x438   :  { %v2814_v43 = vpop.f32.mrf.mxu0  ;;  %v2867_v49 = vpop.f32.mrf.mxu1  ;;  %6107 = vmatpush2.bf16.msra.mxu1 %v8105_v28  ;;  %v8036_v28 = vld [vmem:[#allocation15 + $0x190] ss:$28 sps:$4 sm:$0xff]  }
 0x439   :  { %v2815_v47 = vadd.f32 %v2814_v43, %v1269_v46  ;;  %6108 = vmatprep.subr.bf16.mxu1 %v8113_v48  ;;  %v2866_v59 = vadd.f32 %v2865_v35, %v2813_v13  ;;  %v8044_v13 = vld [vmem:[#allocation15 + $0x15c] ss:$28 sps:$4 sm:$0xff]  }
 0x43a   :  { %v2816_v51 = vpop.f32.mrf.mxu0  ;;  %v2869_v52 = vpop.f32.mrf.mxu1 }
 0x43b   :  { %v2868_v56 = vadd.f32 %v2867_v49, %v2815_v47  ;;  %v2817_v57 = vadd.f32 %v2816_v51, %v1265_v29  ;;  %v2994_v26 = vmul.f32 0.2, %v2866_v59 }
 0x43c   :  { %v2818_v25 = vpop.f32.mrf.mxu0  ;;  %v2871_v61 = vpop.f32.mrf.mxu1  ;;  %6109 = vmatpush2.bf16.msra.mxu1 %v8111_v37 }
 0x43d   :  { %v2870_v15 = vadd.f32 %v2869_v52, %v2817_v57  ;;  %v2819_v16 = vadd.f32 %v2818_v25, %v1269_v46  ;;  %6110 = vmatprep.subr.bf16.mxu1 %v8119_v50  ;;  %v2995_v0 = vmul.f32 0.2, %v2868_v56  ;;  %v3026_v14 = vmax.f32 %v2866_v59, %v2994_v26  ;;  %v8042_v50 = vld [vmem:[#allocation15 + $0x158] ss:$28 sps:$4 sm:$0xff]   ;;  %v8048_v25 = vld [vmem:[#allocation15 + $0x120] ss:$28 sps:$4 sm:$0xff]  }
 0x43e   :  { %v2822_v17 = vpop.f32.mrf.mxu0  ;;  %v2875_v33 = vpop.f32.mrf.mxu1  ;;  %v8078_v26 = vld [vmem:[#allocation15 + $0x8] ss:$28 sps:$4 sm:$0xff]  }
 0x43f   :  { %v3002_v40 = vmul.f32 0.2, %v2870_v15  ;;  %v2872_v44 = vadd.f32 %v2871_v61, %v2819_v16  ;;  %v2823_v1 = vadd.f32 %v2822_v17, %v1265_v29  ;;  %v3027_v10 = vmax.f32 %v2868_v56, %v2995_v0  ;;  %v8062_v16 = vld [vmem:[#allocation15 + $0xb4] ss:$28 sps:$4 sm:$0xff]   ;;  %v8068_v17 = vld [vmem:[#allocation15 + $0x7c] ss:$28 sps:$4 sm:$0xff]  }
 0x440   :  { %v2824_v41 = vpop.f32.mrf.mxu0  ;;  %v2877_v42 = vpop.f32.mrf.mxu1  ;;  %6111 = vmatpush2.bf16.msra.mxu1 %v8117_v62  ;;  %v8056_v62 = vld [vmem:[#allocation15 + $0xec] ss:$28 sps:$4 sm:$0xff]   ;;  %v8074_v0 = vld [vmem:[#allocation15 + $0x44] ss:$28 sps:$4 sm:$0xff]  }
 0x441   :  { %v3003_v11 = vmul.f32 0.2, %v2872_v44  ;;  %v2825_v5 = vadd.f32 %v2824_v41, %v1269_v46  ;;  %6112 = vmatprep.subr.bf16.mxu1 %v8125_v63  ;;  %v3034_v7 = vmax.f32 %v2870_v15, %v3002_v40  ;;  %v2876_v19 = vadd.f32 %v2875_v33, %v2823_v1  ;;  %v8054_v15 = vld [vmem:[#allocation15 + $0xe8] ss:$28 sps:$4 sm:$0xff]   ;;  %v8060_v63 = vld [vmem:[#allocation15 + $0xb0] ss:$28 sps:$4 sm:$0xff]  }
 0x442   :  { %v2826_v8 = vpop.f32.mrf.mxu0  ;;  %v2879_v9 = vpop.f32.mrf.mxu1  ;;  %v8066_v33 = vld [vmem:[#allocation15 + $0x78] ss:$28 sps:$4 sm:$0xff]   ;;  %v8072_v40 = vld [vmem:[#allocation15 + $0x40] ss:$28 sps:$4 sm:$0xff]   ;;  %v8084_v41 = vld [vmem:[#allocation15 + $0x350] ss:$28 sps:$4 sm:$0xff]  }
 0x443   :  { %v3035_v34 = vmax.f32 %v2872_v44, %v3003_v11  ;;  %v2878_v12 = vadd.f32 %v2877_v42, %v2825_v5  ;;  %v2827_v21 = vadd.f32 %v2826_v8, %v1265_v29  ;;  %v9121_v48 = vpack.c.bf16 %v3034_v7, %v3026_v14  ;;  %v8080_v44 = vld [vmem:[#allocation15 + $0xc] ss:$28 sps:$4 sm:$0xff]   ;;  %v8086_v1 = vld [vmem:[#allocation15 + $0x354] ss:$28 sps:$4 sm:$0xff]   ;;  %v8092_v42 = vld [vmem:[#allocation15 + $0x31c] ss:$28 sps:$4 sm:$0xff]  }
 0x444   :  { %v2828_v3 = vpop.f32.mrf.mxu0  ;;  %6113 = vmatpush2.bf16.msra.mxu1 %v8123_v4  ;;  %v2881_v35 = vpop.f32.mrf.mxu1  ;;  %v3010_v37 = vmul.f32 0.2, %v2876_v19  ;;  %v8090_v4 = vld [vmem:[#allocation15 + $0x318] ss:$28 sps:$4 sm:$0xff]   ;;  %v8098_v11 = vld [vmem:[#allocation15 + $0x2e4] ss:$28 sps:$4 sm:$0xff]  }
 0x445   :  { %v9119_v24 = vpack.c.bf16 %v3035_v34, %v3027_v10  ;;  %v2829_v27 = vadd.f32 %v2828_v3, %v1269_v46  ;;  %6188 = vmatprep.subr.bf16.mxu1 %v8131_v6  ;;  %v2880_v32 = vadd.f32 %v2879_v9, %v2827_v21  ;;  %v3011_v43 = vmul.f32 0.2, %v2878_v12  ;;  %v8050_v46 = vld [vmem:[#allocation15 + $0x124] ss:$28 sps:$4 sm:$0xff]   ;;  %v8104_v6 = vld [vmem:[#allocation15 + $0x2ac] ss:$28 sps:$4 sm:$0xff]  }
 0x446   :  { %v3042_v57 = vmax.f32 %v2876_v19, %v3010_v37  ;;  %v8096_v5 = vld [vmem:[#allocation15 + $0x2e0] ss:$28 sps:$4 sm:$0xff]   ;;  %v8102_v7 = vld [vmem:[#allocation15 + $0x2a8] ss:$28 sps:$4 sm:$0xff]   ;;  %v1272_v8 = vsub.s32 6, %v8923_v53  ;;  %v1276_v10 = vsub.s32 7, %v8923_v53 }
 0x447   :  { %v2882_v49 = vadd.f32 %v2881_v35, %v2829_v27  ;;  %6061 = vmatprep.mubr.bf16.mxu0 %v9119_v24  ;;  %v3018_v47 = vmul.f32 0.2, %v2880_v32  ;;  %v3043_v52 = vmax.f32 %v2878_v12, %v3011_v43  ;;  %v8110_v9 = vld [vmem:[#allocation15 + $0x274] ss:$28 sps:$4 sm:$0xff]   ;;  %v8116_v19 = vld [vmem:[#allocation15 + $0x23c] ss:$28 sps:$4 sm:$0xff]  }
 0x448   :  { %6062 = vmatmul.mubr.bf16.vlgmr.msra.gmra.mxu0 %v9121_v48  ;;  %v1273_v34 = vrot.slane %v9035_v31, %v1272_v8  ;;  %v8108_v12 = vld [vmem:[#allocation15 + $0x270] ss:$28 sps:$4 sm:$0xff]   ;;  %v1277_v14 = vrot.slane %v9035_v31, %v1276_v10  ;;  %v8114_v35 = vld [vmem:[#allocation15 + $0x238] ss:$28 sps:$4 sm:$0xff]   ;;  %v8122_v43 = vld [vmem:[#allocation15 + $0x204] ss:$28 sps:$4 sm:$0xff]  }
 0x449   :  { %v3019_v29 = vmul.f32 0.2, %v2882_v49  ;;  %6136 = vmatpush1.bf16.msra.mxu0 %v8036_v28  ;;  %v3050_v51 = vmax.f32 %v2880_v32, %v3018_v47  ;;  %v8120_v31 = vld [vmem:[#allocation15 + $0x200] ss:$28 sps:$4 sm:$0xff]  }
 0x44a   :  { %6137 = vmatprep.subr.bf16.mxu0 %v8044_v13 }
 0x44b   :  { %v3051_v56 = vmax.f32 %v2882_v49, %v3019_v29  ;;  %v9127_v61 = vpack.c.bf16 %v3050_v51, %v3042_v57  ;;  %v8128_v57 = vld [vmem:[#allocation15 + $0x1cc] ss:$28 sps:$4 sm:$0xff]  }
 0x44d   :  { %v9125_v59 = vpack.c.bf16 %v3051_v56, %v3043_v52  ;;  %6138 = vmatpush1.bf16.msra.mxu0 %v8042_v50 }
 0x44e   :  { %6139 = vmatprep.subr.bf16.mxu0 %v8050_v46 }
 0x44f   :  { %6071 = vmatprep.mubr.bf16.mxu0 %v9125_v59 }
 0x450   :  { %6072 = vmatmul.mubr.bf16.gmra.mxu0 %v9127_v61 }
 0x451   :  { %6140 = vmatpush1.bf16.msra.mxu0 %v8048_v25  ;;  %6167 = vmatprep.mubr.bf16.mxu0 %v9057_v60 }
 0x452   :  { %6141 = vmatprep.subr.bf16.mxu0 %v8056_v62 }
 0x455   :  { %6142 = vmatpush1.bf16.msra.mxu0 %v8054_v15 }
 0x456   :  { %6143 = vmatprep.subr.bf16.mxu0 %v8062_v16 }
 0x459   :  { %6144 = vmatpush1.bf16.msra.mxu0 %v8060_v63 }
 0x45a   :  { %6145 = vmatprep.subr.bf16.mxu0 %v8068_v17 }
 0x45d   :  { %6146 = vmatpush1.bf16.msra.mxu0 %v8066_v33 }
 0x45e   :  { %6147 = vmatprep.subr.bf16.mxu0 %v8074_v0 }
 0x461   :  { %6148 = vmatpush1.bf16.msra.mxu0 %v8072_v40 }
 0x462   :  { %6149 = vmatprep.subr.bf16.mxu0 %v8080_v44  ;;  %v8126_v44 = vld [vmem:[#allocation15 + $0x1c8] ss:$28 sps:$4 sm:$0xff]  }
 0x465   :  { %6150 = vmatpush1.bf16.msra.mxu0 %v8078_v26 }
 0x466   :  { %6151 = vmatprep.subr.bf16.mxu0 %v8086_v1 }
 0x469   :  { %6152 = vmatpush2.bf16.msra.mxu0 %v8084_v41  ;;  %v8134_v41 = vld [vmem:[#allocation15 + $0x894] ss:$28 sps:$4 sm:$0xff]  }
 0x46a   :  { %6153 = vmatprep.subr.bf16.mxu0 %v8092_v42 }
 0x46d   :  { %6154 = vmatpush2.bf16.msra.mxu0 %v8090_v4 }
 0x46e   :  { %6155 = vmatprep.subr.bf16.mxu0 %v8098_v11 }
 0x471   :  { %6156 = vmatpush2.bf16.msra.mxu0 %v8096_v5 }
 0x472   :  { %6157 = vmatprep.subr.bf16.mxu0 %v8104_v6 }
 0x475   :  { %6158 = vmatpush2.bf16.msra.mxu0 %v8102_v7 }
 0x476   :  { %6159 = vmatprep.subr.bf16.mxu0 %v8110_v9 }
 0x477   :  { %v2918_v21 = vpop.f32.mrf.mxu0  ;;  %v2971_v3 = vpop.f32.mrf.mxu1 }
 0x478   :  { %v2919_v27 = vadd.f32 %v2918_v21, %v1273_v34 }
 0x479   :  { %v2920_v28 = vpop.f32.mrf.mxu0  ;;  %v2973_v32 = vpop.f32.mrf.mxu1  ;;  %6160 = vmatpush2.bf16.msra.mxu0 %v8108_v12 }
 0x47a   :  { %v2921_v13 = vadd.f32 %v2920_v28, %v1277_v14  ;;  %6161 = vmatprep.subr.bf16.mxu0 %v8116_v19  ;;  %v2972_v50 = vadd.f32 %v2971_v3, %v2919_v27  ;;  %v8129_v27 = vld [vmem:[#allocation15 + $0x510] ss:$28 sps:$4 sm:$0xff]  }
 0x47b   :  { %v2922_v49 = vpop.f32.mrf.mxu0  ;;  %v2975_v37 = vpop.f32.mrf.mxu1  ;;  %v8132_v28 = vld [vmem:[#allocation15 + $0x890] ss:$28 sps:$4 sm:$0xff]  }
 0x47c   :  { %v2974_v47 = vadd.f32 %v2973_v32, %v2921_v13  ;;  %v2923_v29 = vadd.f32 %v2922_v49, %v1273_v34  ;;  %v2996_v17 = vmul.f32 0.2, %v2972_v50  ;;  %v8140_v49 = vld [vmem:[#allocation15 + $0x85c] ss:$28 sps:$4 sm:$0xff]  }
 0x47d   :  { %v2924_v51 = vpop.f32.mrf.mxu0  ;;  %v2977_v46 = vpop.f32.mrf.mxu1  ;;  %6162 = vmatpush2.bf16.msra.mxu0 %v8114_v35 }
 0x47e   :  { %v2976_v52 = vadd.f32 %v2975_v37, %v2923_v29  ;;  %v2925_v56 = vadd.f32 %v2924_v51, %v1277_v14  ;;  %6163 = vmatprep.subr.bf16.mxu0 %v8122_v43  ;;  %v2997_v15 = vmul.f32 0.2, %v2974_v47  ;;  %v3028_v9 = vmax.f32 %v2972_v50, %v2996_v17  ;;  %v8137_v43 = vld [vmem:[#allocation15 + $0x4dc] ss:$28 sps:$4 sm:$0xff]   ;;  %v8149_v17 = vld [vmem:[#allocation15 + $0x46c] ss:$28 sps:$4 sm:$0xff]  }
 0x47f   :  { %v2928_v25 = vpop.f32.mrf.mxu0  ;;  %v2981_v62 = vpop.f32.mrf.mxu1  ;;  %v8135_v50 = vld [vmem:[#allocation15 + $0x4d8] ss:$28 sps:$4 sm:$0xff]  }
 0x480   :  { %v3004_v16 = vmul.f32 0.2, %v2976_v52  ;;  %v2978_v63 = vadd.f32 %v2977_v46, %v2925_v56  ;;  %v2929_v33 = vadd.f32 %v2928_v25, %v1273_v34  ;;  %v3029_v5 = vmax.f32 %v2974_v47, %v2997_v15  ;;  %v8138_v51 = vld [vmem:[#allocation15 + $0x858] ss:$28 sps:$4 sm:$0xff]   ;;  %v8141_v15 = vld [vmem:[#allocation15 + $0x4a0] ss:$28 sps:$4 sm:$0xff]  }
 0x481   :  { %v2930_v0 = vpop.f32.mrf.mxu0  ;;  %v2983_v40 = vpop.f32.mrf.mxu1  ;;  %6164 = vmatpush2.bf16.msra.mxu0 %v8120_v31  ;;  %v8143_v31 = vld [vmem:[#allocation15 + $0x4a4] ss:$28 sps:$4 sm:$0xff]  }
 0x482   :  { %v3005_v26 = vmul.f32 0.2, %v2978_v63  ;;  %v2931_v1 = vadd.f32 %v2930_v0, %v1277_v14  ;;  %6165 = vmatprep.subr.bf16.mxu0 %v8128_v57  ;;  %v3036_v42 = vmax.f32 %v2976_v52, %v3004_v16  ;;  %v2982_v10 = vadd.f32 %v2981_v62, %v2929_v33  ;;  %v8146_v52 = vld [vmem:[#allocation15 + $0x824] ss:$28 sps:$4 sm:$0xff]   ;;  %v8152_v33 = vld [vmem:[#allocation15 + $0x7ec] ss:$28 sps:$4 sm:$0xff]  }
 0x483   :  { %v2932_v4 = vpop.f32.mrf.mxu0  ;;  %v2985_v11 = vpop.f32.mrf.mxu1  ;;  %v8144_v16 = vld [vmem:[#allocation15 + $0x820] ss:$28 sps:$4 sm:$0xff]   ;;  %v8147_v0 = vld [vmem:[#allocation15 + $0x468] ss:$28 sps:$4 sm:$0xff]  }
 0x484   :  { %v3037_v6 = vmax.f32 %v2978_v63, %v3005_v26  ;;  %v2984_v7 = vadd.f32 %v2983_v40, %v2931_v1  ;;  %v2933_v12 = vadd.f32 %v2932_v4, %v1273_v34  ;;  %v9140_v32 = vpack.c.bf16 %v3036_v42, %v3028_v9  ;;  %v8150_v40 = vld [vmem:[#allocation15 + $0x7e8] ss:$28 sps:$4 sm:$0xff]   ;;  %v8158_v26 = vld [vmem:[#allocation15 + $0x7b4] ss:$28 sps:$4 sm:$0xff]   ;;  %v8161_v42 = vld [vmem:[#allocation15 + $0x3fc] ss:$28 sps:$4 sm:$0xff]  }
 0x485   :  { %v2934_v19 = vpop.f32.mrf.mxu0  ;;  %6166 = vmatpush2.bf16.msra.mxu0 %v8126_v44  ;;  %v2987_v13 = vpop.f32.mrf.mxu1  ;;  %v3012_v34 = vmul.f32 0.2, %v2982_v10  ;;  %v8155_v44 = vld [vmem:[#allocation15 + $0x434] ss:$28 sps:$4 sm:$0xff]   ;;  %v8164_v4 = vld [vmem:[#allocation15 + $0x77c] ss:$28 sps:$4 sm:$0xff]  }
 0x486   :  { %v9138_v21 = vpack.c.bf16 %v3037_v6, %v3029_v5  ;;  %v2935_v3 = vadd.f32 %v2934_v19, %v1277_v14  ;;  %6241 = vmatprep.subr.bf16.mxu0 %v8134_v41  ;;  %v2986_v35 = vadd.f32 %v2985_v11, %v2933_v12  ;;  %v3013_v37 = vmul.f32 0.2, %v2984_v7  ;;  %v8153_v1 = vld [vmem:[#allocation15 + $0x430] ss:$28 sps:$4 sm:$0xff]   ;;  %v8159_v11 = vld [vmem:[#allocation15 + $0x3f8] ss:$28 sps:$4 sm:$0xff]  }
 0x487   :  { %v3044_v25 = vmax.f32 %v2982_v10, %v3012_v34  ;;  %v8156_v41 = vld [vmem:[#allocation15 + $0x7b0] ss:$28 sps:$4 sm:$0xff]   ;;  %v8162_v5 = vld [vmem:[#allocation15 + $0x778] ss:$28 sps:$4 sm:$0xff]   ;;  %v8167_v6 = vld [vmem:[#allocation15 + $0x3c4] ss:$28 sps:$4 sm:$0xff]  }
 0x488   :  { %v2988_v47 = vadd.f32 %v2987_v13, %v2935_v3  ;;  %6114 = vmatprep.mubr.bf16.mxu1 %v9138_v21  ;;  %6168 = vmatmul.mubr.bf16.vlgmr.msra.gmra.mxu0 %v9082_v18  ;;  %v3020_v29 = vmul.f32 0.2, %v2986_v35  ;;  %v3045_v56 = vmax.f32 %v2984_v7, %v3013_v37  ;;  %v8170_v7 = vld [vmem:[#allocation15 + $0x744] ss:$28 sps:$4 sm:$0xff]   ;;  %v8173_v12 = vld [vmem:[#allocation15 + $0x38c] ss:$28 sps:$4 sm:$0xff]  }
 0x489   :  { %6115 = vmatmul.mubr.bf16.vlgmr.msra.gmra.mxu1 %v9140_v32  ;;  %6177 = vmatprep.mubr.bf16.mxu0 %v9084_v22  ;;  %v8165_v9 = vld [vmem:[#allocation15 + $0x3c0] ss:$28 sps:$4 sm:$0xff]   ;;  %v8176_v19 = vld [vmem:[#allocation15 + $0x70c] ss:$28 sps:$4 sm:$0xff]   ;;  %v8186_v34 = vld [vmem:[#allocation15 + $0xa18] ss:$28 sps:$4 sm:$0xff]  }
 0x48a   :  { %v3021_v14 = vmul.f32 0.2, %v2988_v47  ;;  %6189 = vmatpush1.bf16.msra.mxu1 %v8129_v27  ;;  %6242 = vmatpush1.bf16.msra.mxu0 %v8132_v28  ;;  %v3052_v46 = vmax.f32 %v2986_v35, %v3020_v29  ;;  %v8168_v10 = vld [vmem:[#allocation15 + $0x740] ss:$28 sps:$4 sm:$0xff]   ;;  %v8171_v3 = vld [vmem:[#allocation15 + $0x388] ss:$28 sps:$4 sm:$0xff]  }
 0x48b   :  { %6190 = vmatprep.subr.bf16.mxu1 %v8137_v43  ;;  %6243 = vmatprep.subr.bf16.mxu0 %v8140_v49  ;;  %v8174_v27 = vld [vmem:[#allocation15 + $0x708] ss:$28 sps:$4 sm:$0xff]   ;;  %v8179_v28 = vld [vmem:[#allocation15 + $0x6d4] ss:$28 sps:$4 sm:$0xff]   ;;  %v8185_v49 = vld [vmem:[#allocation15 + $0x69c] ss:$28 sps:$4 sm:$0xff]  }
 0x48c   :  { %v3053_v57 = vmax.f32 %v2988_v47, %v3021_v14  ;;  %v9148_v63 = vpack.c.bf16 %v3052_v46, %v3044_v25  ;;  %v8182_v35 = vld [vmem:[#allocation15 + $0xa54] ss:$28 sps:$4 sm:$0xff]   ;;  %v8188_v37 = vld [vmem:[#allocation15 + $0xa1c] ss:$28 sps:$4 sm:$0xff]   ;;  %v8191_v29 = vld [vmem:[#allocation15 + $0x664] ss:$28 sps:$4 sm:$0xff]  }
 0x48d   :  { %v8177_v13 = vld [vmem:[#allocation15 + $0x6d0] ss:$28 sps:$4 sm:$0xff]   ;;  %v8183_v47 = vld [vmem:[#allocation15 + $0x698] ss:$28 sps:$4 sm:$0xff]   ;;  %v8194_v14 = vld [vmem:[#allocation15 + $0x9e4] ss:$28 sps:$4 sm:$0xff]  }
 0x48e   :  { %v9146_v62 = vpack.c.bf16 %v3053_v57, %v3045_v56  ;;  %6191 = vmatpush1.bf16.msra.mxu1 %v8135_v50  ;;  %6244 = vmatpush1.bf16.msra.mxu0 %v8138_v51  ;;  %v8180_v43 = vld [vmem:[#allocation15 + $0xa50] ss:$28 sps:$4 sm:$0xff]   ;;  %v8189_v50 = vld [vmem:[#allocation15 + $0x660] ss:$28 sps:$4 sm:$0xff]   ;;  %v8198_v56 = vld [vmem:[#allocation15 + $0x9a8] ss:$28 sps:$4 sm:$0xff]  }
 0x48f   :  { %6192 = vmatprep.subr.bf16.mxu1 %v8143_v31  ;;  %6245 = vmatprep.subr.bf16.mxu0 %v8146_v52  ;;  %v8192_v51 = vld [vmem:[#allocation15 + $0x9e0] ss:$28 sps:$4 sm:$0xff]   ;;  %v8197_v46 = vld [vmem:[#allocation15 + $0x62c] ss:$28 sps:$4 sm:$0xff]   ;;  %v8203_v57 = vld [vmem:[#allocation15 + $0x5f4] ss:$28 sps:$4 sm:$0xff]  }
 0x490   :  { %6124 = vmatprep.mubr.bf16.mxu1 %v9146_v62  ;;  %6178 = vmatmul.mubr.bf16.gmra.mxu0 %v9092_v58  ;;  %v8200_v31 = vld [vmem:[#allocation15 + $0x9ac] ss:$28 sps:$4 sm:$0xff]   ;;  %v8206_v25 = vld [vmem:[#allocation15 + $0x974] ss:$28 sps:$4 sm:$0xff]  }
 0x491   :  { %6125 = vmatmul.mubr.bf16.gmra.mxu1 %v9148_v63  ;;  %6273 = vmatprep.mubr.bf16.mxu0 %v9119_v24  ;;  %v8195_v52 = vld [vmem:[#allocation15 + $0x628] ss:$28 sps:$4 sm:$0xff]  }
 0x492   :  { %6193 = vmatpush1.bf16.msra.mxu1 %v8141_v15  ;;  %6246 = vmatpush1.bf16.msra.mxu0 %v8144_v16  ;;  %v8201_v15 = vld [vmem:[#allocation15 + $0x5f0] ss:$28 sps:$4 sm:$0xff]  }
 0x493   :  { %6220 = vmatprep.mubr.bf16.mxu1 %v9098_v2  ;;  %6194 = vmatprep.subr.bf16.mxu1 %v8149_v17  ;;  %v8204_v16 = vld [vmem:[#allocation15 + $0x970] ss:$28 sps:$4 sm:$0xff]   ;;  %v8209_v17 = vld [vmem:[#allocation15 + $0x5bc] ss:$28 sps:$4 sm:$0xff]  }
 0x494   :  { %6247 = vmatprep.subr.bf16.mxu0 %v8152_v33  ;;  %v8212_v33 = vld [vmem:[#allocation15 + $0x93c] ss:$28 sps:$4 sm:$0xff]  }
 0x496   :  { %6195 = vmatpush1.bf16.msra.mxu1 %v8147_v0  ;;  %6248 = vmatpush1.bf16.msra.mxu0 %v8150_v40  ;;  %v8207_v0 = vld [vmem:[#allocation15 + $0x5b8] ss:$28 sps:$4 sm:$0xff]  }
 0x497   :  { %6196 = vmatprep.subr.bf16.mxu1 %v8155_v44  ;;  %6249 = vmatprep.subr.bf16.mxu0 %v8158_v26  ;;  %v8210_v40 = vld [vmem:[#allocation15 + $0x938] ss:$28 sps:$4 sm:$0xff]   ;;  %v8215_v44 = vld [vmem:[#allocation15 + $0x584] ss:$28 sps:$4 sm:$0xff]  }
 0x498   :  { %v8218_v26 = vld [vmem:[#allocation15 + $0x904] ss:$28 sps:$4 sm:$0xff]  }
 0x49a   :  { %6197 = vmatpush1.bf16.msra.mxu1 %v8153_v1  ;;  %6250 = vmatpush1.bf16.msra.mxu0 %v8156_v41  ;;  %v8213_v1 = vld [vmem:[#allocation15 + $0x580] ss:$28 sps:$4 sm:$0xff]  }
 0x49b   :  { %6198 = vmatprep.subr.bf16.mxu1 %v8161_v42  ;;  %6251 = vmatprep.subr.bf16.mxu0 %v8164_v4  ;;  %v8216_v41 = vld [vmem:[#allocation15 + $0x900] ss:$28 sps:$4 sm:$0xff]   ;;  %v8221_v42 = vld [vmem:[#allocation15 + $0x54c] ss:$28 sps:$4 sm:$0xff]  }
 0x49c   :  { %v8224_v4 = vld [vmem:[#allocation15 + $0x8cc] ss:$28 sps:$4 sm:$0xff]  }
 0x49e   :  { %6199 = vmatpush1.bf16.msra.mxu1 %v8159_v11  ;;  %6252 = vmatpush1.bf16.msra.mxu0 %v8162_v5  ;;  %v8219_v11 = vld [vmem:[#allocation15 + $0x548] ss:$28 sps:$4 sm:$0xff]  }
 0x49f   :  { %6200 = vmatprep.subr.bf16.mxu1 %v8167_v6  ;;  %6253 = vmatprep.subr.bf16.mxu0 %v8170_v7  ;;  %v8222_v5 = vld [vmem:[#allocation15 + $0x8c8] ss:$28 sps:$4 sm:$0xff]   ;;  %v8227_v6 = vld [vmem:[#allocation15 + $0xc14] ss:$28 sps:$4 sm:$0xff]   ;;  %v8230_v7 = vld [vmem:[#allocation15 + $0x19c] ss:$28 sps:$4 sm:$0xff]  }
 0x4a2   :  { %6201 = vmatpush1.bf16.msra.mxu1 %v8165_v9  ;;  %6254 = vmatpush1.bf16.msra.mxu0 %v8168_v10  ;;  %v8225_v9 = vld [vmem:[#allocation15 + $0xc10] ss:$28 sps:$4 sm:$0xff]   ;;  %v8228_v10 = vld [vmem:[#allocation15 + $0x198] ss:$28 sps:$4 sm:$0xff]  }
 0x4a3   :  { %6202 = vmatprep.subr.bf16.mxu1 %v8173_v12  ;;  %6255 = vmatprep.subr.bf16.mxu0 %v8176_v19  ;;  %v8233_v12 = vld [vmem:[#allocation15 + $0xbdc] ss:$28 sps:$4 sm:$0xff]   ;;  %v8236_v19 = vld [vmem:[#allocation15 + $0x164] ss:$28 sps:$4 sm:$0xff]  }
 0x4a6   :  { %6203 = vmatpush1.bf16.msra.mxu1 %v8171_v3  ;;  %6256 = vmatpush1.bf16.msra.mxu0 %v8174_v27  ;;  %v8231_v3 = vld [vmem:[#allocation15 + $0xbd8] ss:$28 sps:$4 sm:$0xff]   ;;  %v8234_v27 = vld [vmem:[#allocation15 + $0x160] ss:$28 sps:$4 sm:$0xff]  }
 0x4a7   :  { %6204 = vmatprep.subr.bf16.mxu1 %v8179_v28  ;;  %6257 = vmatprep.subr.bf16.mxu0 %v8182_v35  ;;  %v8239_v28 = vld [vmem:[#allocation15 + $0xba4] ss:$28 sps:$4 sm:$0xff]   ;;  %v8242_v35 = vld [vmem:[#allocation15 + $0x12c] ss:$28 sps:$4 sm:$0xff]  }
 0x4aa   :  { %6205 = vmatpush2.bf16.msra.mxu1 %v8177_v13  ;;  %6258 = vmatpush2.bf16.msra.mxu0 %v8180_v43  ;;  %v8237_v13 = vld [vmem:[#allocation15 + $0xba0] ss:$28 sps:$4 sm:$0xff]   ;;  %v8240_v43 = vld [vmem:[#allocation15 + $0x128] ss:$28 sps:$4 sm:$0xff]  }
 0x4ab   :  { %6206 = vmatprep.subr.bf16.mxu1 %v8185_v49  ;;  %6259 = vmatprep.subr.bf16.mxu0 %v8188_v37  ;;  %v8245_v49 = vld [vmem:[#allocation15 + $0xb6c] ss:$28 sps:$4 sm:$0xff]   ;;  %v8248_v37 = vld [vmem:[#allocation15 + $0xf4] ss:$28 sps:$4 sm:$0xff]  }
 0x4ae   :  { %6207 = vmatpush2.bf16.msra.mxu1 %v8183_v47  ;;  %6260 = vmatpush2.bf16.msra.mxu0 %v8186_v34  ;;  %v8243_v47 = vld [vmem:[#allocation15 + $0xb68] ss:$28 sps:$4 sm:$0xff]   ;;  %v8246_v34 = vld [vmem:[#allocation15 + $0xf0] ss:$28 sps:$4 sm:$0xff]  }
 0x4af   :  { %6208 = vmatprep.subr.bf16.mxu1 %v8191_v29  ;;  %6261 = vmatprep.subr.bf16.mxu0 %v8194_v14  ;;  %v8251_v29 = vld [vmem:[#allocation15 + $0xb34] ss:$28 sps:$4 sm:$0xff]   ;;  %v8254_v14 = vld [vmem:[#allocation15 + $0xbc] ss:$28 sps:$4 sm:$0xff]  }
 0x4b2   :  { %6209 = vmatpush2.bf16.msra.mxu1 %v8189_v50  ;;  %6262 = vmatpush2.bf16.msra.mxu0 %v8192_v51  ;;  %v8249_v50 = vld [vmem:[#allocation15 + $0xb30] ss:$28 sps:$4 sm:$0xff]   ;;  %v8252_v51 = vld [vmem:[#allocation15 + $0xb8] ss:$28 sps:$4 sm:$0xff]  }
 0x4b3   :  { %6210 = vmatprep.subr.bf16.mxu1 %v8197_v46  ;;  %6263 = vmatprep.subr.bf16.mxu0 %v8200_v31  ;;  %v8257_v46 = vld [vmem:[#allocation15 + $0xafc] ss:$28 sps:$4 sm:$0xff]   ;;  %v8260_v31 = vld [vmem:[#allocation15 + $0x84] ss:$28 sps:$4 sm:$0xff]  }
 0x4b6   :  { %6211 = vmatpush2.bf16.msra.mxu1 %v8195_v52  ;;  %6264 = vmatpush2.bf16.msra.mxu0 %v8198_v56  ;;  %v8255_v52 = vld [vmem:[#allocation15 + $0xaf8] ss:$28 sps:$4 sm:$0xff]   ;;  %v8258_v56 = vld [vmem:[#allocation15 + $0x80] ss:$28 sps:$4 sm:$0xff]  }
 0x4b7   :  { %6212 = vmatprep.subr.bf16.mxu1 %v8203_v57  ;;  %6265 = vmatprep.subr.bf16.mxu0 %v8206_v25  ;;  %v8263_v57 = vld [vmem:[#allocation15 + $0xac4] ss:$28 sps:$4 sm:$0xff]   ;;  %v8266_v25 = vld [vmem:[#allocation15 + $0x4c] ss:$28 sps:$4 sm:$0xff]  }
 0x4ba   :  { %6213 = vmatpush2.bf16.msra.mxu1 %v8201_v15  ;;  %6266 = vmatpush2.bf16.msra.mxu0 %v8204_v16  ;;  %v8261_v15 = vld [vmem:[#allocation15 + $0xac0] ss:$28 sps:$4 sm:$0xff]   ;;  %v8264_v16 = vld [vmem:[#allocation15 + $0x48] ss:$28 sps:$4 sm:$0xff]  }
 0x4bb   :  { %6214 = vmatprep.subr.bf16.mxu1 %v8209_v17  ;;  %6267 = vmatprep.subr.bf16.mxu0 %v8212_v33  ;;  %v8269_v17 = vld [vmem:[#allocation15 + $0xa8c] ss:$28 sps:$4 sm:$0xff]   ;;  %v8272_v33 = vld [vmem:[#allocation15 + $0x14] ss:$28 sps:$4 sm:$0xff]  }
 0x4be   :  { %6215 = vmatpush2.bf16.msra.mxu1 %v8207_v0  ;;  %6268 = vmatpush2.bf16.msra.mxu0 %v8210_v40  ;;  %v8267_v0 = vld [vmem:[#allocation15 + $0xa88] ss:$28 sps:$4 sm:$0xff]   ;;  %v8270_v40 = vld [vmem:[#allocation15 + $0x10] ss:$28 sps:$4 sm:$0xff]  }
 0x4bf   :  { %6216 = vmatprep.subr.bf16.mxu1 %v8215_v44  ;;  %6269 = vmatprep.subr.bf16.mxu0 %v8218_v26  ;;  %v8275_v44 = vld [vmem:[#allocation15 + $0xdd4] ss:$28 sps:$4 sm:$0xff]   ;;  %v8278_v26 = vld [vmem:[#allocation15 + $0x35c] ss:$28 sps:$4 sm:$0xff]  }
 0x4c2   :  { %6217 = vmatpush2.bf16.msra.mxu1 %v8213_v1  ;;  %6270 = vmatpush2.bf16.msra.mxu0 %v8216_v41  ;;  %v8273_v1 = vld [vmem:[#allocation15 + $0xdd0] ss:$28 sps:$4 sm:$0xff]   ;;  %v8276_v41 = vld [vmem:[#allocation15 + $0x358] ss:$28 sps:$4 sm:$0xff]  }
 0x4c3   :  { %6218 = vmatprep.subr.bf16.mxu1 %v8221_v42  ;;  %6271 = vmatprep.subr.bf16.mxu0 %v8224_v4  ;;  %v8281_v42 = vld [vmem:[#allocation15 + $0xd9c] ss:$28 sps:$4 sm:$0xff]   ;;  %v8284_v4 = vld [vmem:[#allocation15 + $0x324] ss:$28 sps:$4 sm:$0xff]  }
 0x4c6   :  { %6219 = vmatpush2.bf16.msra.mxu1 %v8219_v11  ;;  %6272 = vmatpush2.bf16.msra.mxu0 %v8222_v5  ;;  %v8279_v11 = vld [vmem:[#allocation15 + $0xd98] ss:$28 sps:$4 sm:$0xff]   ;;  %v8282_v5 = vld [vmem:[#allocation15 + $0x320] ss:$28 sps:$4 sm:$0xff]  }
 0x4c7   :  { %6294 = vmatprep.subr.bf16.mxu1 %v8227_v6  ;;  %6347 = vmatprep.subr.bf16.mxu0 %v8230_v7  ;;  %v8287_v6 = vld [vmem:[#allocation15 + $0xd64] ss:$28 sps:$4 sm:$0xff]   ;;  %v8290_v7 = vld [vmem:[#allocation15 + $0x2ec] ss:$28 sps:$4 sm:$0xff]  }
 0x4c9   :  { %6221 = vmatmul.mubr.bf16.vlgmr.msra.gmra.mxu1 %v9101_v30  ;;  %6274 = vmatmul.mubr.bf16.vlgmr.msra.gmra.mxu0 %v9121_v48 }
 0x4ca   :  { %6230 = vmatprep.mubr.bf16.mxu1 %v9105_v45  ;;  %6283 = vmatprep.mubr.bf16.mxu0 %v9125_v59 }
 0x4cb   :  { %6295 = vmatpush1.bf16.msra.mxu1 %v8225_v9  ;;  %6348 = vmatpush1.bf16.msra.mxu0 %v8228_v10  ;;  %v8285_v9 = vld [vmem:[#allocation15 + $0xd60] ss:$28 sps:$4 sm:$0xff]   ;;  %v8288_v10 = vld [vmem:[#allocation15 + $0x2e8] ss:$28 sps:$4 sm:$0xff]  }
 0x4cc   :  { %6296 = vmatprep.subr.bf16.mxu1 %v8233_v12  ;;  %6349 = vmatprep.subr.bf16.mxu0 %v8236_v19  ;;  %v8293_v12 = vld [vmem:[#allocation15 + $0xd2c] ss:$28 sps:$4 sm:$0xff]   ;;  %v8296_v19 = vld [vmem:[#allocation15 + $0x2b4] ss:$28 sps:$4 sm:$0xff]  }
 0x4cf   :  { %6297 = vmatpush1.bf16.msra.mxu1 %v8231_v3  ;;  %6350 = vmatpush1.bf16.msra.mxu0 %v8234_v27  ;;  %v8291_v3 = vld [vmem:[#allocation15 + $0xd28] ss:$28 sps:$4 sm:$0xff]   ;;  %v8294_v27 = vld [vmem:[#allocation15 + $0x2b0] ss:$28 sps:$4 sm:$0xff]  }
 0x4d0   :  { %6298 = vmatprep.subr.bf16.mxu1 %v8239_v28  ;;  %6351 = vmatprep.subr.bf16.mxu0 %v8242_v35  ;;  %v8299_v28 = vld [vmem:[#allocation15 + $0xcf4] ss:$28 sps:$4 sm:$0xff]   ;;  %v8302_v35 = vld [vmem:[#allocation15 + $0x27c] ss:$28 sps:$4 sm:$0xff]  }
 0x4d1   :  { %6231 = vmatmul.mubr.bf16.gmra.mxu1 %v9107_v36  ;;  %6284 = vmatmul.mubr.bf16.gmra.mxu0 %v9127_v61 }
 0x4d2   :  { %6326 = vmatprep.mubr.bf16.mxu1 %v9138_v21  ;;  %6379 = vmatprep.mubr.bf16.mxu0 %v9057_v60 }
 0x4d3   :  { %6299 = vmatpush1.bf16.msra.mxu1 %v8237_v13  ;;  %6352 = vmatpush1.bf16.msra.mxu0 %v8240_v43  ;;  %v8297_v13 = vld [vmem:[#allocation15 + $0xcf0] ss:$28 sps:$4 sm:$0xff]   ;;  %v8300_v43 = vld [vmem:[#allocation15 + $0x278] ss:$28 sps:$4 sm:$0xff]  }
 0x4d4   :  { %6300 = vmatprep.subr.bf16.mxu1 %v8245_v49  ;;  %6353 = vmatprep.subr.bf16.mxu0 %v8248_v37  ;;  %v8305_v49 = vld [vmem:[#allocation15 + $0xcbc] ss:$28 sps:$4 sm:$0xff]   ;;  %v8308_v37 = vld [vmem:[#allocation15 + $0x244] ss:$28 sps:$4 sm:$0xff]  }
 0x4d7   :  { %6301 = vmatpush1.bf16.msra.mxu1 %v8243_v47  ;;  %6354 = vmatpush1.bf16.msra.mxu0 %v8246_v34  ;;  %v8303_v47 = vld [vmem:[#allocation15 + $0xcb8] ss:$28 sps:$4 sm:$0xff]   ;;  %v8306_v34 = vld [vmem:[#allocation15 + $0x240] ss:$28 sps:$4 sm:$0xff]  }
 0x4d8   :  { %6302 = vmatprep.subr.bf16.mxu1 %v8251_v29  ;;  %6355 = vmatprep.subr.bf16.mxu0 %v8254_v14  ;;  %v8311_v29 = vld [vmem:[#allocation15 + $0xc84] ss:$28 sps:$4 sm:$0xff]   ;;  %v8314_v14 = vld [vmem:[#allocation15 + $0x20c] ss:$28 sps:$4 sm:$0xff]  }
 0x4db   :  { %6303 = vmatpush1.bf16.msra.mxu1 %v8249_v50  ;;  %6356 = vmatpush1.bf16.msra.mxu0 %v8252_v51  ;;  %v8309_v50 = vld [vmem:[#allocation15 + $0xc80] ss:$28 sps:$4 sm:$0xff]   ;;  %v8312_v51 = vld [vmem:[#allocation15 + $0x208] ss:$28 sps:$4 sm:$0xff]  }
 0x4dc   :  { %6304 = vmatprep.subr.bf16.mxu1 %v8257_v46  ;;  %6357 = vmatprep.subr.bf16.mxu0 %v8260_v31  ;;  %v8317_v46 = vld [vmem:[#allocation15 + $0xc4c] ss:$28 sps:$4 sm:$0xff]   ;;  %v8320_v31 = vld [vmem:[#allocation15 + $0x1d4] ss:$28 sps:$4 sm:$0xff]  }
 0x4df   :  { %6305 = vmatpush1.bf16.msra.mxu1 %v8255_v52  ;;  %6358 = vmatpush1.bf16.msra.mxu0 %v8258_v56  ;;  %v8315_v52 = vld [vmem:[#allocation15 + $0xc48] ss:$28 sps:$4 sm:$0xff]   ;;  %v8318_v56 = vld [vmem:[#allocation15 + $0x1d0] ss:$28 sps:$4 sm:$0xff]  }
 0x4e0   :  { %6306 = vmatprep.subr.bf16.mxu1 %v8263_v57  ;;  %6359 = vmatprep.subr.bf16.mxu0 %v8266_v25  ;;  %v8323_v57 = vld [vmem:[#allocation15 + $0x51c] ss:$28 sps:$4 sm:$0xff]  }
 0x4e1   :  { %v8326_v25 = vld [vmem:[#allocation15 + $0x89c] ss:$28 sps:$4 sm:$0xff]  }
 0x4e3   :  { %6307 = vmatpush1.bf16.msra.mxu1 %v8261_v15  ;;  %6360 = vmatpush1.bf16.msra.mxu0 %v8264_v16  ;;  %v8321_v15 = vld [vmem:[#allocation15 + $0x518] ss:$28 sps:$4 sm:$0xff]  }
 0x4e4   :  { %6308 = vmatprep.subr.bf16.mxu1 %v8269_v17  ;;  %6361 = vmatprep.subr.bf16.mxu0 %v8272_v33  ;;  %v8324_v16 = vld [vmem:[#allocation15 + $0x898] ss:$28 sps:$4 sm:$0xff]   ;;  %v8329_v17 = vld [vmem:[#allocation15 + $0x4e4] ss:$28 sps:$4 sm:$0xff]  }
 0x4e5   :  { %v8332_v33 = vld [vmem:[#allocation15 + $0x864] ss:$28 sps:$4 sm:$0xff]  }
 0x4e7   :  { %6309 = vmatpush1.bf16.msra.mxu1 %v8267_v0  ;;  %6362 = vmatpush1.bf16.msra.mxu0 %v8270_v40  ;;  %v8327_v0 = vld [vmem:[#allocation15 + $0x4e0] ss:$28 sps:$4 sm:$0xff]  }
 0x4e8   :  { %6310 = vmatprep.subr.bf16.mxu1 %v8275_v44  ;;  %6363 = vmatprep.subr.bf16.mxu0 %v8278_v26  ;;  %v8330_v40 = vld [vmem:[#allocation15 + $0x860] ss:$28 sps:$4 sm:$0xff]   ;;  %v8335_v44 = vld [vmem:[#allocation15 + $0x4ac] ss:$28 sps:$4 sm:$0xff]  }
 0x4e9   :  { %v8338_v26 = vld [vmem:[#allocation15 + $0x82c] ss:$28 sps:$4 sm:$0xff]  }
 0x4eb   :  { %6311 = vmatpush2.bf16.msra.mxu1 %v8273_v1  ;;  %6364 = vmatpush2.bf16.msra.mxu0 %v8276_v41  ;;  %v8333_v1 = vld [vmem:[#allocation15 + $0x4a8] ss:$28 sps:$4 sm:$0xff]  }
 0x4ec   :  { %6312 = vmatprep.subr.bf16.mxu1 %v8281_v42  ;;  %6365 = vmatprep.subr.bf16.mxu0 %v8284_v4  ;;  %v8336_v41 = vld [vmem:[#allocation15 + $0x828] ss:$28 sps:$4 sm:$0xff]   ;;  %v8341_v42 = vld [vmem:[#allocation15 + $0x474] ss:$28 sps:$4 sm:$0xff]  }
 0x4ed   :  { %v8344_v4 = vld [vmem:[#allocation15 + $0x7f4] ss:$28 sps:$4 sm:$0xff]  }
 0x4ef   :  { %6313 = vmatpush2.bf16.msra.mxu1 %v8279_v11  ;;  %6366 = vmatpush2.bf16.msra.mxu0 %v8282_v5  ;;  %v8339_v11 = vld [vmem:[#allocation15 + $0x470] ss:$28 sps:$4 sm:$0xff]  }
 0x4f0   :  { %6314 = vmatprep.subr.bf16.mxu1 %v8287_v6  ;;  %6367 = vmatprep.subr.bf16.mxu0 %v8290_v7  ;;  %v8342_v5 = vld [vmem:[#allocation15 + $0x7f0] ss:$28 sps:$4 sm:$0xff]   ;;  %v8347_v6 = vld [vmem:[#allocation15 + $0x43c] ss:$28 sps:$4 sm:$0xff]  }
 0x4f1   :  { %v8350_v7 = vld [vmem:[#allocation15 + $0x7bc] ss:$28 sps:$4 sm:$0xff]  }
 0x4f3   :  { %6315 = vmatpush2.bf16.msra.mxu1 %v8285_v9  ;;  %6368 = vmatpush2.bf16.msra.mxu0 %v8288_v10  ;;  %v8345_v9 = vld [vmem:[#allocation15 + $0x438] ss:$28 sps:$4 sm:$0xff]  }
 0x4f4   :  { %6316 = vmatprep.subr.bf16.mxu1 %v8293_v12  ;;  %6369 = vmatprep.subr.bf16.mxu0 %v8296_v19  ;;  %v8348_v10 = vld [vmem:[#allocation15 + $0x7b8] ss:$28 sps:$4 sm:$0xff]   ;;  %v9171_v12 = vpop.f32.mrf.mxu0  ;;  %v8353_v19 = vld [vmem:[#allocation15 + $0x404] ss:$28 sps:$4 sm:$0xff]  }
 0x4f7   :  { %6317 = vmatpush2.bf16.msra.mxu1 %v8291_v3  ;;  %6370 = vmatpush2.bf16.msra.mxu0 %v8294_v27  ;;  %v8356_v3 = vld [vmem:[#allocation15 + $0x784] ss:$28 sps:$4 sm:$0xff]  }
 0x4f8   :  { %6318 = vmatprep.subr.bf16.mxu1 %v8299_v28  ;;  %6371 = vmatprep.subr.bf16.mxu0 %v8302_v35  ;;  %v8351_v27 = vld [vmem:[#allocation15 + $0x400] ss:$28 sps:$4 sm:$0xff]   ;;  %v9173_v35 = vpop.f32.mrf.mxu0 }
 0x4f9   :  { %v8354_v28 = vld [vmem:[#allocation15 + $0x780] ss:$28 sps:$4 sm:$0xff]  }
 0x4fb   :  { %6319 = vmatpush2.bf16.msra.mxu1 %v8297_v13  ;;  %6372 = vmatpush2.bf16.msra.mxu0 %v8300_v43  ;;  %v8359_v13 = vld [vmem:[#allocation15 + $0x3cc] ss:$28 sps:$4 sm:$0xff]  }
 0x4fc   :  { %6320 = vmatprep.subr.bf16.mxu1 %v8305_v49  ;;  %6373 = vmatprep.subr.bf16.mxu0 %v8308_v37  ;;  %v8362_v43 = vld [vmem:[#allocation15 + $0x74c] ss:$28 sps:$4 sm:$0xff]  }
 0x4fd   :  { %v8357_v49 = vld [vmem:[#allocation15 + $0x3c8] ss:$28 sps:$4 sm:$0xff]  }
 0x4fe   :  { %v8360_v37 = vld [vmem:[#allocation15 + $0x748] ss:$28 sps:$4 sm:$0xff]  }
 0x4ff   :  { %6321 = vmatpush2.bf16.msra.mxu1 %v8303_v47  ;;  %6374 = vmatpush2.bf16.msra.mxu0 %v8306_v34  ;;  %v9175_v47 = vpop.f32.mrf.mxu0  ;;  %v8365_v34 = vld [vmem:[#allocation15 + $0x394] ss:$28 sps:$4 sm:$0xff]  }
 0x500   :  { %6322 = vmatprep.subr.bf16.mxu1 %v8311_v29  ;;  %6375 = vmatprep.subr.bf16.mxu0 %v8314_v14  ;;  %v8368_v29 = vld [vmem:[#allocation15 + $0x714] ss:$28 sps:$4 sm:$0xff]  }
 0x501   :  { %v8363_v14 = vld [vmem:[#allocation15 + $0x390] ss:$28 sps:$4 sm:$0xff]  }
 0x503   :  { %6323 = vmatpush2.bf16.msra.mxu1 %v8309_v50  ;;  %6376 = vmatpush2.bf16.msra.mxu0 %v8312_v51  ;;  %v8366_v50 = vld [vmem:[#allocation15 + $0x710] ss:$28 sps:$4 sm:$0xff]   ;;  %v9177_v51 = vpop.f32.mrf.mxu0 }
 0x504   :  { %6324 = vmatprep.subr.bf16.mxu1 %v8317_v46  ;;  %6377 = vmatprep.subr.bf16.mxu0 %v8320_v31  ;;  %v8371_v46 = vld [vmem:[#allocation15 + $0x6dc] ss:$28 sps:$4 sm:$0xff]  }
 0x505   :  { %v8374_v31 = vld [vmem:[#allocation15 + $0xa5c] ss:$28 sps:$4 sm:$0xff]  }
 0x507   :  { %6325 = vmatpush2.bf16.msra.mxu1 %v8315_v52  ;;  %6378 = vmatpush2.bf16.msra.mxu0 %v8318_v56  ;;  %v8369_v52 = vld [vmem:[#allocation15 + $0x6d8] ss:$28 sps:$4 sm:$0xff]  }
 0x508   :  { %6400 = vmatprep.subr.bf16.mxu1 %v8323_v57  ;;  %6453 = vmatprep.subr.bf16.mxu0 %v8326_v25  ;;  %v8372_v56 = vld [vmem:[#allocation15 + $0xa58] ss:$28 sps:$4 sm:$0xff]   ;;  %v9179_v57 = vpop.f32.mrf.mxu0  ;;  %v8377_v25 = vld [vmem:[#allocation15 + $0x6a4] ss:$28 sps:$4 sm:$0xff]  }
 0x50a   :  { %6327 = vmatmul.mubr.bf16.vlgmr.msra.gmra.mxu1 %v9140_v32  ;;  %6380 = vmatmul.mubr.bf16.vlgmr.msra.gmra.mxu0 %v9082_v18 }
 0x50b   :  { %6336 = vmatprep.mubr.bf16.mxu1 %v9146_v62  ;;  %6389 = vmatprep.mubr.bf16.mxu0 %v9084_v22 }
 0x50c   :  { %6401 = vmatpush1.bf16.msra.mxu1 %v8321_v15  ;;  %6454 = vmatpush1.bf16.msra.mxu0 %v8324_v16  ;;  %v8380_v15 = vld [vmem:[#allocation15 + $0xa24] ss:$28 sps:$4 sm:$0xff]   ;;  %v9181_v16 = vpop.f32.mrf.mxu1 }
 0x50d   :  { %6402 = vmatprep.subr.bf16.mxu1 %v8329_v17  ;;  %6455 = vmatprep.subr.bf16.mxu0 %v8332_v33  ;;  %v8375_v17 = vld [vmem:[#allocation15 + $0x6a0] ss:$28 sps:$4 sm:$0xff]  }
 0x50e   :  { %v8378_v33 = vld [vmem:[#allocation15 + $0xa20] ss:$28 sps:$4 sm:$0xff]  }
 0x510   :  { %6403 = vmatpush1.bf16.msra.mxu1 %v8327_v0  ;;  %6456 = vmatpush1.bf16.msra.mxu0 %v8330_v40  ;;  %v9183_v0 = vpop.f32.mrf.mxu0  ;;  %v8383_v40 = vld [vmem:[#allocation15 + $0x66c] ss:$28 sps:$4 sm:$0xff]  }
 0x511   :  { %6404 = vmatprep.subr.bf16.mxu1 %v8335_v44  ;;  %6457 = vmatprep.subr.bf16.mxu0 %v8338_v26  ;;  %v8386_v44 = vld [vmem:[#allocation15 + $0x9ec] ss:$28 sps:$4 sm:$0xff]   ;;  %v9185_v26 = vpop.f32.mrf.mxu1 }
 0x512   :  { %6337 = vmatmul.mubr.bf16.gmra.mxu1 %v9148_v63  ;;  %6390 = vmatmul.mubr.bf16.gmra.mxu0 %v9092_v58 }
 0x513   :  { %6432 = vmatprep.mubr.bf16.mxu1 %v9098_v2  ;;  %6485 = vmatprep.mubr.bf16.mxu0 %v9119_v24 }
 0x514   :  { %6405 = vmatpush1.bf16.msra.mxu1 %v8333_v1  ;;  %6458 = vmatpush1.bf16.msra.mxu0 %v8336_v41  ;;  %v8381_v1 = vld [vmem:[#allocation15 + $0x668] ss:$28 sps:$4 sm:$0xff]  }
 0x515   :  { %6406 = vmatprep.subr.bf16.mxu1 %v8341_v42  ;;  %6459 = vmatprep.subr.bf16.mxu0 %v8344_v4  ;;  %v8384_v41 = vld [vmem:[#allocation15 + $0x9e8] ss:$28 sps:$4 sm:$0xff]   ;;  %v9187_v42 = vpop.f32.mrf.mxu0  ;;  %v8389_v4 = vld [vmem:[#allocation15 + $0x634] ss:$28 sps:$4 sm:$0xff]  }
 0x518   :  { %6407 = vmatpush1.bf16.msra.mxu1 %v8339_v11  ;;  %6460 = vmatpush1.bf16.msra.mxu0 %v8342_v5  ;;  %v8392_v11 = vld [vmem:[#allocation15 + $0x9b4] ss:$28 sps:$4 sm:$0xff]   ;;  %v9189_v5 = vpop.f32.mrf.mxu1 }
 0x519   :  { %6408 = vmatprep.subr.bf16.mxu1 %v8347_v6  ;;  %6461 = vmatprep.subr.bf16.mxu0 %v8350_v7  ;;  %v8387_v6 = vld [vmem:[#allocation15 + $0x630] ss:$28 sps:$4 sm:$0xff]  }
 0x51a   :  { %v8390_v7 = vld [vmem:[#allocation15 + $0x9b0] ss:$28 sps:$4 sm:$0xff]  }
 0x51c   :  { %6409 = vmatpush1.bf16.msra.mxu1 %v8345_v9  ;;  %6462 = vmatpush1.bf16.msra.mxu0 %v8348_v10  ;;  %v9191_v9 = vpop.f32.mrf.mxu0  ;;  %v8395_v10 = vld [vmem:[#allocation15 + $0x5fc] ss:$28 sps:$4 sm:$0xff]  }
 0x51d   :  { %6410 = vmatprep.subr.bf16.mxu1 %v8353_v19  ;;  %6463 = vmatprep.subr.bf16.mxu0 %v8356_v3  ;;  %v8398_v19 = vld [vmem:[#allocation15 + $0x97c] ss:$28 sps:$4 sm:$0xff]   ;;  %v9193_v3 = vpop.f32.mrf.mxu1 }
 0x520   :  { %6411 = vmatpush1.bf16.msra.mxu1 %v8351_v27  ;;  %6464 = vmatpush1.bf16.msra.mxu0 %v8354_v28  ;;  %v6063_v27 = vpop.f32.mrf.mxu0  ;;  %v8393_v28 = vld [vmem:[#allocation15 + $0x5f8] ss:$28 sps:$4 sm:$0xff]  }
 0x521   :  { %6412 = vmatprep.subr.bf16.mxu1 %v8359_v13  ;;  %6465 = vmatprep.subr.bf16.mxu0 %v8362_v43  ;;  %v8396_v13 = vld [vmem:[#allocation15 + $0x978] ss:$28 sps:$4 sm:$0xff]   ;;  %v8401_v43 = vld [vmem:[#allocation15 + $0x5c4] ss:$28 sps:$4 sm:$0xff]  }
 0x524   :  { %6413 = vmatpush1.bf16.msra.mxu1 %v8357_v49  ;;  %6466 = vmatpush1.bf16.msra.mxu0 %v8360_v37  ;;  %v8404_v49 = vld [vmem:[#allocation15 + $0x944] ss:$28 sps:$4 sm:$0xff]   ;;  %v9195_v37 = vpop.f32.mrf.mxu1 }
 0x525   :  { %6414 = vmatprep.subr.bf16.mxu1 %v8365_v34  ;;  %6467 = vmatprep.subr.bf16.mxu0 %v8368_v29  ;;  %v6065_v34 = vpop.f32.mrf.mxu0  ;;  %v8399_v29 = vld [vmem:[#allocation15 + $0x5c0] ss:$28 sps:$4 sm:$0xff]  }
 0x528   :  { %6415 = vmatpush1.bf16.msra.mxu1 %v8363_v14  ;;  %6468 = vmatpush1.bf16.msra.mxu0 %v8366_v50  ;;  %v8402_v14 = vld [vmem:[#allocation15 + $0x940] ss:$28 sps:$4 sm:$0xff]  }
 0x529   :  { %6416 = vmatprep.subr.bf16.mxu1 %v8371_v46  ;;  %6469 = vmatprep.subr.bf16.mxu0 %v8374_v31  ;;  %v9197_v50 = vld [vmem:[#allocation16] sm:$0xff]  ;;  %v8407_v46 = vld [vmem:[#allocation15 + $0x58c] ss:$28 sps:$4 sm:$0xff]  }
 0x52a   :  { %v8410_v31 = vld [vmem:[#allocation15 + $0x90c] ss:$28 sps:$4 sm:$0xff]  }
 0x52c   :  { %6417 = vmatpush2.bf16.msra.mxu1 %v8369_v52  ;;  %6470 = vmatpush2.bf16.msra.mxu0 %v8372_v56  ;;  %v9199_v52 = vpop.f32.mrf.mxu1  ;;  %v6067_v56 = vpop.f32.mrf.mxu0 }
 0x52d   :  { %6418 = vmatprep.subr.bf16.mxu1 %v8377_v25  ;;  %6471 = vmatprep.subr.bf16.mxu0 %v8380_v15  ;;  %v9203_v25 = vrot.slane %v9197_v50, %v8929_v55  ;;  %v8405_v15 = vld [vmem:[#allocation15 + $0x588] ss:$28 sps:$4 sm:$0xff]   ;;  %v8411_v55 = vld [vmem:[#allocation15 + $0x550] ss:$28 sps:$4 sm:$0xff]  }
 0x530   :  { %6419 = vmatpush2.bf16.msra.mxu1 %v8375_v17  ;;  %6472 = vmatpush2.bf16.msra.mxu0 %v8378_v33  ;;  %v8408_v17 = vld [vmem:[#allocation15 + $0x908] ss:$28 sps:$4 sm:$0xff]   ;;  %v8413_v33 = vld [vmem:[#allocation15 + $0x554] ss:$28 sps:$4 sm:$0xff]  }
 0x531   :  { %6420 = vmatprep.subr.bf16.mxu1 %v8383_v40  ;;  %6473 = vmatprep.subr.bf16.mxu0 %v8386_v44  ;;  %v8416_v40 = vld [vmem:[#allocation15 + $0x8d4] ss:$28 sps:$4 sm:$0xff]   ;;  %v9207_v44 = vrot.slane %v9197_v50, %v8926_v54 }
 0x534   :  { %6421 = vmatpush2.bf16.msra.mxu1 %v8381_v1  ;;  %6474 = vmatpush2.bf16.msra.mxu0 %v8384_v41  ;;  %v9209_v1 = vpop.f32.mrf.mxu1  ;;  %v6069_v41 = vpop.f32.mrf.mxu0 }
 0x535   :  { %6422 = vmatprep.subr.bf16.mxu1 %v8389_v4  ;;  %6475 = vmatprep.subr.bf16.mxu0 %v8392_v11  ;;  %v5958_v4 = vadd.f32 %v9171_v12, %v9203_v25  ;;  %v8414_v11 = vld [vmem:[#allocation15 + $0x8d0] ss:$28 sps:$4 sm:$0xff]  }
 0x537   :  { %v6011_v54 = vadd.f32 %v9181_v16, %v5958_v4  ;;  %v8426_v4 = vld [vmem:[#allocation15 + $0x168] ss:$28 sps:$4 sm:$0xff]  }
 0x538   :  { %6423 = vmatpush2.bf16.msra.mxu1 %v8387_v6  ;;  %6476 = vmatpush2.bf16.msra.mxu0 %v8390_v7  ;;  %v8419_v6 = vld [vmem:[#allocation15 + $0xc1c] ss:$28 sps:$4 sm:$0xff]  }
 0x539   :  { %6424 = vmatprep.subr.bf16.mxu1 %v8395_v10  ;;  %6477 = vmatprep.subr.bf16.mxu0 %v8398_v19  ;;  %v8420_v7 = vld [vmem:[#allocation15 + $0x360] ss:$28 sps:$4 sm:$0xff]   ;;  %v5960_v10 = vadd.f32 %v9173_v35, %v9207_v44  ;;  %v9216_v19 = vpop.f32.mrf.mxu1  ;;  %v5964_v35 = vadd.f32 %v9177_v51, %v9207_v44 }
 0x53b   :  { %v6013_v12 = vadd.f32 %v9185_v26, %v5960_v10 }
 0x53c   :  { %6425 = vmatpush2.bf16.msra.mxu1 %v8393_v28  ;;  %6478 = vmatpush2.bf16.msra.mxu0 %v8396_v13  ;;  %v6073_v28 = vpop.f32.mrf.mxu0  ;;  %v5962_v13 = vadd.f32 %v9175_v47, %v9203_v25  ;;  %v5968_v47 = vadd.f32 %v9179_v57, %v9203_v25  ;;  %v8422_v57 = vld [vmem:[#allocation15 + $0xbe0] ss:$28 sps:$4 sm:$0xff]  }
 0x53d   :  { %6426 = vmatprep.subr.bf16.mxu1 %v8401_v43  ;;  %6479 = vmatprep.subr.bf16.mxu0 %v8404_v49  ;;  %v6064_v43 = vadd.f32 %v6063_v27, %v6011_v54  ;;  %v8417_v49 = vld [vmem:[#allocation15 + $0xc18] ss:$28 sps:$4 sm:$0xff]  }
 0x53e   :  { %v6015_v16 = vadd.f32 %v9189_v5, %v5962_v13  ;;  %v6075_v26 = vpop.f32.mrf.mxu0  ;;  %v5970_v5 = vadd.f32 %v9183_v0, %v9207_v44 }
 0x540   :  { %6427 = vmatpush2.bf16.msra.mxu1 %v8399_v29  ;;  %6480 = vmatpush2.bf16.msra.mxu0 %v8402_v14  ;;  %v8421_v14 = vld [vmem:[#allocation15 + $0x1a0] ss:$28 sps:$4 sm:$0xff]   ;;  %v6077_v10 = vpop.f32.mrf.mxu0  ;;  %v6023_v0 = vadd.f32 %v9199_v52, %v5970_v5  ;;  %v8435_v52 = vld [vmem:[#allocation15 + $0x2b8] ss:$28 sps:$4 sm:$0xff]   ;;  %v8445_v5 = vld [vmem:[#allocation15 + $0x248] ss:$28 sps:$4 sm:$0xff]  }
 0x541   :  { %6428 = vmatprep.subr.bf16.mxu1 %v8407_v46  ;;  %6481 = vmatprep.subr.bf16.mxu0 %v8410_v31  ;;  %v6066_v46 = vadd.f32 %v6065_v34, %v6013_v12 }
 0x544   :  { %6429 = vmatpush2.bf16.msra.mxu1 %v8405_v15  ;;  %6482 = vmatpush2.bf16.msra.mxu0 %v8408_v17  ;;  %v8424_v15 = vld [vmem:[#allocation15 + $0xbe4] ss:$28 sps:$4 sm:$0xff]  }
 0x545   :  { %6430 = vmatprep.subr.bf16.mxu1 %v8413_v33  ;;  %6483 = vmatprep.subr.bf16.mxu0 %v8416_v40  ;;  %v8425_v17 = vld [vmem:[#allocation15 + $0x328] ss:$28 sps:$4 sm:$0xff]   ;;  %v6017_v33 = vadd.f32 %v9193_v3, %v5964_v35  ;;  %v6068_v40 = vadd.f32 %v6067_v56, %v6015_v16  ;;  %v8432_v16 = vld [vmem:[#allocation15 + $0xb70] ss:$28 sps:$4 sm:$0xff]  }
 0x546   :  { %v8429_v56 = vld [vmem:[#allocation15 + $0xbac] ss:$28 sps:$4 sm:$0xff]  }
 0x548   :  { %6431 = vmatpush2.bf16.msra.mxu1 %v8411_v55  ;;  %6484 = vmatpush2.bf16.msra.mxu0 %v8414_v11  ;;  %v6021_v55 = vadd.f32 %v9195_v37, %v5968_v47  ;;  %v6070_v11 = vadd.f32 %v6069_v41, %v6017_v33  ;;  %v5974_v37 = vadd.f32 %v9191_v9, %v9207_v44  ;;  %v8427_v41 = vld [vmem:[#allocation15 + $0xba8] ss:$28 sps:$4 sm:$0xff]   ;;  %v8439_v47 = vld [vmem:[#allocation15 + $0xb3c] ss:$28 sps:$4 sm:$0xff]  }
 0x549   :  { %6506 = vmatprep.subr.bf16.mxu1 %v8419_v6  ;;  %7612 = vmatprep.subr.bf16.mxu0 %v8420_v7  ;;  %v6116_v29 = vpop.f32.mrf.mxu1  ;;  %v8430_v6 = vld [vmem:[#allocation15 + $0x2f0] ss:$28 sps:$4 sm:$0xff]   ;;  %v5972_v7 = vadd.f32 %v9187_v42, %v9203_v25 }
 0x54a   :  { %v6117_v31 = vadd.f32 %v6116_v29, %v6064_v43  ;;  %v6074_v13 = vadd.f32 %v6073_v28, %v6021_v55  ;;  %v8434_v25 = vld [vmem:[#allocation15 + $0xb74] ss:$28 sps:$4 sm:$0xff]   ;;  %v6079_v28 = vpop.f32.mrf.mxu0  ;;  %v6027_v44 = vadd.f32 %v9216_v19, %v5974_v37  ;;  %v8446_v55 = vld [vmem:[#allocation15 + $0x88] ss:$28 sps:$4 sm:$0xff]  }
 0x54b   :  { %6433 = vmatmul.mubr.bf16.vlgmr.msra.gmra.mxu1 %v9101_v30  ;;  %6486 = vmatmul.mubr.bf16.vlgmr.msra.gmra.mxu0 %v9121_v48  ;;  %v6118_v27 = vpop.f32.mrf.mxu1  ;;  %v6025_v29 = vadd.f32 %v9209_v1, %v5972_v7  ;;  %v8447_v7 = vld [vmem:[#allocation15 + $0xac8] ss:$28 sps:$4 sm:$0xff]   ;;  %v8452_v37 = vld [vmem:[#allocation15 + $0xa90] ss:$28 sps:$4 sm:$0xff]  }
 0x54c   :  { %8529 = vtanh.f32 %v6117_v31  ;;  %6442 = vmatprep.mubr.bf16.mxu1 %v9105_v45  ;;  %6495 = vmatprep.mubr.bf16.mxu0 %v9125_v59  ;;  %v6119_v51 = vadd.f32 %v6118_v27, %v6066_v46  ;;  %v8436_v31 = vld [vmem:[#allocation15 + $0xf8] ss:$28 sps:$4 sm:$0xff]  }
 0x54d   :  { %6507 = vmatpush1.bf16.msra.mxu1 %v8417_v49  ;;  %7613 = vmatpush3.bf16.msra.mxu0 %v8421_v14  ;;  %v6120_v34 = vpop.f32.mrf.mxu1  ;;  %v8431_v49 = vld [vmem:[#allocation15 + $0x130] ss:$28 sps:$4 sm:$0xff]   ;;  %v6076_v14 = vadd.f32 %v6075_v26, %v6023_v0  ;;  %v6078_v35 = vadd.f32 %v6077_v10, %v6025_v29  ;;  %v8440_v26 = vld [vmem:[#allocation15 + $0x280] ss:$28 sps:$4 sm:$0xff]   ;;  %v8455_v0 = vld [vmem:[#allocation15 + $0x1d8] ss:$28 sps:$4 sm:$0xff]  }
 0x54e   :  { %8531 = vtanh.f32 %v6119_v51  ;;  %6508 = vmatprep.subr.bf16.mxu1 %v8424_v15  ;;  %7614 = vmatprep.subr.bf16.mxu0 %v8425_v17  ;;  %v6121_v3 = vadd.f32 %v6120_v34, %v6068_v40  ;;  %v6080_v15 = vadd.f32 %v6079_v28, %v6027_v44  ;;  %v8441_v40 = vld [vmem:[#allocation15 + $0xc0] ss:$28 sps:$4 sm:$0xff]   ;;  %v8451_v10 = vld [vmem:[#allocation15 + $0x50] ss:$28 sps:$4 sm:$0xff]  }
 0x54f   :  { %v6122_v54 = vpop.f32.mrf.mxu1  ;;  %v8444_v51 = vld [vmem:[#allocation15 + $0xb04] ss:$28 sps:$4 sm:$0xff]   ;;  %v8469_v44 = vld [vmem:[#allocation15 + $0xd6c] ss:$28 sps:$4 sm:$0xff]  }
 0x550   :  { %8533 = vtanh.f32 %v6121_v3  ;;  %v6123_v12 = vadd.f32 %v6122_v54, %v6070_v11  ;;  %v8449_v11 = vld [vmem:[#allocation15 + $0xacc] ss:$28 sps:$4 sm:$0xff]   ;;  %v8454_v54 = vld [vmem:[#allocation15 + $0xa94] ss:$28 sps:$4 sm:$0xff]   ;;  %v8462_v28 = vld [vmem:[#allocation15 + $0xda0] ss:$28 sps:$4 sm:$0xff]  }
 0x551   :  { %6509 = vmatpush1.bf16.msra.mxu1 %v8422_v57  ;;  %7615 = vmatpush3.bf16.msra.mxu0 %v8426_v4  ;;  %v6126_v43 = vpop.f32.mrf.mxu1  ;;  %v8442_v4 = vld [vmem:[#allocation15 + $0xb00] ss:$28 sps:$4 sm:$0xff]   ;;  %v8450_v3 = vld [vmem:[#allocation15 + $0x210] ss:$28 sps:$4 sm:$0xff]  }
 0x552   :  { %8535 = vtanh.f32 %v6123_v12  ;;  %6510 = vmatprep.subr.bf16.mxu1 %v8429_v56  ;;  %7616 = vmatprep.subr.bf16.mxu0 %v8430_v6  ;;  %v6127_v42 = vadd.f32 %v6126_v43, %v6074_v13  ;;  %v8459_v43 = vld [vmem:[#allocation15 + $0xddc] ss:$28 sps:$4 sm:$0xff]  }
 0x553   :  { %6443 = vmatmul.mubr.bf16.gmra.mxu1 %v9107_v36  ;;  %6496 = vmatmul.mubr.bf16.gmra.mxu0 %v9127_v61  ;;  %v6128_v9 = vpop.f32.mrf.mxu1 }
 0x554   :  { %8537 = vtanh.f32 %v6127_v42  ;;  %6538 = vmatprep.mubr.bf16.mxu1 %v9138_v21  ;;  %6591 = vmatprep.mubr.bf16.mxu0 %v9057_v60  ;;  %v6129_v1 = vadd.f32 %v6128_v9, %v6076_v14  ;;  %v8437_v60 = vld [vmem:[#allocation15 + $0xb38] ss:$28 sps:$4 sm:$0xff]   ;;  %v8461_v42 = vld [vmem:[#allocation15 + $0x8a0] ss:$28 sps:$4 sm:$0xff]   ;;  %v8466_v9 = vld [vmem:[#allocation15 + $0x868] ss:$28 sps:$4 sm:$0xff]  }
 0x555   :  { %6511 = vmatpush1.bf16.msra.mxu1 %v8427_v41  ;;  %7617 = vmatpush3.bf16.msra.mxu0 %v8431_v49  ;;  %v6130_v46 = vpop.f32.mrf.mxu1  ;;  %v8456_v41 = vld [vmem:[#allocation15 + $0x18] ss:$28 sps:$4 sm:$0xff]   ;;  %v8460_v49 = vld [vmem:[#allocation15 + $0xa60] ss:$28 sps:$4 sm:$0xff]  }
 0x556   :  { %8539 = vtanh.f32 %v6129_v1  ;;  %6512 = vmatprep.subr.bf16.mxu1 %v8434_v25  ;;  %7618 = vmatprep.subr.bf16.mxu0 %v8435_v52  ;;  %v6131_v17 = vadd.f32 %v6130_v46, %v6078_v35  ;;  %v8457_v14 = vld [vmem:[#allocation15 + $0xdd8] ss:$28 sps:$4 sm:$0xff]   ;;  %v8464_v25 = vld [vmem:[#allocation15 + $0xda4] ss:$28 sps:$4 sm:$0xff]   ;;  %v8470_v35 = vld [vmem:[#allocation15 + $0x9f0] ss:$28 sps:$4 sm:$0xff]  }
 0x557   :  { %v6132_v19 = vpop.f32.mrf.mxu1  ;;  %v8465_v52 = vld [vmem:[#allocation15 + $0xa28] ss:$28 sps:$4 sm:$0xff]   ;;  %v8474_v46 = vld [vmem:[#allocation15 + $0xd34] ss:$28 sps:$4 sm:$0xff]  }
 0x558   :  { %8541 = vtanh.f32 %v6131_v17  ;;  %v6133_v27 = vadd.f32 %v6132_v19, %v6080_v15  ;;  %v8467_v1 = vld [vmem:[#allocation15 + $0xd68] ss:$28 sps:$4 sm:$0xff]   ;;  %v8479_v15 = vld [vmem:[#allocation15 + $0xcfc] ss:$28 sps:$4 sm:$0xff]  }
 0x559   :  { %v8530_v33 = vpop.eup %8529  ;;  %6513 = vmatpush1.bf16.msra.mxu1 %v8432_v16  ;;  %7619 = vmatpush3.bf16.msra.mxu0 %v8436_v31  ;;  %v8471_v16 = vld [vmem:[#allocation15 + $0x830] ss:$28 sps:$4 sm:$0xff]   ;;  %v8475_v31 = vld [vmem:[#allocation15 + $0x9b8] ss:$28 sps:$4 sm:$0xff]   ;;  %v8480_v17 = vld [vmem:[#allocation15 + $0x980] ss:$28 sps:$4 sm:$0xff]  }
 0x55a   :  { %6783 = vst [vmem:[%s9425_s11] sm:$0xff] %v8530_v33  ;;  %8543 = vtanh.f32 %v6133_v27  ;;  %6514 = vmatprep.subr.bf16.mxu1 %v8439_v47  ;;  %7620 = vmatprep.subr.bf16.mxu0 %v8440_v26  ;;  %v8477_v47 = vld [vmem:[#allocation15 + $0xcf8] ss:$28 sps:$4 sm:$0xff]   ;;  %v8481_v26 = vld [vmem:[#allocation15 + $0x7c0] ss:$28 sps:$4 sm:$0xff]   ;;  %v8485_v27 = vld [vmem:[#allocation15 + $0x948] ss:$28 sps:$4 sm:$0xff]  }
 0x55b   :  { %v8532_v57 = vpop.eup %8531  ;;  %v8484_v19 = vld [vmem:[#allocation15 + $0xcc4] ss:$28 sps:$4 sm:$0xff]   ;;  %v8489_v33 = vld [vmem:[#allocation15 + $0xc8c] ss:$28 sps:$4 sm:$0xff]  }
 0x55c   :  { %6784 = vst [vmem:[%s9425_s11 + $0x8] sm:$0xff] %v8532_v57  ;;  %v8495_v57 = vld [vmem:[#allocation15 + $0x8d8] ss:$28 sps:$4 sm:$0xff]  }
 0x55d   :  { %v8534_v34 = vpop.eup %8533  ;;  %6515 = vmatpush1.bf16.msra.mxu1 %v8437_v60  ;;  %7621 = vmatpush3.bf16.msra.mxu0 %v8441_v40  ;;  %v8490_v60 = vld [vmem:[#allocation15 + $0x910] ss:$28 sps:$4 sm:$0xff]   ;;  %v8487_v40 = vld [vmem:[#allocation15 + $0xc88] ss:$28 sps:$4 sm:$0xff]  }
 0x55e   :  { %6790 = vst [vmem:[%s9425_s11 + $0x38] sm:$0xff] %v8534_v34  ;;  %6516 = vmatprep.subr.bf16.mxu1 %v8444_v51  ;;  %7622 = vmatprep.subr.bf16.mxu0 %v8445_v5  ;;  %v8491_v51 = vld [vmem:[#allocation15 + $0x750] ss:$28 sps:$4 sm:$0xff]  }
 0x55f   :  { %v8536_v56 = vpop.eup %8535  ;;  %v8494_v5 = vld [vmem:[#allocation15 + $0xc54] ss:$28 sps:$4 sm:$0xff]  }
 0x560   :  { %6791 = vst [vmem:[%s9425_s11 + $0x40] sm:$0xff] %v8536_v56  ;;  %v8492_v34 = vld [vmem:[#allocation15 + $0xc50] ss:$28 sps:$4 sm:$0xff]   ;;  %v9276_v56 = vld [vmem:[#allocation15 + $0xc20] ss:$28 sps:$4 sm:$0xff]  }
 0x561   :  { %v8538_v6 = vpop.eup %8537  ;;  %6517 = vmatpush1.bf16.msra.mxu1 %v8442_v4  ;;  %7623 = vmatpush3.bf16.msra.mxu0 %v8446_v55  ;;  %v8496_v4 = vld [vmem:[#allocation15 + $0x718] ss:$28 sps:$4 sm:$0xff]   ;;  %v8497_v55 = vld [vmem:[#allocation15 + $0x6e0] ss:$28 sps:$4 sm:$0xff]  }
 0x562   :  { %6797 = vst [vmem:[%s9425_s11 + $0x70] sm:$0xff] %v8538_v6  ;;  %6518 = vmatprep.subr.bf16.mxu1 %v8449_v11  ;;  %7624 = vmatprep.subr.bf16.mxu0 %v8450_v3  ;;  %v9273_v11 = vld [vmem:[#allocation15 + $0xde0] ss:$28 sps:$4 sm:$0xff]   ;;  %v8501_v6 = vld [vmem:[#allocation15 + $0x6a8] ss:$28 sps:$4 sm:$0xff]  }
 0x563   :  { %v8540_v13 = vpop.eup %8539  ;;  %v8499_v3 = vld [vmem:[#allocation15 + $0x520] ss:$28 sps:$4 sm:$0xff]  }
 0x564   :  { %6798 = vst [vmem:[%s9425_s11 + $0x78] sm:$0xff] %v8540_v13  ;;  %v9288_v13 = vld [vmem:[#allocation15 + $0xd70] ss:$28 sps:$4 sm:$0xff]  }
 0x565   :  { %v8542_v12 = vpop.eup %8541  ;;  %6519 = vmatpush1.bf16.msra.mxu1 %v8447_v7  ;;  %7625 = vmatpush3.bf16.msra.mxu0 %v8451_v10  ;;  %v9279_v7 = vld [vmem:[#allocation15 + $0xda8] ss:$28 sps:$4 sm:$0xff]  }
 0x566   :  { %6804 = vst [vmem:[%s9425_s11 + $0xa8] sm:$0xff] %v8542_v12  ;;  %6520 = vmatprep.subr.bf16.mxu1 %v8454_v54  ;;  %7626 = vmatprep.subr.bf16.mxu0 %v8455_v0  ;;  %v8503_v10 = vld [vmem:[#allocation15 + $0x4e8] ss:$28 sps:$4 sm:$0xff]   ;;  %v8505_v0 = vld [vmem:[#allocation15 + $0x670] ss:$28 sps:$4 sm:$0xff]  }
 0x567   :  { %v8544_v29 = vpop.eup %8543  ;;  %v9285_v54 = vld [vmem:[#allocation15 + $0xbe8] ss:$28 sps:$4 sm:$0xff]   ;;  %v8507_v12 = vld [vmem:[#allocation15 + $0x4b0] ss:$28 sps:$4 sm:$0xff]  }
 0x568   :  { %6805 = vst [vmem:[%s9425_s11 + $0xb0] sm:$0xff] %v8544_v29  ;;  %v8514_v29 = vld [vmem:[#allocation15 + $0xd00] ss:$28 sps:$4 sm:$0xff]  }
 0x569   :  { %6521 = vmatpush1.bf16.msra.mxu1 %v8452_v37  ;;  %7627 = vmatpush3.bf16.msra.mxu0 %v8456_v41  ;;  %v8509_v37 = vld [vmem:[#allocation15 + $0x638] ss:$28 sps:$4 sm:$0xff]  }
 0x56a   :  { %6522 = vmatprep.subr.bf16.mxu1 %v8459_v43  ;;  %7668 = vmatprep.subr.bf16.mxu0 %v8460_v49  ;;  %v8511_v41 = vld [vmem:[#allocation15 + $0x478] ss:$28 sps:$4 sm:$0xff]   ;;  %v8513_v49 = vld [vmem:[#allocation15 + $0x600] ss:$28 sps:$4 sm:$0xff]  }
 0x56b   :  { %v8512_v43 = vld [vmem:[#allocation15 + $0xb78] ss:$28 sps:$4 sm:$0xff]  }
 0x56c   :  { %6592 = vmatmul.mubr.bf16.vlgmr.msra.gmra.mxu0 %v9082_v18  ;;  %v8472_v18 = vld [vmem:[#allocation15 + $0xd30] ss:$28 sps:$4 sm:$0xff]  }
 0x56d   :  { %6523 = vmatpush2.bf16.msra.mxu1 %v8457_v14  ;;  %6599 = vmatprep.mubr.bf16.mxu0 %v9084_v22  ;;  %v8476_v22 = vld [vmem:[#allocation15 + $0x7f8] ss:$28 sps:$4 sm:$0xff]   ;;  %v8515_v14 = vld [vmem:[#allocation15 + $0x440] ss:$28 sps:$4 sm:$0xff]  }
 0x56e   :  { %7669 = vmatpush3.bf16.msra.mxu0 %v8461_v42  ;;  %6524 = vmatprep.subr.bf16.mxu1 %v8464_v25  ;;  %v8516_v42 = vld [vmem:[#allocation15 + $0xb40] ss:$28 sps:$4 sm:$0xff]   ;;  %v6169_v25 = vpop.f32.mrf.mxu0 }
 0x56f   :  { %7670 = vmatprep.subr.bf16.mxu0 %v8465_v52  ;;  %v8520_v52 = vld [vmem:[#allocation15 + $0xb08] ss:$28 sps:$4 sm:$0xff]  }
 0x571   :  { %6525 = vmatpush2.bf16.msra.mxu1 %v8462_v28  ;;  %v8521_v28 = vld [vmem:[#allocation15 + $0x590] ss:$28 sps:$4 sm:$0xff]  }
 0x572   :  { %7671 = vmatpush3.bf16.msra.mxu0 %v8466_v9  ;;  %6526 = vmatprep.subr.bf16.mxu1 %v8469_v44  ;;  %v6171_v9 = vpop.f32.mrf.mxu0  ;;  %v8522_v44 = vld [vmem:[#allocation15 + $0xc90] ss:$28 sps:$4 sm:$0xff]  }
 0x573   :  { %7672 = vmatprep.subr.bf16.mxu0 %v8470_v35  ;;  %v8523_v35 = vld [vmem:[#allocation15 + $0x3d0] ss:$28 sps:$4 sm:$0xff]  }
 0x574   :  { %6600 = vmatmul.mubr.bf16.gmra.mxu0 %v9092_v58  ;;  %v8482_v58 = vld [vmem:[#allocation15 + $0xcc0] ss:$28 sps:$4 sm:$0xff]  }
 0x575   :  { %6527 = vmatpush2.bf16.msra.mxu1 %v8467_v1  ;;  %6689 = vmatprep.mubr.bf16.mxu0 %v9119_v24  ;;  %v8486_v24 = vld [vmem:[#allocation15 + $0x788] ss:$28 sps:$4 sm:$0xff]   ;;  %v8524_v1 = vld [vmem:[#allocation15 + $0xad0] ss:$28 sps:$4 sm:$0xff]  }
 0x576   :  { %7673 = vmatpush3.bf16.msra.mxu0 %v8471_v16  ;;  %6528 = vmatprep.subr.bf16.mxu1 %v8474_v46  ;;  %v8525_v16 = vld [vmem:[#allocation15 + $0x558] ss:$28 sps:$4 sm:$0xff]   ;;  %v6173_v46 = vpop.f32.mrf.mxu0 }
 0x577   :  { %7674 = vmatprep.subr.bf16.mxu0 %v8475_v31  ;;  %v8526_v31 = vld [vmem:[#allocation15 + $0xc58] ss:$28 sps:$4 sm:$0xff]  }
 0x579   :  { %6529 = vmatpush2.bf16.msra.mxu1 %v8472_v18  ;;  %v8527_v18 = vld [vmem:[#allocation15 + $0x398] ss:$28 sps:$4 sm:$0xff]  }
 0x57a   :  { %7675 = vmatpush3.bf16.msra.mxu0 %v8476_v22  ;;  %6530 = vmatprep.subr.bf16.mxu1 %v8479_v15  ;;  %v8528_v22 = vld [vmem:[#allocation15 + $0xa98] ss:$28 sps:$4 sm:$0xff]   ;;  %v6175_v15 = vpop.f32.mrf.mxu0 }
 0x57b   :  { %7676 = vmatprep.subr.bf16.mxu0 %v8480_v17 }
 0x57c   :  { %v6179_v17 = vpop.f32.mrf.mxu0 }
 0x57d   :  { %6531 = vmatpush2.bf16.msra.mxu1 %v8477_v47 }
 0x57e   :  { %7677 = vmatpush3.bf16.msra.mxu0 %v8481_v26  ;;  %6532 = vmatprep.subr.bf16.mxu1 %v8484_v19  ;;  %v6181_v26 = vpop.f32.mrf.mxu0 }
 0x57f   :  { %7678 = vmatprep.subr.bf16.mxu0 %v8485_v27 }
 0x580   :  { %v6183_v27 = vpop.f32.mrf.mxu0 }
 0x581   :  { %6533 = vmatpush2.bf16.msra.mxu1 %v8482_v58 }
 0x582   :  { %7679 = vmatpush3.bf16.msra.mxu0 %v8486_v24  ;;  %6534 = vmatprep.subr.bf16.mxu1 %v8489_v33 }
 0x583   :  { %7680 = vmatprep.subr.bf16.mxu0 %v8490_v60  ;;  %v3595_v60 = vrot.slane %v9197_v50, %v8953_v39 }
 0x585   :  { %6535 = vmatpush2.bf16.msra.mxu1 %v8487_v40 }
 0x586   :  { %7681 = vmatpush3.bf16.msra.mxu0 %v8491_v51  ;;  %6536 = vmatprep.subr.bf16.mxu1 %v8494_v5  ;;  %v6170_v51 = vadd.f32 %v6169_v25, %v3595_v60 }
 0x587   :  { %7682 = vmatprep.subr.bf16.mxu0 %v8495_v57 }
 0x589   :  { %6537 = vmatpush2.bf16.msra.mxu1 %v8492_v34  ;;  %v6222_v47 = vpop.f32.mrf.mxu1 }
 0x58a   :  { %7683 = vmatpush3.bf16.msra.mxu0 %v8496_v4  ;;  %7640 = vmatprep.subr.bf16.mxu1 %v8497_v55  ;;  %v6223_v34 = vadd.f32 %v6222_v47, %v6170_v51  ;;  %v6174_v55 = vadd.f32 %v6173_v46, %v3595_v60 }
 0x58b   :  { %7696 = vmatprep.subr.bf16.mxu0 %v9273_v11  ;;  %v6224_v19 = vpop.f32.mrf.mxu1 }
 0x58c   :  { %6539 = vmatmul.mubr.bf16.vlgmr.msra.gmra.mxu1 %v9140_v32 }
 0x58d   :  { %6690 = vmatmul.mubr.bf16.vlgmr.msra.gmra.mxu0 %v9121_v48  ;;  %6548 = vmatprep.mubr.bf16.mxu1 %v9146_v62  ;;  %v9291_v48 = vld [vmem:[#allocation15 + $0xbb0] ss:$28 sps:$4 sm:$0xff]   ;;  %v6226_v58 = vpop.f32.mrf.mxu1 }
 0x58e   :  { %7641 = vmatpush3.bf16.msra.mxu1 %v8499_v3  ;;  %6697 = vmatprep.mubr.bf16.mxu0 %v9125_v59  ;;  %v9295_v59 = vld [vmem:[#allocation15 + $0xd38] ss:$28 sps:$4 sm:$0xff]  }
 0x58f   :  { %7697 = vmatpush3.bf16.msra.mxu0 %v9276_v56  ;;  %7642 = vmatprep.subr.bf16.mxu1 %v8501_v6  ;;  %v6227_v6 = vadd.f32 %v6226_v58, %v6174_v55 }
 0x590   :  { %7698 = vmatprep.subr.bf16.mxu0 %v9279_v7 }
 0x592   :  { %7643 = vmatpush3.bf16.msra.mxu1 %v8503_v10 }
 0x593   :  { %7699 = vmatpush3.bf16.msra.mxu0 %v9285_v54  ;;  %7644 = vmatprep.subr.bf16.mxu1 %v8505_v0 }
 0x594   :  { %6549 = vmatmul.mubr.bf16.gmra.mxu1 %v9148_v63  ;;  %7700 = vmatprep.subr.bf16.mxu0 %v9288_v13 }
 0x595   :  { %6698 = vmatmul.mubr.bf16.gmra.mxu0 %v9127_v61  ;;  %6640 = vmatprep.mubr.bf16.mxu1 %v9098_v2  ;;  %v8517_v61 = vld [vmem:[#allocation15 + $0x5c8] ss:$28 sps:$4 sm:$0xff]  }
 0x596   :  { %7645 = vmatpush3.bf16.msra.mxu1 %v8507_v12  ;;  %6738 = vmatprep.mubr.bf16.mxu0 %v9138_v21  ;;  %v8518_v2 = vld [vmem:[#allocation15 + $0xcc8] ss:$28 sps:$4 sm:$0xff]  }
 0x597   :  { %7701 = vmatpush3.bf16.msra.mxu0 %v9291_v48  ;;  %7646 = vmatprep.subr.bf16.mxu1 %v8509_v37  ;;  %v8519_v21 = vld [vmem:[#allocation15 + $0x408] ss:$28 sps:$4 sm:$0xff]  }
 0x598   :  { %7702 = vmatprep.subr.bf16.mxu0 %v9295_v59 }
 0x59a   :  { %7647 = vmatpush3.bf16.msra.mxu1 %v8511_v41 }
 0x59b   :  { %7703 = vmatpush3.bf16.msra.mxu0 %v8512_v43  ;;  %7648 = vmatprep.subr.bf16.mxu1 %v8513_v49 }
 0x59c   :  { %7704 = vmatprep.subr.bf16.mxu0 %v8514_v29 }
 0x59e   :  { %7649 = vmatpush3.bf16.msra.mxu1 %v8515_v14 }
 0x59f   :  { %7705 = vmatpush3.bf16.msra.mxu0 %v8516_v42  ;;  %7650 = vmatprep.subr.bf16.mxu1 %v8517_v61 }
 0x5a0   :  { %7706 = vmatprep.subr.bf16.mxu0 %v8518_v2 }
 0x5a2   :  { %7651 = vmatpush3.bf16.msra.mxu1 %v8519_v21 }
 0x5a3   :  { %7707 = vmatpush3.bf16.msra.mxu0 %v8520_v52  ;;  %7652 = vmatprep.subr.bf16.mxu1 %v8521_v28 }
 0x5a4   :  { %7708 = vmatprep.subr.bf16.mxu0 %v8522_v44 }
 0x5a6   :  { %7653 = vmatpush3.bf16.msra.mxu1 %v8523_v35 }
 0x5a7   :  { %7709 = vmatpush3.bf16.msra.mxu0 %v8524_v1  ;;  %7654 = vmatprep.subr.bf16.mxu1 %v8525_v16 }
 0x5a8   :  { %7710 = vmatprep.subr.bf16.mxu0 %v8526_v31 }
 0x5aa   :  { %7655 = vmatpush3.bf16.msra.mxu1 %v8527_v18 }
 0x5ab   :  { %7711 = vmatpush3.bf16.msra.mxu0 %v8528_v22  ;;  %7730 = vmatprep.subr.bf16.mxu1 %v9273_v11 }
 0x5ad   :  { %6641 = vmatmul.mubr.bf16.vlgmr.msra.gmra.mxu1 %v9101_v30  ;;  %v6185_v30 = vpop.f32.mrf.mxu0 }
 0x5ae   :  { %6739 = vmatmul.mubr.bf16.vlgmr.msra.gmra.mxu0 %v9140_v32  ;;  %6648 = vmatprep.mubr.bf16.mxu1 %v9105_v45  ;;  %v6228_v45 = vpop.f32.mrf.mxu1 }
 0x5af   :  { %7738 = vmatpush3.bf16.msra.mxu1 %v9276_v56  ;;  %v6275_v32 = vpop.f32.mrf.mxu0 }
 0x5b0   :  { %7731 = vmatprep.subr.bf16.mxu1 %v9279_v7  ;;  %v6232_v24 = vpop.f32.mrf.mxu1  ;;  %v6276_v56 = vadd.f32 %v6275_v32, %v6223_v34 }
 0x5b1   :  { %v6277_v33 = vpop.f32.mrf.mxu0 }
 0x5b2   :  { %v6234_v40 = vpop.f32.mrf.mxu1 }
 0x5b3   :  { %7739 = vmatpush3.bf16.msra.mxu1 %v9285_v54  ;;  %v6180_v54 = vadd.f32 %v6179_v17, %v3595_v60 }
 0x5b4   :  { %7732 = vmatprep.subr.bf16.mxu1 %v9288_v13  ;;  %v6236_v5 = vpop.f32.mrf.mxu1 }
 0x5b5   :  { %6649 = vmatmul.mubr.bf16.gmra.mxu1 %v9107_v36  ;;  %v3599_v36 = vrot.slane %v9197_v50, %v8950_v38 }
 0x5b6   :  { %6746 = vmatprep.mubr.bf16.mxu1 %v9146_v62  ;;  %v6279_v62 = vpop.f32.mrf.mxu0  ;;  %v6238_v3 = vpop.f32.mrf.mxu1 }
 0x5b7   :  { %7740 = vmatpush3.bf16.msra.mxu1 %v9291_v48  ;;  %v6172_v57 = vadd.f32 %v6171_v9, %v3599_v36  ;;  %v6176_v39 = vadd.f32 %v6175_v15, %v3599_v36  ;;  %v6182_v12 = vadd.f32 %v6181_v26, %v3599_v36  ;;  %v6280_v37 = vadd.f32 %v6279_v62, %v6227_v6 }
 0x5b8   :  { %7733 = vmatprep.subr.bf16.mxu1 %v9295_v59  ;;  %v6281_v4 = vpop.f32.mrf.mxu0  ;;  %v6233_v59 = vadd.f32 %v6232_v24, %v6180_v54  ;;  %v6186_v25 = vadd.f32 %v6185_v30, %v3599_v36 }
 0x5b9   :  { %v6225_v11 = vadd.f32 %v6224_v19, %v6172_v57  ;;  %v6229_v0 = vadd.f32 %v6228_v45, %v6176_v39 }
 0x5ba   :  { %v6285_v7 = vpop.f32.mrf.mxu0 }
 0x5bb   :  { %7741 = vmatpush3.bf16.msra.mxu1 %v8512_v43  ;;  %v6278_v38 = vadd.f32 %v6277_v33, %v6225_v11  ;;  %v6184_v43 = vadd.f32 %v6183_v27, %v3595_v60  ;;  %v6282_v14 = vadd.f32 %v6281_v4, %v6229_v0  ;;  %v6286_v21 = vadd.f32 %v6285_v7, %v6233_v59 }
 0x5bc   :  { %7734 = vmatprep.subr.bf16.mxu1 %v8514_v29  ;;  %v6287_v49 = vpop.f32.mrf.mxu0 }
 0x5be   :  { %v6289_v9 = vpop.f32.mrf.mxu0 }
 0x5bf   :  { %7742 = vmatpush3.bf16.msra.mxu1 %v8516_v42  ;;  %v6235_v42 = vadd.f32 %v6234_v40, %v6182_v12 }
 0x5c0   :  { %7735 = vmatprep.subr.bf16.mxu1 %v8518_v2  ;;  %v6291_v18 = vpop.f32.mrf.mxu0 }
 0x5c1   :  { %v6288_v35 = vadd.f32 %v6287_v49, %v6235_v42 }
 0x5c3   :  { %7743 = vmatpush3.bf16.msra.mxu1 %v8520_v52  ;;  %v6237_v52 = vadd.f32 %v6236_v5, %v6184_v43 }
 0x5c4   :  { %7736 = vmatprep.subr.bf16.mxu1 %v8522_v44 }
 0x5c7   :  { %7744 = vmatpush3.bf16.msra.mxu1 %v8524_v1  ;;  %v6239_v1 = vadd.f32 %v6238_v3, %v6186_v25 }
 0x5c8   :  { %7737 = vmatprep.subr.bf16.mxu1 %v8526_v31  ;;  %v6290_v31 = vadd.f32 %v6289_v9, %v6237_v52 }
 0x5c9   :  { %v6292_v15 = vadd.f32 %v6291_v18, %v6239_v1 }
 0x5ca   :  { %v6328_v10 = vpop.f32.mrf.mxu1  ;;  %v6381_v60 = vpop.f32.mrf.mxu0 }
 0x5cb   :  { %7745 = vmatpush3.bf16.msra.mxu1 %v8528_v22  ;;  %v6329_v13 = vadd.f32 %v6328_v10, %v6276_v56 }
 0x5cc   :  { %v6330_v48 = vpop.f32.mrf.mxu1  ;;  %v6383_v40 = vpop.f32.mrf.mxu0 }
 0x5cd   :  { %8545 = vtanh.f32 %v6329_v13  ;;  %v6331_v41 = vadd.f32 %v6330_v48, %v6278_v38 }
 0x5ce   :  { %6747 = vmatmul.mubr.bf16.vlgmr.msra.gmra.mxu1 %v9148_v63  ;;  %v6332_v29 = vpop.f32.mrf.mxu1  ;;  %v6385_v36 = vpop.f32.mrf.mxu0 }
 0x5cf   :  { %8547 = vtanh.f32 %v6331_v41  ;;  %v6333_v61 = vadd.f32 %v6332_v29, %v6280_v37  ;;  %v3603_v41 = vrot.slane %v9197_v50, %v1264_v20  ;;  %v3607_v29 = vrot.slane %v9197_v50, %v1268_v23 }
 0x5d0   :  { %v6334_v2 = vpop.f32.mrf.mxu1  ;;  %v6387_v62 = vpop.f32.mrf.mxu0 }
 0x5d1   :  { %8549 = vtanh.f32 %v6333_v61  ;;  %v6335_v28 = vadd.f32 %v6334_v2, %v6282_v14  ;;  %v6382_v14 = vadd.f32 %v6381_v60, %v3603_v41  ;;  %v6384_v25 = vadd.f32 %v6383_v40, %v3607_v29 }
 0x5d2   :  { %v6338_v44 = vpop.f32.mrf.mxu1  ;;  %v6391_v51 = vpop.f32.mrf.mxu0 }
 0x5d3   :  { %8551 = vtanh.f32 %v6335_v28  ;;  %v6339_v16 = vadd.f32 %v6338_v44, %v6286_v21  ;;  %v6386_v21 = vadd.f32 %v6385_v36, %v3603_v41  ;;  %v6388_v44 = vadd.f32 %v6387_v62, %v3607_v29 }
 0x5d4   :  { %v6340_v46 = vpop.f32.mrf.mxu1  ;;  %v6393_v5 = vpop.f32.mrf.mxu0 }
 0x5d5   :  { %8553 = vtanh.f32 %v6339_v16  ;;  %v6341_v63 = vadd.f32 %v6340_v46, %v6288_v35  ;;  %v6392_v16 = vadd.f32 %v6391_v51, %v3603_v41  ;;  %v6394_v23 = vadd.f32 %v6393_v5, %v3607_v29 }
 0x5d6   :  { %v6342_v22 = vpop.f32.mrf.mxu1  ;;  %v6395_v57 = vpop.f32.mrf.mxu0 }
 0x5d7   :  { %8555 = vtanh.f32 %v6341_v63  ;;  %v6343_v17 = vadd.f32 %v6342_v22, %v6290_v31 }
 0x5d8   :  { %v6344_v47 = vpop.f32.mrf.mxu1  ;;  %v6397_v34 = vpop.f32.mrf.mxu0 }
 0x5d9   :  { %8557 = vtanh.f32 %v6343_v17  ;;  %v6345_v26 = vadd.f32 %v6344_v47, %v6292_v15  ;;  %v6396_v47 = vadd.f32 %v6395_v57, %v3603_v41 }
 0x5da   :  { %v8546_v19 = vpop.eup %8545 }
 0x5db   :  { %6785 = vst [vmem:[%s9425_s11 + $0x10] sm:$0xff] %v8546_v19  ;;  %8559 = vtanh.f32 %v6345_v26 }
 0x5dc   :  { %v8548_v27 = vpop.eup %8547 }
 0x5dd   :  { %6786 = vst [vmem:[%s9425_s11 + $0x18] sm:$0xff] %v8548_v27 }
 0x5de   :  { %v8550_v58 = vpop.eup %8549 }
 0x5df   :  { %6792 = vst [vmem:[%s9425_s11 + $0x48] sm:$0xff] %v8550_v58 }
 0x5e0   :  { %v8552_v30 = vpop.eup %8551 }
 0x5e1   :  { %6793 = vst [vmem:[%s9425_s11 + $0x50] sm:$0xff] %v8552_v30 }
 0x5e2   :  { %v8554_v45 = vpop.eup %8553 }
 0x5e3   :  { %6799 = vst [vmem:[%s9425_s11 + $0x80] sm:$0xff] %v8554_v45  ;;  %v6398_v45 = vadd.f32 %v6397_v34, %v3607_v29 }
 0x5e4   :  { %v8556_v32 = vpop.eup %8555 }
 0x5e5   :  { %6800 = vst [vmem:[%s9425_s11 + $0x88] sm:$0xff] %v8556_v32 }
 0x5e6   :  { %v8558_v24 = vpop.eup %8557 }
 0x5e7   :  { %6806 = vst [vmem:[%s9425_s11 + $0xb8] sm:$0xff] %v8558_v24 }
 0x5e8   :  { %v8560_v33 = vpop.eup %8559 }
 0x5e9   :  { %6807 = vst [vmem:[%s9425_s11 + $0xc0] sm:$0xff] %v8560_v33 }
 0x60b   :  { %v6487_v4 = vpop.f32.mrf.mxu0  ;;  %v6434_v7 = vpop.f32.mrf.mxu1 }
 0x60c   :  { %v6435_v2 = vadd.f32 %v6434_v7, %v6382_v14 }
 0x60d   :  { %v6489_v55 = vpop.f32.mrf.mxu0  ;;  %v6436_v54 = vpop.f32.mrf.mxu1 }
 0x60e   :  { %v6437_v52 = vadd.f32 %v6436_v54, %v6384_v25  ;;  %v6488_v20 = vadd.f32 %v6487_v4, %v6435_v2  ;;  %v8585_v2 = vld [vmem:[#allocation16] sm:$0xff] }
 0x60f   :  { %v6491_v11 = vpop.f32.mrf.mxu0  ;;  %v6438_v0 = vpop.f32.mrf.mxu1 }
 0x610   :  { %v6439_v35 = vadd.f32 %v6438_v0, %v6386_v21  ;;  %v6490_v46 = vadd.f32 %v6489_v55, %v6437_v52  ;;  %v3611_v21 = vrot.slane %v8585_v2, %v1272_v8 }
 0x611   :  { %v6493_v3 = vpop.f32.mrf.mxu0  ;;  %v6440_v12 = vpop.f32.mrf.mxu1 }
 0x612   :  { %v6441_v31 = vadd.f32 %v6440_v12, %v6388_v44  ;;  %v6492_v22 = vadd.f32 %v6491_v11, %v6439_v35 }
 0x613   :  { %v6497_v39 = vpop.f32.mrf.mxu0  ;;  %v6444_v37 = vpop.f32.mrf.mxu1 }
 0x614   :  { %v6445_v15 = vadd.f32 %v6444_v37, %v6392_v16  ;;  %v6494_v27 = vadd.f32 %v6493_v3, %v6441_v31 }
 0x615   :  { %v6499_v56 = vpop.f32.mrf.mxu0  ;;  %v6446_v43 = vpop.f32.mrf.mxu1 }
 0x616   :  { %v6447_v58 = vadd.f32 %v6446_v43, %v6394_v23  ;;  %v6498_v24 = vadd.f32 %v6497_v39, %v6445_v15 }
 0x617   :  { %v6501_v6 = vpop.f32.mrf.mxu0  ;;  %v6448_v42 = vpop.f32.mrf.mxu1 }
 0x618   :  { %v6449_v33 = vadd.f32 %v6448_v42, %v6396_v47  ;;  %v6500_v62 = vadd.f32 %v6499_v56, %v6447_v58 }
 0x619   :  { %v6503_v10 = vpop.f32.mrf.mxu0  ;;  %v6450_v28 = vpop.f32.mrf.mxu1 }
 0x61a   :  { %v6451_v51 = vadd.f32 %v6450_v28, %v6398_v45  ;;  %v6502_v4 = vadd.f32 %v6501_v6, %v6449_v33 }
 0x61c   :  { %v6504_v7 = vadd.f32 %v6503_v10, %v6451_v51 }
 0x62c   :  { %v9343_v38 = vpop.f32.mrf.mxu0 }
 0x62e   :  { %v9345_v13 = vpop.f32.mrf.mxu0 }
 0x62f   :  { %v7630_v52 = vadd.f32 %v9345_v13, %v9343_v38 }
 0x630   :  { %v9347_v48 = vpop.f32.mrf.mxu0 }
 0x632   :  { %v9349_v59 = vpop.f32.mrf.mxu0 }
 0x633   :  { %v7633_v16 = vadd.f32 %v9349_v59, %v9347_v48 }
 0x634   :  { %v9354_v49 = vpop.f32.mrf.mxu0 }
 0x635   :  { %v6597_v8 = vadd.f32 %v7633_v16, %v3611_v21 }
 0x636   :  { %v9359_v61 = vpop.f32.mrf.mxu0 }
 0x638   :  { %v9361_v9 = vpop.f32.mrf.mxu0 }
 0x63a   :  { %v9363_v50 = vpop.f32.mrf.mxu0 }
 0x64c   :  { %v6540_v1 = vpop.f32.mrf.mxu1 }
 0x64d   :  { %v6541_v63 = vadd.f32 %v6540_v1, %v6488_v20  ;;  %v9365_v26 = vpop.f32.mrf.mxu0  ;;  %v6594_v1 = vadd.f32 %v7630_v52, %v3611_v21 }
 0x64e   :  { %v6542_v18 = vpop.f32.mrf.mxu1 }
 0x64f   :  { %8561 = vtanh.f32 %v6541_v63  ;;  %v6543_v17 = vadd.f32 %v6542_v18, %v6490_v46  ;;  %v7685_v40 = vpop.f32.mrf.mxu0 }
 0x650   :  { %v6544_v19 = vpop.f32.mrf.mxu1  ;;  %v7686_v23 = vadd.f32 %v7685_v40, %v9365_v26 }
 0x651   :  { %8563 = vtanh.f32 %v6543_v17  ;;  %v6545_v30 = vadd.f32 %v6544_v19, %v6492_v22  ;;  %v7687_v11 = vpop.f32.mrf.mxu0 }
 0x652   :  { %v6546_v32 = vpop.f32.mrf.mxu1 }
 0x653   :  { %8565 = vtanh.f32 %v6545_v30  ;;  %v6547_v60 = vadd.f32 %v6546_v32, %v6494_v27  ;;  %v7688_v12 = vpop.f32.mrf.mxu0 }
 0x654   :  { %v6550_v36 = vpop.f32.mrf.mxu1  ;;  %v7689_v47 = vadd.f32 %v7688_v12, %v7687_v11 }
 0x655   :  { %8567 = vtanh.f32 %v6547_v60  ;;  %v6551_v5 = vadd.f32 %v6550_v36, %v6498_v24  ;;  %v7690_v37 = vpop.f32.mrf.mxu0  ;;  %v7636_v24 = vadd.f32 %v9359_v61, %v9354_v49 }
 0x656   :  { %v6552_v57 = vpop.f32.mrf.mxu1 }
 0x657   :  { %8569 = vtanh.f32 %v6551_v5  ;;  %v6553_v55 = vadd.f32 %v6552_v57, %v6500_v62  ;;  %v7691_v43 = vpop.f32.mrf.mxu0  ;;  %v6602_v36 = vadd.f32 %v7636_v24, %v3611_v21  ;;  %v7639_v62 = vadd.f32 %v9363_v50, %v9361_v9 }
 0x658   :  { %v6554_v3 = vpop.f32.mrf.mxu1 }
 0x659   :  { %8571 = vtanh.f32 %v6553_v55  ;;  %v6555_v34 = vadd.f32 %v6554_v3, %v6502_v4  ;;  %v7693_v42 = vpop.f32.mrf.mxu0  ;;  %v6605_v4 = vadd.f32 %v7639_v62, %v3611_v21  ;;  %v7692_v55 = vadd.f32 %v7691_v43, %v7690_v37 }
 0x65a   :  { %v6556_v54 = vpop.f32.mrf.mxu1 }
 0x65b   :  { %8573 = vtanh.f32 %v6555_v34  ;;  %v6557_v39 = vadd.f32 %v6556_v54, %v6504_v7  ;;  %v7694_v28 = vpop.f32.mrf.mxu0 }
 0x65c   :  { %v8562_v0 = vpop.eup %8561  ;;  %v7695_v34 = vadd.f32 %v7694_v28, %v7693_v42 }
 0x65d   :  { %6787 = vst [vmem:[%s9425_s11 + $0x20] sm:$0xff] %v8562_v0  ;;  %8575 = vtanh.f32 %v6557_v39 }
 0x65e   :  { %v8564_v56 = vpop.eup %8563 }
 0x65f   :  { %6788 = vst [vmem:[%s9425_s11 + $0x28] sm:$0xff] %v8564_v56 }
 0x660   :  { %v8566_v6 = vpop.eup %8565 }
 0x661   :  { %6794 = vst [vmem:[%s9425_s11 + $0x58] sm:$0xff] %v8566_v6 }
 0x662   :  { %v8568_v10 = vpop.eup %8567 }
 0x663   :  { %6795 = vst [vmem:[%s9425_s11 + $0x60] sm:$0xff] %v8568_v10 }
 0x664   :  { %v8570_v41 = vpop.eup %8569 }
 0x665   :  { %6801 = vst [vmem:[%s9425_s11 + $0x90] sm:$0xff] %v8570_v41 }
 0x666   :  { %v8572_v29 = vpop.eup %8571 }
 0x667   :  { %6802 = vst [vmem:[%s9425_s11 + $0x98] sm:$0xff] %v8572_v29 }
 0x668   :  { %v8574_v14 = vpop.eup %8573 }
 0x669   :  { %6808 = vst [vmem:[%s9425_s11 + $0xc8] sm:$0xff] %v8574_v14 }
 0x66a   :  { %v8576_v25 = vpop.eup %8575 }
 0x66b   :  { %6809 = vst [vmem:[%s9425_s11 + $0xd0] sm:$0xff] %v8576_v25 }
 0x66d   :  { %v7656_v44 = vpop.f32.mrf.mxu1 }
 0x66e   :  { %v7712_v20 = vpop.f32.mrf.mxu0 }
 0x66f   :  { %v7657_v35 = vpop.f32.mrf.mxu1 }
 0x670   :  { %v7658_v46 = vadd.f32 %v7657_v35, %v7656_v44  ;;  %v7713_v31 = vpop.f32.mrf.mxu0 }
 0x671   :  { %v7659_v63 = vpop.f32.mrf.mxu1  ;;  %v7714_v17 = vadd.f32 %v7713_v31, %v7712_v20 }
 0x672   :  { %v6643_v18 = vadd.f32 %v7658_v46, %v6594_v1  ;;  %v7715_v22 = vpop.f32.mrf.mxu0 }
 0x673   :  { %v7660_v53 = vpop.f32.mrf.mxu1 }
 0x674   :  { %v6692_v15 = vadd.f32 %v7686_v23, %v6643_v18  ;;  %v7661_v38 = vadd.f32 %v7660_v53, %v7659_v63  ;;  %v7716_v13 = vpop.f32.mrf.mxu0 }
 0x675   :  { %v7717_v30 = vadd.f32 %v7716_v13, %v7715_v22  ;;  %v7662_v59 = vpop.f32.mrf.mxu1 }
 0x676   :  { %v6741_v19 = vadd.f32 %v7714_v17, %v6692_v15  ;;  %v6646_v27 = vadd.f32 %v7661_v38, %v6597_v8 }
 0x677   :  { %v7663_v45 = vpop.f32.mrf.mxu1 }
 0x678   :  { %8577 = vtanh.f32 %v6741_v19  ;;  %v6695_v58 = vadd.f32 %v7689_v47, %v6646_v27  ;;  %v7664_v60 = vadd.f32 %v7663_v45, %v7662_v59 }
 0x679   :  { %v7665_v26 = vpop.f32.mrf.mxu1 }
 0x67a   :  { %v6744_v48 = vadd.f32 %v7717_v30, %v6695_v58  ;;  %v6651_v51 = vadd.f32 %v7664_v60, %v6602_v36 }
 0x67b   :  { %v7666_v40 = vpop.f32.mrf.mxu1 }
 0x67c   :  { %8579 = vtanh.f32 %v6744_v48  ;;  %v7667_v5 = vadd.f32 %v7666_v40, %v7665_v26  ;;  %v6700_v7 = vadd.f32 %v7692_v55, %v6651_v51 }
 0x67e   :  { %v6654_v3 = vadd.f32 %v7667_v5, %v6605_v4 }
 0x680   :  { %v6703_v0 = vadd.f32 %v7695_v34, %v6654_v3 }
 0x685   :  { %v8578_v32 = vpop.eup %8577 }
 0x686   :  { %6789 = vst [vmem:[%s9425_s11 + $0x30] sm:$0xff] %v8578_v32 }
 0x689   :  { %v8580_v33 = vpop.eup %8579 }
 0x68a   :  { %6796 = vst [vmem:[%s9425_s11 + $0x68] sm:$0xff] %v8580_v33 }
 0x68e   :  { %v7718_v57 = vpop.f32.mrf.mxu1 }
 0x690   :  { %v7719_v11 = vpop.f32.mrf.mxu1 }
 0x691   :  { %v7720_v49 = vadd.f32 %v7719_v11, %v7718_v57 }
 0x692   :  { %v7721_v61 = vpop.f32.mrf.mxu1 }
 0x693   :  { %v6749_v54 = vadd.f32 %v7720_v49, %v6700_v7 }
 0x694   :  { %v7722_v39 = vpop.f32.mrf.mxu1 }
 0x695   :  { %8581 = vtanh.f32 %v6749_v54  ;;  %v7723_v12 = vadd.f32 %v7722_v39, %v7721_v61 }
 0x697   :  { %v6752_v56 = vadd.f32 %v7723_v12, %v6703_v0 }
 0x699   :  { %8583 = vtanh.f32 %v6752_v56 }
 0x6a2   :  { %v8582_v6 = vpop.eup %8581 }
 0x6a3   :  { %6803 = vst [vmem:[%s9425_s11 + $0xa0] sm:$0xff] %v8582_v6 }
 0x6a6   :  { %v8584_v9 = vpop.eup %8583 }
 0x6a7   :  { %6810 = vst [vmem:[%s9425_s11 + $0xd8] sm:$0xff] %v8584_v9 }
 0x6a8   :  { %6815 = vsyncpa [#allocation3], 1 }
 0x6a9   :  { %6816 = vsyncpa [#allocation5], 1 }
 0x6aa   :  { %6817 = vsyncpa [#allocation8], 1 }
 0x6ab   :  { %6818 = vsyncpa [#allocation11], 1 }
 0x6ac   :  { %6819 = vsyncpa [#allocation14], 1 }
 0x6ad   :  { %6820 = vsyncpa [#allocation17], 1 }

</bundles_post_ra>
